<compile_context>
chip_gen: v6e
topology: v6e:2x2x1
jax: 0.10.0
libtpu: 0.0.40
codegen_flags: <defaults>
</compile_context>

<pallas_src>
import jax
import jax.numpy as jnp
from jax.experimental import pallas as pl
from jax.experimental.pallas import tpu as pltpu


def _round_up(x, m):
    return (x + m - 1) // m * m


# --------------------------------------------------------------------------
# Kernel
# --------------------------------------------------------------------------
def _conv3x3_relu_kernel(x_ref, w_ref, b_ref, o_ref, acc_ref):
    """One (Cout-tile j, tap dy) grid step of a 3x3 same conv + bias + ReLU.

    x_ref:   (N, H+2, Wp, Cin)   zero-padded activations (bf16), whole batch,
                                 resident in VMEM (constant block index).
    w_ref:   (1, 1, 3, Cin, TCO) contiguous weight slab for (tile j, tap dy).
    b_ref:   (1, TCO)            bias slab (f32).
    o_ref:   (N, H, W, TCO)      output tile (resident across dy).
    acc_ref: (N, H, W, TCO)      f32 scratch accumulator.
    """
    dy = pl.program_id(1)
    nb = x_ref.shape[0]
    wp = x_ref.shape[2]
    cin = x_ref.shape[3]
    H, W, tco = o_ref.shape[1], o_ref.shape[2], o_ref.shape[3]

    # Rows dy .. dy+H-1 of the padded activations, batch folded into the matmul
    # M dimension.  wp is a multiple of 8, so the flatten is a free view.
    slab = x_ref[:, pl.ds(dy, H), :, :].reshape(nb * H * wp, cin)

    contrib = None
    for dx in range(3):                      # static unroll over the 3 dx taps
        part = jnp.dot(slab, w_ref[0, 0, dx],
                       preferred_element_type=jnp.float32)
        # dx shift applied once per dx on the narrow tco-wide result.
        part = part.reshape(nb, H, wp, tco)[:, :, dx:dx + W, :]
        contrib = part if contrib is None else contrib + part

    @pl.when(dy == 0)
    def _():
        acc_ref[...] = contrib               # init from first tap (no zero fill)

    @pl.when(dy != 0)
    def _():
        acc_ref[...] = acc_ref[...] + contrib

    @pl.when(dy == pl.num_programs(1) - 1)
    def _():
        out = jnp.maximum(acc_ref[...] + b_ref[...], 0.0)   # bias bcast + ReLU
        o_ref[...] = out.astype(o_ref.dtype)


# --------------------------------------------------------------------------
# Tiling heuristic + weight pre-packing (done once, at param-init time)
# --------------------------------------------------------------------------
def _chip_generation():
    try:
        kind = jax.devices()[0].device_kind.lower()
    except Exception:
        return None
    if "v7" in kind or "tpu7" in kind:
        return "v7x"
    if "v6" in kind or "trillium" in kind:
        return "v6e"
    if "v5" in kind:
        return "v5e"
    return None


def default_cout_tile(cout):
    gen = _chip_generation()
    if gen == "v6e":
        tile = 256                  # single TC: fill the 256-wide MXU N dim
    elif gen == "v7x":
        tile = 256
        if cout // tile < 2:        # keep >= 2 "parallel" steps for the 2 TCs
            tile = 128
    else:                           # v5e / unknown: 128-wide MXU
        tile = 128
    tile = min(tile, cout)
    while tile > 8 and cout % tile:
        tile //= 2
    return tile


def pack_conv3x3_params(w_hwio, b, tco=None, compute_dtype=jnp.bfloat16):
    """Pre-pack HWIO weights tile-major + bf16, once.

    Returns (w_packed, b_packed, tco) with
      w_packed: (Cout//tco, 3, 3, Cin, tco) compute_dtype  (contiguous per-step slab)
      b_packed: (1, Cout) f32
    """
    kh, kw, cin, cout = w_hwio.shape
    assert (kh, kw) == (3, 3)
    if tco is None:
        tco = default_cout_tile(cout)
    assert cout % tco == 0, "Cout must be divisible by the Cout tile"
    n_tiles = cout // tco
    w_packed = jnp.transpose(
        w_hwio.reshape(3, 3, cin, n_tiles, tco), (3, 0, 1, 2, 4))
    w_packed = w_packed.astype(compute_dtype)
    b_packed = b.reshape(1, cout).astype(jnp.float32)
    return w_packed, b_packed, tco


# --------------------------------------------------------------------------
# Wrapper
# --------------------------------------------------------------------------
def conv3x3_relu_pallas(x_nhwc, w_packed, b_packed, *,
                        compute_dtype=jnp.bfloat16, out_dtype=jnp.float32):
    """3x3 same-padding conv + bias + ReLU.  NHWC in / NHWC out.

    w_packed / b_packed come from pack_conv3x3_params (tile-major bf16).
    out_dtype may be set to bfloat16 if the KD loss tolerates it (halves
    output writeback bytes); defaults to f32 to match the PyTorch module.
    """
    N, H, W, cin = x_nhwc.shape
    n_tiles, kh, kw, cin_w, tco = w_packed.shape
    assert (kh, kw, cin_w) == (3, 3, cin)
    cout = n_tiles * tco
    assert b_packed.shape == (1, cout)

    # Same-padding plus a right pad so the padded width is a multiple of 8
    # sublanes: in-kernel row slices / flattens become free views.  The extra
    # zero columns never reach the output (they are sliced away per dx).
    wp = _round_up(W + 2, 8)
    x_pad = jnp.pad(
        x_nhwc, ((0, 0), (1, 1), (1, wp - W - 1), (0, 0))).astype(compute_dtype)

    grid = (n_tiles, 3)   # (Cout tiles -> parallel, dy taps -> reduction)
    return pl.pallas_call(
        _conv3x3_relu_kernel,
        out_shape=jax.ShapeDtypeStruct((N, H, W, cout), out_dtype),
        grid_spec=pltpu.PrefetchScalarGridSpec(
            num_scalar_prefetch=0,
            grid=grid,
            in_specs=[
                # whole padded batch; constant block index -> DMA'd once.
                pl.BlockSpec((N, H + 2, wp, cin), lambda j, dy: (0, 0, 0, 0)),
                # one contiguous (3, Cin, tco) weight slab per (tile, dy) step.
                pl.BlockSpec((1, 1, 3, cin, tco),
                             lambda j, dy: (j, dy, 0, 0, 0)),
                pl.BlockSpec((1, tco), lambda j, dy: (0, j)),
            ],
            out_specs=pl.BlockSpec((N, H, W, tco),
                                   lambda j, dy: (0, 0, 0, j)),
            scratch_shapes=[pltpu.VMEM((N, H, W, tco), jnp.float32)],
        ),
        compiler_params=pltpu.CompilerParams(
            dimension_semantics=("parallel", "arbitrary"),
            vmem_limit_bytes=32 << 20,   # safe within v7x's 64 MiB physical VMEM
        ),
    )(x_pad, w_packed, b_packed)


# --------------------------------------------------------------------------
# Module-equivalent parameter init + forward
# --------------------------------------------------------------------------
def init_feature_adaptation_params(key, tco=None):
    """Deterministic synthetic params for the three adaptation layers.

    Keeps the original f32 HWIO weights (for reference checks) and the
    pre-packed bf16 tile-major weights used by the kernel.
    """
    params = {}
    for layer, c in ((1, 256), (2, 512), (3, 1024)):
        key, kw_key, kb_key = jax.random.split(key, 3)
        fan_in = 3 * 3 * c
        w = jax.random.normal(kw_key, (3, 3, c, c), jnp.float32) / (fan_in ** 0.5)
        b = 0.01 * jax.random.normal(kb_key, (c,), jnp.float32)
        w_packed, b_packed, layer_tco = pack_conv3x3_params(w, b, tco=tco)
        params[layer] = dict(w=w, b=b, w_packed=w_packed, b_packed=b_packed,
                             tco=layer_tco)
    return params


def feature_adaptation_forward_nhwc(x_nhwc, params, layer):
    """NHWC-native path (preferred in a training loop: no layout round-trips)."""
    p = params[layer]
    return conv3x3_relu_pallas(x_nhwc, p["w_packed"], p["b_packed"])


def feature_adaptation_forward(features_nchw, params, layer):
    """Equivalent of FeatureAdaptation.forward(features, layer). NCHW in/out."""
    x_nhwc = jnp.transpose(features_nchw, (0, 2, 3, 1))
    y_nhwc = feature_adaptation_forward_nhwc(x_nhwc, params, layer)
    return jnp.transpose(y_nhwc, (0, 3, 1, 2))


# --------------------------------------------------------------------------
# Pure-JAX reference (lax conv) for self-checking
# --------------------------------------------------------------------------
def _reference_forward(features_nchw, params, layer,
                       compute_dtype=jnp.float32):
    """With compute_dtype=bfloat16 it uses the same quantized operands as the
    kernel (only summation order differs)."""
    w, b = params[layer]["w"], params[layer]["b"]
    x = jnp.transpose(features_nchw, (0, 2, 3, 1))
    x = x.astype(compute_dtype).astype(jnp.float32)
    wf = w.astype(compute_dtype).astype(jnp.float32)
    y = jax.lax.conv_general_dilated(
        x, wf, window_strides=(1, 1), padding="SAME",
        dimension_numbers=("NHWC", "HWIO", "NHWC"))
    y = jnp.maximum(y + b[None, None, None, :], 0.0)
    return jnp.transpose(y, (0, 3, 1, 2))


if __name__ == "__main__":
    key = jax.random.PRNGKey(0)
    key, k1, k2, k3 = jax.random.split(key, 4)
    params = init_feature_adaptation_params(key)

    # Channel counts are fixed by the module's __init__; spatial kept small.
    inputs = {
        1: jax.random.normal(k1, (2, 256, 16, 16), jnp.float32),
        2: jax.random.normal(k2, (2, 512, 8, 8), jnp.float32),
        3: jax.random.normal(k3, (2, 1024, 8, 8), jnp.float32),
    }

    ok = True
    for layer in (1, 2, 3):
        out = jax.block_until_ready(
            feature_adaptation_forward(inputs[layer], params, layer))
        if out.shape != inputs[layer].shape:
            ok = False

        # Structural check: same bf16-rounded operands, f32 accumulation ->
        # only summation order differs.
        ref_bf16 = jax.block_until_ready(
            _reference_forward(inputs[layer], params, layer,
                               compute_dtype=jnp.bfloat16))
        if not bool(jnp.allclose(out, ref_bf16, atol=3e-3, rtol=3e-3)):
            ok = False

        # Sanity check vs. the full-f32 PyTorch-equivalent conv (bf16 operand
        # quantization is the only intended difference; loose tolerance).
        ref_f32 = jax.block_until_ready(
            _reference_forward(inputs[layer], params, layer,
                               compute_dtype=jnp.float32))
        if not bool(jnp.allclose(out, ref_f32, atol=1e-1, rtol=1e-1)):
            ok = False

    print("KERNEL_OK" if ok else "KERNEL_MISMATCH")
</pallas_src>

<mosaic_0001>
module attributes {stable_mosaic.version = 11 : i64} {
  func.func @_conv3x3_relu_kernel(%arg0: i32, %arg1: i32, %arg2: memref<2x18x24x256xbf16, #tpu.memory_space<vmem>>, %arg3: memref<1x1x3x256x128xbf16, #tpu.memory_space<vmem>>, %arg4: memref<1x128xf32, #tpu.memory_space<vmem>>, %arg5: memref<2x16x16x128xf32, #tpu.memory_space<vmem>>, %arg6: memref<2x16x16x128xf32, #tpu.memory_space<vmem>>) attributes {dimension_semantics = [#tpu.dimension_semantics<parallel>, #tpu.dimension_semantics<arbitrary>], iteration_bounds = array<i64: 2, 3>, scalar_prefetch = 0 : i64, scratch_operands = 1 : i64, tpu.core_type = #tpu.core_type<tc>, window_params = [{pipeline_mode = #tpu.pipeline_mode<synchronous>, transform_indices = @transform_0, window_bounds = array<i64: 2, 18, 24, 256>}, {transform_indices = @transform_1, window_bounds = array<i64: 1, 1, 3, 256, 128>}, {transform_indices = @transform_2, window_bounds = array<i64: 1, 128>}, {transform_indices = @transform_3, window_bounds = array<i64: 2, 16, 16, 128>}]} {
    %c0 = arith.constant 0 : index
    %0 = arith.index_cast %arg1 : i32 to index
    %c0_0 = arith.constant 0 : index
    %c0_1 = arith.constant 0 : index
    %1 = vector.load %arg2[%c0, %0, %c0_0, %c0_1] : memref<2x18x24x256xbf16, #tpu.memory_space<vmem>>, vector<2x16x24x256xbf16>
    %2 = vector.shape_cast %1 : vector<2x16x24x256xbf16> to vector<768x256xbf16>
    %c0_2 = arith.constant 0 : index
    %c0_3 = arith.constant 0 : index
    %c0_4 = arith.constant 0 : index
    %c0_5 = arith.constant 0 : index
    %c0_6 = arith.constant 0 : index
    %3 = vector.load %arg3[%c0_2, %c0_3, %c0_4, %c0_5, %c0_6] : memref<1x1x3x256x128xbf16, #tpu.memory_space<vmem>>, vector<1x1x1x256x128xbf16>
    %4 = vector.shape_cast %3 : vector<1x1x1x256x128xbf16> to vector<256x128xbf16>
    %cst = arith.constant dense<0.000000e+00> : vector<768x128xf32>
    %5 = tpu.matmul %2, %4, %cst {dimension_numbers = #tpu.dot_dimension_numbers<[1], [0], [0], [1], [0, 0, 1, 1], [], []>} : vector<768x256xbf16>, vector<256x128xbf16>, vector<768x128xf32> -> vector<768x128xf32>
    %6 = vector.shape_cast %5 : vector<768x128xf32> to vector<2x16x24x128xf32>
    %7 = vector.extract_strided_slice %6 {offsets = [0, 0, 0, 0], sizes = [2, 16, 16, 128], strides = [1, 1, 1, 1]} : vector<2x16x24x128xf32> to vector<2x16x16x128xf32>
    %c0_7 = arith.constant 0 : index
    %c0_8 = arith.constant 0 : index
    %c1 = arith.constant 1 : index
    %c0_9 = arith.constant 0 : index
    %c0_10 = arith.constant 0 : index
    %8 = vector.load %arg3[%c0_7, %c0_8, %c1, %c0_9, %c0_10] : memref<1x1x3x256x128xbf16, #tpu.memory_space<vmem>>, vector<1x1x1x256x128xbf16>
    %9 = vector.shape_cast %8 : vector<1x1x1x256x128xbf16> to vector<256x128xbf16>
    %cst_11 = arith.constant dense<0.000000e+00> : vector<768x128xf32>
    %10 = tpu.matmul %2, %9, %cst_11 {dimension_numbers = #tpu.dot_dimension_numbers<[1], [0], [0], [1], [0, 0, 1, 1], [], []>} : vector<768x256xbf16>, vector<256x128xbf16>, vector<768x128xf32> -> vector<768x128xf32>
    %11 = vector.shape_cast %10 : vector<768x128xf32> to vector<2x16x24x128xf32>
    %12 = vector.extract_strided_slice %11 {offsets = [0, 0, 1, 0], sizes = [2, 16, 16, 128], strides = [1, 1, 1, 1]} : vector<2x16x24x128xf32> to vector<2x16x16x128xf32>
    %13 = arith.addf %7, %12 : vector<2x16x16x128xf32>
    %c0_12 = arith.constant 0 : index
    %c0_13 = arith.constant 0 : index
    %c2 = arith.constant 2 : index
    %c0_14 = arith.constant 0 : index
    %c0_15 = arith.constant 0 : index
    %14 = vector.load %arg3[%c0_12, %c0_13, %c2, %c0_14, %c0_15] : memref<1x1x3x256x128xbf16, #tpu.memory_space<vmem>>, vector<1x1x1x256x128xbf16>
    %15 = vector.shape_cast %14 : vector<1x1x1x256x128xbf16> to vector<256x128xbf16>
    %cst_16 = arith.constant dense<0.000000e+00> : vector<768x128xf32>
    %16 = tpu.matmul %2, %15, %cst_16 {dimension_numbers = #tpu.dot_dimension_numbers<[1], [0], [0], [1], [0, 0, 1, 1], [], []>} : vector<768x256xbf16>, vector<256x128xbf16>, vector<768x128xf32> -> vector<768x128xf32>
    %17 = vector.shape_cast %16 : vector<768x128xf32> to vector<2x16x24x128xf32>
    %18 = vector.extract_strided_slice %17 {offsets = [0, 0, 2, 0], sizes = [2, 16, 16, 128], strides = [1, 1, 1, 1]} : vector<2x16x24x128xf32> to vector<2x16x16x128xf32>
    %19 = arith.addf %13, %18 : vector<2x16x16x128xf32>
    %c0_i32 = arith.constant 0 : i32
    %20 = arith.cmpi eq, %arg1, %c0_i32 : i32
    %21 = arith.extui %20 : i1 to i32
    %c0_i32_17 = arith.constant 0 : i32
    %22 = arith.cmpi ne, %21, %c0_i32_17 : i32
    scf.if %22 {
      %c0_21 = arith.constant 0 : index
      %c0_22 = arith.constant 0 : index
      %c0_23 = arith.constant 0 : index
      %c0_24 = arith.constant 0 : index
      %29 = vector.load %arg6[%c0_21, %c0_22, %c0_23, %c0_24] : memref<2x16x16x128xf32, #tpu.memory_space<vmem>>, vector<2x16x16x128xf32>
      tpu.vector_store %arg6[%c0_21, %c0_22, %c0_23, %c0_24], %19 {strides = array<i32>} : memref<2x16x16x128xf32, #tpu.memory_space<vmem>>, vector<2x16x16x128xf32>,
    } else {
    }
    %c0_i32_18 = arith.constant 0 : i32
    %23 = arith.cmpi ne, %arg1, %c0_i32_18 : i32
    %24 = arith.extui %23 : i1 to i32
    %c0_i32_19 = arith.constant 0 : i32
    %25 = arith.cmpi ne, %24, %c0_i32_19 : i32
    scf.if %25 {
      %c0_21 = arith.constant 0 : index
      %c0_22 = arith.constant 0 : index
      %c0_23 = arith.constant 0 : index
      %c0_24 = arith.constant 0 : index
      %29 = vector.load %arg6[%c0_21, %c0_22, %c0_23, %c0_24] : memref<2x16x16x128xf32, #tpu.memory_space<vmem>>, vector<2x16x16x128xf32>
      %30 = arith.addf %29, %19 : vector<2x16x16x128xf32>
      %c0_25 = arith.constant 0 : index
      %c0_26 = arith.constant 0 : index
      %c0_27 = arith.constant 0 : index
      %c0_28 = arith.constant 0 : index
      %31 = vector.load %arg6[%c0_25, %c0_26, %c0_27, %c0_28] : memref<2x16x16x128xf32, #tpu.memory_space<vmem>>, vector<2x16x16x128xf32>
      tpu.vector_store %arg6[%c0_25, %c0_26, %c0_27, %c0_28], %30 {strides = array<i32>} : memref<2x16x16x128xf32, #tpu.memory_space<vmem>>, vector<2x16x16x128xf32>,
    } else {
    }
    %c2_i32 = arith.constant 2 : i32
    %26 = arith.cmpi eq, %arg1, %c2_i32 : i32
    %27 = arith.extui %26 : i1 to i32
    %c0_i32_20 = arith.constant 0 : i32
    %28 = arith.cmpi ne, %27, %c0_i32_20 : i32
    scf.if %28 {
      %c0_21 = arith.constant 0 : index
      %c0_22 = arith.constant 0 : index
      %c0_23 = arith.constant 0 : index
      %c0_24 = arith.constant 0 : index
      %29 = vector.load %arg6[%c0_21, %c0_22, %c0_23, %c0_24] : memref<2x16x16x128xf32, #tpu.memory_space<vmem>>, vector<2x16x16x128xf32>
      %c0_25 = arith.constant 0 : index
      %c0_26 = arith.constant 0 : index
      %30 = vector.load %arg4[%c0_25, %c0_26] : memref<1x128xf32, #tpu.memory_space<vmem>>, vector<1x128xf32>
      %31 = vector.shape_cast %30 : vector<1x128xf32> to vector<1x1x1x128xf32>
      %32 = vector.broadcast %31 : vector<1x1x1x128xf32> to vector<2x16x16x128xf32>
      %33 = arith.addf %29, %32 : vector<2x16x16x128xf32>
      %cst_27 = arith.constant 0.000000e+00 : f32
      %34 = vector.broadcast %cst_27 : f32 to vector<2x16x16x128xf32>
      %35 = arith.maximumf %33, %34 : vector<2x16x16x128xf32>
      %c0_28 = arith.constant 0 : index
      %c0_29 = arith.constant 0 : index
      %c0_30 = arith.constant 0 : index
      %c0_31 = arith.constant 0 : index
      %36 = vector.load %arg5[%c0_28, %c0_29, %c0_30, %c0_31] : memref<2x16x16x128xf32, #tpu.memory_space<vmem>>, vector<2x16x16x128xf32>
      tpu.vector_store %arg5[%c0_28, %c0_29, %c0_30, %c0_31], %35 {strides = array<i32>} : memref<2x16x16x128xf32, #tpu.memory_space<vmem>>, vector<2x16x16x128xf32>,
    } else {
    }
    return
  }
  func.func @transform_0(%arg0: i32, %arg1: i32) -> (i32, i32, i32, i32) {
    %c0_i32 = arith.constant 0 : i32
    %c0_i32_0 = arith.constant 0 : i32
    %c0_i32_1 = arith.constant 0 : i32
    %c0_i32_2 = arith.constant 0 : i32
    %c0_i32_3 = arith.constant 0 : i32
    return %c0_i32, %c0_i32_0, %c0_i32_1, %c0_i32_2 : i32, i32, i32, i32
  }
  func.func @transform_1(%arg0: i32, %arg1: i32) -> (i32, i32, i32, i32, i32) {
    %c0_i32 = arith.constant 0 : i32
    %c0_i32_0 = arith.constant 0 : i32
    %c0_i32_1 = arith.constant 0 : i32
    %c0_i32_2 = arith.constant 0 : i32
    return %arg0, %arg1, %c0_i32, %c0_i32_0, %c0_i32_1 : i32, i32, i32, i32, i32
  }
  func.func @transform_2(%arg0: i32, %arg1: i32) -> (i32, i32) {
    %c0_i32 = arith.constant 0 : i32
    %c0_i32_0 = arith.constant 0 : i32
    return %c0_i32, %arg0 : i32, i32
  }
  func.func @transform_3(%arg0: i32, %arg1: i32) -> (i32, i32, i32, i32) {
    %c0_i32 = arith.constant 0 : i32
    %c0_i32_0 = arith.constant 0 : i32
    %c0_i32_1 = arith.constant 0 : i32
    %c0_i32_2 = arith.constant 0 : i32
    return %c0_i32, %c0_i32_0, %c0_i32_1, %arg0 : i32, i32, i32, i32
  }
}

</mosaic_0001>

<bundles_post_ra>
// kernel: tpu_custom_call.1
= control target key start
LH: loop header
LB: loop body
LE: loop exit
PB: predicated region body
PF: predicated region fallthrough
CT: control target
= control target key end

     0   :  { %s6225_s0 = inlined_call_operand.hbm [shape: bf16[2,18,24,256], index: 0, kind: input, shape index: {}]   ;;  %s6226_s1 = inlined_call_operand.hbm [shape: bf16[2,3,3,256,128], index: 1, kind: input, shape index: {}]   ;;  %s6227_s2 = inlined_call_operand.hbm [shape: f32[1,256], index: 2, kind: input, shape index: {}]   ;;  %s6228_s3 = inlined_call_operand.hbm [shape: f32[2,16,16,256], index: 3, kind: output, shape index: {}]  }
   0x1   :  { %6236 = sst [smem:[#allocation39_spill]] %s6225_s0 }
   0x2   :  { %6237 = sst [smem:[#allocation40_spill]] %s6226_s1 }
   0x3   :  { %8 = vsyncpa [#allocation4], 0 }
   0x4   :  { %9 = vsyncpa [#allocation7], 0 }
   0x5   :  { %11 = vsyncpa [#allocation7 + $0x1], 0 }
   0x6   :  { %12 = vsyncpa [#allocation5], 0 }
   0x7   :  { %14 = vsyncpa [#allocation5 + $0x1], 0  ;;  %s4742_s12 = smov 0   ;;  %s4744_s13 = smov 0  }
   0x8   :  { %s4746_s14 = smov 0   ;;  %s4748_s15 = smov 0  }
   0x9   :  { %s4750_s16 = smov 0   ;;  %s4752_s17 = smov 0  }
   0xa   :  { %s4754_s18 = smov 0   ;;  %s4756_s19 = smov 0  }
   0xb   :  { %s4758_s20 = smov 0   ;;  %s4760_s21 = smov 0  }
   0xc   :  { %s4762_s22 = smov 0  }
   0xd LB: > { %6238 = sst [smem:[#allocation14_spill]] %s4700_s20  ;;  %s29_s23 = sadd.s32 1, %s4700_s20  ;;  %s4708_s22 = sphi %s4762_s22, %s20_s22   ;;  %s4704_s21 = sphi %s4760_s21, %s6364_s21   ;;  %s4700_s20 = sphi %s4758_s20, %s6355_s20   ;;  %s4696_s19 = sphi %s4756_s19, %s6363_s19   ;;  %s4692_s18 = sphi %s4754_s18, %s6354_s18   ;;  %s4688_s17 = sphi %s4752_s17, %s6362_s17   ;;  %s4684_s16 = sphi %s4750_s16, %s6361_s16   ;;  %s4680_s15 = sphi %s4748_s15, %s6360_s15   ;;  %s4676_s14 = sphi %s4746_s14, %s6359_s14   ;;  %s4672_s13 = sphi %s4744_s13, %s6358_s13   ;;  %s4668_s12 = sphi %s4742_s12, %s6357_s12  }
   0xe   : > { %s32_s24 = sadd.s32 1, %s4704_s21  ;;  %p30_p0 = scmp.ge.s32.totalorder %s29_s23, 3 }
   0xf   : > { %s62_s25 = sadd.s32 1, %s4688_s17  ;;  %p69_p1 = scmp.ne.s32.totalorder %s4688_s17, %s4684_s16 }
  0x10   : > { %p6233_p2 = scmp.eq.s32.totalorder %s4708_s22, 0  ;;  %s6366_s23 = smov (%p30_p0, %s29_s23), 0 }
  0x11   : > { %6239 = sst [smem:[#allocation15_spill]] %s6366_s23  ;;  %s6368_s24 = smov (!%p30_p0, %s32_s24), %s4704_s21 }
  0x12   : > { %s58_s26 = ssub.s32 %s4700_s20, %s6366_s23  ;;  %p4810_p3 = por %p6233_p2, %p69_p1 }
  0x13   : > { %p34_p4 = scmp.ge.s32.totalorder %s6368_s24, 2  ;;  %p6232_p5 = scmp.lt.s32.totalorder %s4708_s22, 6 }
  0x14   : > { %s164_s28 = sand.u32 1, %s4708_s22   ;;  %s166_s29 = sand.u32 1, %s4688_s17  }
  0x15   : > { %s6370_s24 = smov (%p34_p4, %s6368_s24), 0  ;;  %s4128_s4 = smul.u32 384, %s166_s29 }
  0x16   : > { %6241 = sst [smem:[#allocation16_spill]] %s6370_s24  ;;  %s4821_s30 = ssub.s32 %s4704_s21, %s6370_s24 }
  0x17   : > { %s59_s5 = sor.u32 %s58_s26, %s4821_s30  ;;  %s4129_s6 = smul.u32 96, %s4700_s20 }
  0x18   : > { %p60_p7 = scmp.eq.s32.totalorder %s59_s5, 0  ;;  %s168_s7 = scalar_lea.vmem [#allocation6], %s4128_s4 }
  0x19   : > { %s177_s8 = sshll.u32 %s168_s7, 4  ;;  %s4130_s10 = smul.u32 288, %s4704_s21  ;;  %s178_s8 = int_to_ptr.vmem [resolvable:$true] %s177_s8 }
  0x1a   : > { %s4827_s9 = scalar_select %p60_p7, %s4688_s17, %s62_s25  }
  0x1b   : > { %p4834_p8 = pnand %p6232_p5, %p4810_p3  ;;  %s174_s24 = sadd.s32 %s4130_s10, %s4129_s6 }
  0x1c   : > { %s3873_s23 = sshll.u32 %s174_s24, 6  ;;  %s6243_s1 = sld [smem:[#allocation40_spill]] }
  0x1d   : > { %s4841_s20 = scalar_lea.sflag [#allocation7], %s164_s28  ;;  %p4500_p9 = pneg %p4834_p8 }
  0x1e   : > { %s4511_s25 = scalar_lea.vmem %s178_s8, 6144  ;;  %s4710_s27 = smov [#allocation6]  }
  0x1f   : > { %p4512_p10 = scmp.ne.s32.totalorder %s178_s8, %s4511_s25  ;;  %s4516_s4 = sshll.u32 %s4710_s27, 4  ;;  %s4517_s4 = int_to_ptr.vmem [resolvable:$false] %s4516_s4 }
  0x20   : > { %s4518_s7 = scalar_lea.vmem %s4517_s4, 12288  ;;  %p4519_p13 = scmp.lt.s32.totalorder %s178_s8, %s4517_s4 }
  0x21   : > { %p4514_p11 = pnand %p4512_p10, %p4500_p9  ;;  %p4520_p0 = scmp.lt.s32.totalorder %s4518_s7, %s4511_s25 }
  0x22   : > { %s176_s5 = scalar_lea.hbm %s6243_s1, %s3873_s23 }
  0x23   : > { %p4515_p12 = pneg %p4514_p11  ;;  %p4521_p1 = por %p4520_p0, %p4519_p13 }
  0x25   : > { %p4522_p3 = pnand %p4521_p1, %p4515_p12 }
  0x27   : > { %4525 = shalt.err (!%p4522_p3)
}
  0x28   : > { %s4711_s24 = smov 64   ;;  %s4712_s23 = smov 4  }
  0x29   : > { %4149 = dma.hbm_to_vmem [thread:$0]  (!%p4834_p8), %s176_s5, 6144, %s178_s8, %s4841_s20, %s4711_s24, %s4711_s24, %s4712_s23  }
  0x2a   : > { %s4849_s28 = sadd.s32 4294967295, %s4708_s22   ;;  %p75_p4 = scmp.ne.s32.totalorder %s4684_s16, %s4680_s15 }
  0x2b   : > { %p6234_p7 = scmp.eq.s32.totalorder %s4849_s28, 0  ;;  %p3870_p10 = scmp.ge.s32.totalorder %s4708_s22, 1 }
  0x2c   : > { %p138_p12 = scmp.lt.s32.totalorder %s4708_s22, 7  ;;  %s4713_s8 = smov [#allocation3]  }
  0x2d   : > { %p4858_p11 = por %p6234_p7, %p75_p4  ;;  %s150_s11 = sshll.u32 %s4713_s8, 4  ;;  %s151_s11 = int_to_ptr.vmem [resolvable:$true] %s150_s11 }
  0x2e   : > { %p4863_p13 = pnand %p3870_p10, %p138_p12  ;;  %s4537_s15 = scalar_lea.vmem %s151_s11, 13824 }
  0x2f   : > { %p4538_p3 = scmp.ne.s32.totalorder %s151_s11, %s4537_s15  ;;  %p4545_p9 = scmp.lt.s32.totalorder %s151_s11, %s151_s11 }
  0x30   : > { %p4142_p8 = pneg %p4863_p13  ;;  %p4546_p2 = scmp.lt.s32.totalorder %s4537_s15, %s4537_s15 }
  0x32   : > { %p4143_p0 = pnand %p4142_p8, %p6234_p7  ;;  %p4547_p6 = por %p4546_p2, %p4545_p9 }
  0x34   : > { %p4528_p1 = pneg %p4143_p0 }
  0x36   : > { %p4540_p4 = pnand %p4538_p3, %p4528_p1 }
  0x38   : > { %p4541_p5 = pneg %p4540_p4 }
  0x3a   : > { %p4548_p10 = pnand %p4547_p6, %p4541_p5 }
  0x3c   : > { %4551 = shalt.err (!%p4548_p10)
}
  0x3d   : > { %s4714_s29 = smov 128   ;;  %s4715_s26 = smov 8  }
  0x3e   : > { %s6246_s0 = sld [smem:[#allocation39_spill]]  ;;  %s3869_s27 = sadd.s32 4294967294, %s4708_s22  }
  0x3f   : > { %s88_s4 = sadd.s32 1, %s4676_s14  ;;  %p6247_p2 = scmp.eq.s32.totalorder %s4821_s30, 0 }
  0x40   : > { %p95_p5 = scmp.ne.s32.totalorder %s4676_s14, %s4672_s13  ;;  %p101_p6 = scmp.ne.s32.totalorder %s4672_s13, %s4668_s12 }
  0x41   : > { %s4879_s7 = scalar_select %p6247_p2, %s4676_s14, %s88_s4  }
  0x42   : > { %p131_p9 = scmp.eq.s32.totalorder %s3869_s27, 5  ;;  %s189_s24 = sand.u32 1, %s4676_s14  }
  0x43   : > { %p6248_p12 = scmp.eq.s32.totalorder %s4708_s22, 0  ;;  %p4890_p1 = por %p101_p6, %p6234_p7 }
  0x44   : > { %4145 = dma.hbm_to_vmem [thread:$0]  (!%p4143_p0), %s6246_s0, 13824, %s151_s11, [#allocation4], %s4714_s29, %s4714_s29, %s4715_s26  }
  0x45   : > { %p97_p8 = por %p95_p5, %p6248_p12  ;;  %p6250_p3 = scmp.eq.s32.totalorder %s4849_s28, 5 }
  0x46   : > { %p4900_p0 = por %p131_p9, %p101_p6  ;;  %s3874_s11 = sshll.u32 %s4704_s21, 4 }
  0x47   : > { %p4896_p4 = por %p6250_p3, %p95_p5  ;;  %s195_s26 = scalar_lea.hbm %s6227_s2, %s3874_s11 }
  0x48   : > { %s6252_s30 = scalar_select %p4900_p0, 1, 0 }
  0x49   : > { %s6251_s8 = scalar_select %p4896_p4, 1, 0 }
  0x4a   : > { %s190_s5 = scalar_lea.vmem [#allocation8], %s189_s24  ;;  %p6253_p10 = scmp.lt.s32.totalorder %s4708_s22, 6 }
  0x4b   : > { %s197_s25 = sshll.u32 %s190_s5, 4  ;;  %s4716_s0 = smov [#allocation8]   ;;  %s198_s25 = int_to_ptr.vmem [resolvable:$true] %s197_s25 }
  0x4c   : > { %p4910_p2 = pnand %p6253_p10, %p97_p8  ;;  %s4565_s4 = scalar_lea.vmem %s198_s25, 16 }
  0x4d   : > { %p4566_p6 = scmp.ne.s32.totalorder %s198_s25, %s4565_s4  ;;  %s4570_s1 = sshll.u32 %s4716_s0, 4  ;;  %s4571_s1 = int_to_ptr.vmem [resolvable:$false] %s4570_s1 }
  0x4e   : > { %p4554_p5 = pneg %p4910_p2  ;;  %s4572_s15 = scalar_lea.vmem %s4571_s1, 32 }
  0x4f   : > { %p4573_p3 = scmp.lt.s32.totalorder %s198_s25, %s4571_s1  ;;  %p4574_p7 = scmp.lt.s32.totalorder %s4572_s15, %s4565_s4 }
  0x50   : > { %p4568_p9 = pnand %p4566_p6, %p4554_p5 }
  0x51   : > { %p4575_p0 = por %p4574_p7, %p4573_p3 }
  0x52   : > { %p4569_p12 = pneg %p4568_p9 }
  0x54   : > { %p4576_p4 = pnand %p4575_p0, %p4569_p12 }
  0x56   : > { %4579 = shalt.err (!%p4576_p4)
}
  0x57   : > { %4152 = dma.hbm_to_vmem [thread:$0]  (!%p4910_p2), %s195_s26, 16, %s198_s25, %s4841_s20  }
  0x58   : > { %206 = sbr.rel (%p4863_p13) target bundleno = 1089 (0x441), region = 32 }
  0x5d   : > { %p6255_p8 = scmp.eq.s32.totalorder %s4849_s28, 0 }
  0x5f   : > { %4651 = dma.done.wait (%p6255_p8), [#allocation4], 13824   ;;  %p6256_p10 = pmov %p6255_p8 }
  0x60   : > { %s212_s0 = sand.u32 1, %s4849_s28   ;;  %s214_s1 = sand.u32 1, %s4684_s16  }
  0x61   : > { %4653 = vsyncadd (%p6256_p10), [#allocation4], 4294953472  ;;  %s4131_s24 = smul.u32 384, %s214_s1  ;;  %s213_s11 = scalar_lea.sflag [#allocation7], %s212_s0 }
  0x63   : > { %s4927_s29 = scalar_lea.vmem [#allocation6], %s4131_s24 }
  0x64   : > { %4655 = dma.done.wait (%p4858_p11), %s213_s11, 6144  }
  0x65   : > { %4657 = vsyncadd (%p4858_p11), %s213_s11, 4294961152  ;;  %s4934_s20 = sand.u32 1, %s4672_s13  }
  0x66   : > { %s224_s10 = scalar_lea.vmem [#allocation8], %s4934_s20 }
  0x67   : > { %4659 = dma.done.wait (%p4890_p1), %s213_s11, 16  }
  0x68   : > { %4661 = vsyncadd (%p4890_p1), %s213_s11, 4294967280  ;;  %s3877_s28 = sshll.u32 %s4934_s20, 9  ;;  %v4717_v0 = vmov 0   ;;  %v4258_v1 = vld [vmem:[%s4927_s29 + $0x38] sm:$0xff]   ;;  %v4259_v2 = vld [vmem:[%s4927_s29 + $0x30] sm:$0xff]   ;;  %s4095_s6 = smul.u32 24, %s4692_s18 }
  0x69   : > { %959 = vmatprep.subr.bf16.mxu0 %v4717_v0  ;;  %4096 = vmatprep.subr.bf16.mxu1 %v4717_v0  ;;  %v4260_v3 = vld [vmem:[%s4927_s29 + $0x28] sm:$0xff]   ;;  %v4261_v4 = vld [vmem:[%s4927_s29 + $0x20] sm:$0xff]   ;;  %v4262_v5 = vld [vmem:[%s4927_s29 + $0x18] sm:$0xff]   ;;  %vm1986_vm0 = vcmask 1046528   ;;  %vm2917_vm1 = vcmask 1045504   ;;  %s5891_s26 = scalar_lea.vmem [#allocation9], %s3877_s28 }
  0x6a   : > { %960 = vmatpush1.bf16.msra.mxu0 %v4258_v1  ;;  %4112 = vmatpush1.bf16.msra.mxu1 %v4258_v1  ;;  %s4958_s23 = scalar_lea.vmem [#allocation3], %s4095_s6  ;;  %v4263_v8 = vld [vmem:[%s4927_s29 + $0x10] sm:$0xff]   ;;  %v4264_v9 = vld [vmem:[%s4927_s29 + $0x8] sm:$0xff]   ;;  %v4265_v10 = vld [vmem:[%s4927_s29] sm:$0xff]   ;;  %p4087_p7 = scmp.ne.s32.totalorder %s4692_s18, 0 }
  0x6b   : > { %961 = vmatprep.subr.bf16.mxu0 %v4717_v0  ;;  %4097 = vmatprep.subr.bf16.mxu1 %v4717_v0  ;;  %v4961_v6 = vld [vmem:[%s4958_s23 + $0x4] ss:$8 sps:$4 sm:$0xff]   ;;  %v4276_v7 = vld [vmem:[%s4958_s23 + $0x1b4] ss:$8 sps:$4 sm:$0xff]   ;;  %v4999_v19 = vld [vmem:[%s4958_s23] ss:$8 sps:$4 sm:$0xff]  }
  0x6c   : > { %991 = vmatprep.mubr.bf16.mxu0 %v4961_v6  ;;  %1167 = vmatprep.mubr.bf16.mxu1 %v4276_v7  ;;  %v4266_v11 = vld [vmem:[%s4927_s29 + $0x78] sm:$0xff]   ;;  %v4267_v12 = vld [vmem:[%s4927_s29 + $0x70] sm:$0xff]   ;;  %v4268_v13 = vld [vmem:[%s4927_s29 + $0x68] sm:$0xff]  }
  0x6d   : > { %v4269_v14 = vld [vmem:[%s4927_s29 + $0x60] sm:$0xff]   ;;  %v4270_v15 = vld [vmem:[%s4927_s29 + $0x58] sm:$0xff]   ;;  %v4271_v16 = vld [vmem:[%s4927_s29 + $0x50] sm:$0xff]  }
  0x6e   : > { %962 = vmatpush1.bf16.msra.mxu0 %v4259_v2  ;;  %4113 = vmatpush1.bf16.msra.mxu1 %v4259_v2  ;;  %v4272_v17 = vld [vmem:[%s4927_s29 + $0x48] sm:$0xff]   ;;  %v4273_v18 = vld [vmem:[%s4927_s29 + $0x40] sm:$0xff]   ;;  %v4279_v20 = vld [vmem:[%s4958_s23 + $0x1b0] ss:$8 sps:$4 sm:$0xff]  }
  0x6f   : > { %963 = vmatprep.subr.bf16.mxu0 %v4717_v0  ;;  %4098 = vmatprep.subr.bf16.mxu1 %v4717_v0  ;;  %v4280_v21 = vld [vmem:[%s4927_s29 + $0xb8] sm:$0xff]   ;;  %v4284_v24 = vld [vmem:[%s4958_s23 + $0x1c4] ss:$8 sps:$4 sm:$0xff]   ;;  %v4288_v25 = vld [vmem:[%s4927_s29 + $0xb0] sm:$0xff]  }
  0x70   : > { %v4281_v22 = vld [vmem:[%s4927_s29 + $0x138] sm:$0xff]   ;;  %v4293_v26 = vld [vmem:[%s4927_s29 + $0x130] sm:$0xff]   ;;  %v4287_v28 = vld [vmem:[%s4958_s23 + $0x1c0] ss:$8 sps:$4 sm:$0xff]  }
  0x71   : > { %v5007_v23 = vld [vmem:[%s4958_s23 + $0x14] ss:$8 sps:$4 sm:$0xff]   ;;  %v5015_v27 = vld [vmem:[%s4958_s23 + $0x10] ss:$8 sps:$4 sm:$0xff]   ;;  %v5021_v29 = vld [vmem:[%s4958_s23 + $0x24] ss:$8 sps:$4 sm:$0xff]  }
  0x72   : > { %964 = vmatpush1.bf16.msra.mxu0 %v4260_v3  ;;  %4114 = vmatpush1.bf16.msra.mxu1 %v4260_v3  ;;  %v4291_v30 = vld [vmem:[%s4958_s23 + $0x1d4] ss:$8 sps:$4 sm:$0xff]   ;;  %v4302_v31 = vld [vmem:[%s4927_s29 + $0xa8] sm:$0xff]   ;;  %v4310_v34 = vld [vmem:[%s4927_s29 + $0xa0] sm:$0xff]  }
  0x73   : > { %965 = vmatprep.subr.bf16.mxu0 %v4717_v0  ;;  %4099 = vmatprep.subr.bf16.mxu1 %v4717_v0  ;;  %v4303_v32 = vld [vmem:[%s4927_s29 + $0x128] sm:$0xff]   ;;  %v4315_v35 = vld [vmem:[%s4927_s29 + $0x120] sm:$0xff]   ;;  %v4295_v36 = vld [vmem:[%s4958_s23 + $0x1d0] ss:$8 sps:$4 sm:$0xff]  }
  0x74   : > { %v5031_v33 = vld [vmem:[%s4958_s23 + $0x20] ss:$8 sps:$4 sm:$0xff]   ;;  %v5039_v37 = vld [vmem:[%s4958_s23 + $0x34] ss:$8 sps:$4 sm:$0xff]   ;;  %v4298_v38 = vld [vmem:[%s4958_s23 + $0x1e4] ss:$8 sps:$4 sm:$0xff]  }
  0x75   : > { %v4324_v39 = vld [vmem:[%s4927_s29 + $0x98] sm:$0xff]   ;;  %v4332_v41 = vld [vmem:[%s4927_s29 + $0x90] sm:$0xff]   ;;  %v4301_v44 = vld [vmem:[%s4958_s23 + $0x1e0] ss:$8 sps:$4 sm:$0xff]  }
  0x76   : > { %966 = vmatpush1.bf16.msra.mxu0 %v4261_v4  ;;  %4115 = vmatpush1.bf16.msra.mxu1 %v4261_v4  ;;  %v4325_v40 = vld [vmem:[%s4927_s29 + $0x118] sm:$0xff]   ;;  %v4337_v43 = vld [vmem:[%s4927_s29 + $0x110] sm:$0xff]   ;;  %v5057_v45 = vld [vmem:[%s4958_s23 + $0x44] ss:$8 sps:$4 sm:$0xff]  }
  0x77   : > { %967 = vmatprep.subr.bf16.mxu0 %v4717_v0  ;;  %4100 = vmatprep.subr.bf16.mxu1 %v4717_v0  ;;  %v5050_v42 = vld [vmem:[%s4958_s23 + $0x30] ss:$8 sps:$4 sm:$0xff]   ;;  %v4306_v46 = vld [vmem:[%s4958_s23 + $0x1f4] ss:$8 sps:$4 sm:$0xff]   ;;  %v4346_v47 = vld [vmem:[%s4927_s29 + $0x88] sm:$0xff]  }
  0x78   : > { %v4347_v48 = vld [vmem:[%s4927_s29 + $0x108] sm:$0xff]   ;;  %v4354_v49 = vld [vmem:[%s4927_s29 + $0x80] sm:$0xff]   ;;  %v4309_v52 = vld [vmem:[%s4958_s23 + $0x1f0] ss:$8 sps:$4 sm:$0xff]  }
  0x79   : > { %v5068_v50 = vld [vmem:[%s4958_s23 + $0x40] ss:$8 sps:$4 sm:$0xff]   ;;  %v5075_v53 = vld [vmem:[%s4958_s23 + $0x54] ss:$8 sps:$4 sm:$0xff]   ;;  %v4313_v54 = vld [vmem:[%s4958_s23 + $0x204] ss:$8 sps:$4 sm:$0xff]  }
  0x7a   : > { %968 = vmatpush1.bf16.msra.mxu0 %v4262_v5  ;;  %4116 = vmatpush1.bf16.msra.mxu1 %v4262_v5  ;;  %v4359_v51 = vld [vmem:[%s4927_s29 + $0x100] sm:$0xff]   ;;  %v4368_v55 = vld [vmem:[%s4927_s29 + $0xf8] sm:$0xff]   ;;  %v4376_v59 = vld [vmem:[%s4927_s29 + $0xf0] sm:$0xff]  }
  0x7b   : > { %969 = vmatprep.subr.bf16.mxu0 %v4717_v0  ;;  %4101 = vmatprep.subr.bf16.mxu1 %v4717_v0  ;;  %v4369_v56 = vld [vmem:[%s4927_s29 + $0x178] sm:$0xff]   ;;  %v4317_v58 = vld [vmem:[%s4958_s23 + $0x200] ss:$8 sps:$4 sm:$0xff]   ;;  %v4381_v60 = vld [vmem:[%s4927_s29 + $0x170] sm:$0xff]  }
  0x7c   : > { %v5085_v57 = vld [vmem:[%s4958_s23 + $0x50] ss:$8 sps:$4 sm:$0xff]   ;;  %v5091_v61 = vld [vmem:[%s4958_s23 + $0x64] ss:$8 sps:$4 sm:$0xff]   ;;  %v4320_v62 = vld [vmem:[%s4958_s23 + $0x214] ss:$8 sps:$4 sm:$0xff]  }
  0x7d   : > { %v4390_v63 = vld [vmem:[%s4927_s29 + $0xe8] sm:$0xff]   ;;  %v4398_v2 = vld [vmem:[%s4927_s29 + $0xe0] sm:$0xff]   ;;  %v4323_v5 = vld [vmem:[%s4958_s23 + $0x210] ss:$8 sps:$4 sm:$0xff]  }
  0x7e   : > { %970 = vmatpush1.bf16.msra.mxu0 %v4263_v8  ;;  %4117 = vmatpush1.bf16.msra.mxu1 %v4263_v8  ;;  %v4391_v1 = vld [vmem:[%s4927_s29 + $0x168] sm:$0xff]   ;;  %v4403_v3 = vld [vmem:[%s4927_s29 + $0x160] sm:$0xff]   ;;  %v5111_v7 = vld [vmem:[%s4958_s23 + $0x74] ss:$8 sps:$4 sm:$0xff]  }
  0x7f   : > { %971 = vmatprep.subr.bf16.mxu0 %v4717_v0  ;;  %4102 = vmatprep.subr.bf16.mxu1 %v4717_v0  ;;  %v5105_v4 = vld [vmem:[%s4958_s23 + $0x60] ss:$8 sps:$4 sm:$0xff]   ;;  %v4328_v8 = vld [vmem:[%s4958_s23 + $0x224] ss:$8 sps:$4 sm:$0xff]  }
  0x82   : > { %972 = vmatpush1.bf16.msra.mxu0 %v4264_v9  ;;  %4118 = vmatpush1.bf16.msra.mxu1 %v4264_v9  ;;  %v4412_v9 = vld [vmem:[%s4927_s29 + $0xd8] sm:$0xff]  }
  0x83   : > { %973 = vmatprep.subr.bf16.mxu0 %v4717_v0  ;;  %4103 = vmatprep.subr.bf16.mxu1 %v4717_v0 }
  0x86   : > { %974 = vmatpush1.bf16.msra.mxu0 %v4265_v10  ;;  %4119 = vmatpush1.bf16.msra.mxu1 %v4265_v10  ;;  %v4413_v10 = vld [vmem:[%s4927_s29 + $0x158] sm:$0xff]  }
  0x87   : > { %975 = vmatprep.subr.bf16.mxu0 %v4717_v0  ;;  %4104 = vmatprep.subr.bf16.mxu1 %v4717_v0 }
  0x8a   : > { %976 = vmatpush2.bf16.msra.mxu0 %v4266_v11  ;;  %4120 = vmatpush2.bf16.msra.mxu1 %v4266_v11  ;;  %v4420_v11 = vld [vmem:[%s4927_s29 + $0xd0] sm:$0xff]  }
  0x8b   : > { %977 = vmatprep.subr.bf16.mxu0 %v4717_v0  ;;  %4105 = vmatprep.subr.bf16.mxu1 %v4717_v0 }
  0x8e   : > { %978 = vmatpush2.bf16.msra.mxu0 %v4267_v12  ;;  %4121 = vmatpush2.bf16.msra.mxu1 %v4267_v12  ;;  %v4425_v12 = vld [vmem:[%s4927_s29 + $0x150] sm:$0xff]  }
  0x8f   : > { %979 = vmatprep.subr.bf16.mxu0 %v4717_v0  ;;  %4106 = vmatprep.subr.bf16.mxu1 %v4717_v0 }
  0x92   : > { %980 = vmatpush2.bf16.msra.mxu0 %v4268_v13  ;;  %4122 = vmatpush2.bf16.msra.mxu1 %v4268_v13  ;;  %v5125_v13 = vld [vmem:[%s4958_s23 + $0x70] ss:$8 sps:$4 sm:$0xff]  }
  0x93   : > { %981 = vmatprep.subr.bf16.mxu0 %v4717_v0  ;;  %4107 = vmatprep.subr.bf16.mxu1 %v4717_v0 }
  0x96   : > { %982 = vmatpush2.bf16.msra.mxu0 %v4269_v14  ;;  %4123 = vmatpush2.bf16.msra.mxu1 %v4269_v14  ;;  %v4331_v14 = vld [vmem:[%s4958_s23 + $0x220] ss:$8 sps:$4 sm:$0xff]  }
  0x97   : > { %983 = vmatprep.subr.bf16.mxu0 %v4717_v0  ;;  %4108 = vmatprep.subr.bf16.mxu1 %v4717_v0 }
  0x9a   : > { %984 = vmatpush2.bf16.msra.mxu0 %v4270_v15  ;;  %4124 = vmatpush2.bf16.msra.mxu1 %v4270_v15  ;;  %v5129_v15 = vld [vmem:[%s4958_s23 + $0x84] ss:$8 sps:$4 sm:$0xff]  }
  0x9b   : > { %985 = vmatprep.subr.bf16.mxu0 %v4717_v0  ;;  %4109 = vmatprep.subr.bf16.mxu1 %v4717_v0 }
  0x9e   : > { %986 = vmatpush2.bf16.msra.mxu0 %v4271_v16  ;;  %4125 = vmatpush2.bf16.msra.mxu1 %v4271_v16  ;;  %v4335_v16 = vld [vmem:[%s4958_s23 + $0x234] ss:$8 sps:$4 sm:$0xff]  }
  0x9f   : > { %987 = vmatprep.subr.bf16.mxu0 %v4717_v0  ;;  %4110 = vmatprep.subr.bf16.mxu1 %v4717_v0 }
  0xa2   : > { %988 = vmatpush2.bf16.msra.mxu0 %v4272_v17  ;;  %4126 = vmatpush2.bf16.msra.mxu1 %v4272_v17  ;;  %v4434_v17 = vld [vmem:[%s4927_s29 + $0xc8] sm:$0xff]  }
  0xa3   : > { %989 = vmatprep.subr.bf16.mxu0 %v4717_v0  ;;  %4111 = vmatprep.subr.bf16.mxu1 %v4717_v0 }
  0xa6   : > { %990 = vmatpush2.bf16.msra.mxu0 %v4273_v18  ;;  %4127 = vmatpush2.bf16.msra.mxu1 %v4273_v18  ;;  %v4435_v18 = vld [vmem:[%s4927_s29 + $0x148] sm:$0xff]  }
  0xa7   : > { %1473 = vmatprep.subr.bf16.mxu1 %v4717_v0  ;;  %2404 = vmatprep.subr.bf16.mxu0 %v4717_v0 }
  0xa9   : > { %992 = vmatmul.mubr.bf16.vlgmr.msra.gmra.mxu0 %v4999_v19  ;;  %1168 = vmatmul.mubr.bf16.vlgmr.msra.gmra.mxu1 %v4279_v20  ;;  %v4442_v20 = vld [vmem:[%s4927_s29 + $0xc0] sm:$0xff]  }
  0xaa   : > { %1474 = vmatpush1.bf16.msra.mxu1 %v4280_v21  ;;  %2405 = vmatpush1.bf16.msra.mxu0 %v4281_v22  ;;  %v4447_v21 = vld [vmem:[%s4927_s29 + $0x140] sm:$0xff]  }
  0xab   : > { %999 = vmatprep.mubr.bf16.mxu0 %v5007_v23  ;;  %1175 = vmatprep.mubr.bf16.mxu1 %v4284_v24  ;;  %v5143_v22 = vld [vmem:[%s4958_s23 + $0x80] ss:$8 sps:$4 sm:$0xff]   ;;  %v4339_v24 = vld [vmem:[%s4958_s23 + $0x230] ss:$8 sps:$4 sm:$0xff]  }
  0xac   : > { %1475 = vmatprep.subr.bf16.mxu1 %v4717_v0  ;;  %2406 = vmatprep.subr.bf16.mxu0 %v4717_v0 }
  0xae   : > { %1476 = vmatpush1.bf16.msra.mxu1 %v4288_v25  ;;  %2407 = vmatpush1.bf16.msra.mxu0 %v4293_v26  ;;  %v5147_v25 = vld [vmem:[%s4958_s23 + $0x94] ss:$8 sps:$4 sm:$0xff]   ;;  %v4342_v26 = vld [vmem:[%s4958_s23 + $0x244] ss:$8 sps:$4 sm:$0xff]  }
  0xaf   : > { %1477 = vmatprep.subr.bf16.mxu1 %v4717_v0  ;;  %2408 = vmatprep.subr.bf16.mxu0 %v4717_v0 }
  0xb1   : > { %1000 = vmatmul.mubr.bf16.gmra.mxu0 %v5015_v27  ;;  %1176 = vmatmul.mubr.bf16.gmra.mxu1 %v4287_v28  ;;  %v5153_v28 = vld [vmem:[%s4958_s23 + $0x90] ss:$8 sps:$4 sm:$0xff]  }
  0xb2   : > { %1006 = vmatprep.mubr.bf16.mxu0 %v5021_v29  ;;  %1182 = vmatprep.mubr.bf16.mxu1 %v4291_v30  ;;  %v5157_v30 = vld [vmem:[%s4958_s23 + $0xa4] ss:$8 sps:$4 sm:$0xff]  }
  0xb3   : > { %1478 = vmatpush1.bf16.msra.mxu1 %v4302_v31  ;;  %2409 = vmatpush1.bf16.msra.mxu0 %v4303_v32  ;;  %v4350_v31 = vld [vmem:[%s4958_s23 + $0x254] ss:$8 sps:$4 sm:$0xff]   ;;  %v5163_v32 = vld [vmem:[%s4958_s23 + $0xa0] ss:$8 sps:$4 sm:$0xff]  }
  0xb4   : > { %1479 = vmatprep.subr.bf16.mxu1 %v4717_v0  ;;  %2410 = vmatprep.subr.bf16.mxu0 %v4717_v0 }
  0xb7   : > { %1480 = vmatpush1.bf16.msra.mxu1 %v4310_v34  ;;  %2411 = vmatpush1.bf16.msra.mxu0 %v4315_v35  ;;  %v4353_v34 = vld [vmem:[%s4958_s23 + $0x250] ss:$8 sps:$4 sm:$0xff]   ;;  %v5167_v35 = vld [vmem:[%s4958_s23 + $0xb4] ss:$8 sps:$4 sm:$0xff]  }
  0xb8   : > { %1481 = vmatprep.subr.bf16.mxu1 %v4717_v0  ;;  %2412 = vmatprep.subr.bf16.mxu0 %v4717_v0 }
  0xb9   : > { %1007 = vmatmul.mubr.bf16.gmra.mxu0 %v5031_v33  ;;  %1183 = vmatmul.mubr.bf16.gmra.mxu1 %v4295_v36  ;;  %v4357_v36 = vld [vmem:[%s4958_s23 + $0x264] ss:$8 sps:$4 sm:$0xff]  }
  0xba   : > { %1013 = vmatprep.mubr.bf16.mxu0 %v5039_v37  ;;  %1189 = vmatprep.mubr.bf16.mxu1 %v4298_v38  ;;  %v5173_v38 = vld [vmem:[%s4958_s23 + $0xb0] ss:$8 sps:$4 sm:$0xff]  }
  0xbb   : > { %1482 = vmatpush1.bf16.msra.mxu1 %v4324_v39  ;;  %2413 = vmatpush1.bf16.msra.mxu0 %v4325_v40  ;;  %v4361_v39 = vld [vmem:[%s4958_s23 + $0x260] ss:$8 sps:$4 sm:$0xff]   ;;  %v5177_v40 = vld [vmem:[%s4958_s23 + $0xc4] ss:$8 sps:$4 sm:$0xff]  }
  0xbc   : > { %1483 = vmatprep.subr.bf16.mxu1 %v4717_v0  ;;  %2414 = vmatprep.subr.bf16.mxu0 %v4717_v0 }
  0xbf   : > { %1484 = vmatpush1.bf16.msra.mxu1 %v4332_v41  ;;  %2415 = vmatpush1.bf16.msra.mxu0 %v4337_v43  ;;  %v4364_v41 = vld [vmem:[%s4958_s23 + $0x274] ss:$8 sps:$4 sm:$0xff]   ;;  %v5183_v43 = vld [vmem:[%s4958_s23 + $0xc0] ss:$8 sps:$4 sm:$0xff]  }
  0xc0   : > { %1485 = vmatprep.subr.bf16.mxu1 %v4717_v0  ;;  %2416 = vmatprep.subr.bf16.mxu0 %v4717_v0 }
  0xc1   : > { %1014 = vmatmul.mubr.bf16.gmra.mxu0 %v5050_v42  ;;  %1190 = vmatmul.mubr.bf16.gmra.mxu1 %v4301_v44  ;;  %v4367_v44 = vld [vmem:[%s4958_s23 + $0x270] ss:$8 sps:$4 sm:$0xff]  }
  0xc2   : > { %1021 = vmatprep.mubr.bf16.mxu0 %v5057_v45  ;;  %1197 = vmatprep.mubr.bf16.mxu1 %v4306_v46  ;;  %v5187_v46 = vld [vmem:[%s4958_s23 + $0xd4] ss:$8 sps:$4 sm:$0xff]  }
  0xc3   : > { %1486 = vmatpush1.bf16.msra.mxu1 %v4346_v47  ;;  %2417 = vmatpush1.bf16.msra.mxu0 %v4347_v48  ;;  %v4372_v47 = vld [vmem:[%s4958_s23 + $0x284] ss:$8 sps:$4 sm:$0xff]   ;;  %v5193_v48 = vld [vmem:[%s4958_s23 + $0xd0] ss:$8 sps:$4 sm:$0xff]  }
  0xc4   : > { %1487 = vmatprep.subr.bf16.mxu1 %v4717_v0  ;;  %2418 = vmatprep.subr.bf16.mxu0 %v4717_v0 }
  0xc7   : > { %1488 = vmatpush1.bf16.msra.mxu1 %v4354_v49  ;;  %2419 = vmatpush1.bf16.msra.mxu0 %v4359_v51  ;;  %v4375_v49 = vld [vmem:[%s4958_s23 + $0x280] ss:$8 sps:$4 sm:$0xff]   ;;  %v5197_v51 = vld [vmem:[%s4958_s23 + $0xe4] ss:$8 sps:$4 sm:$0xff]  }
  0xc8   : > { %1489 = vmatprep.subr.bf16.mxu1 %v4717_v0  ;;  %2420 = vmatprep.subr.bf16.mxu0 %v4717_v0 }
  0xc9   : > { %1022 = vmatmul.mubr.bf16.gmra.mxu0 %v5068_v50  ;;  %1198 = vmatmul.mubr.bf16.gmra.mxu1 %v4309_v52  ;;  %v4379_v52 = vld [vmem:[%s4958_s23 + $0x294] ss:$8 sps:$4 sm:$0xff]  }
  0xca   : > { %1028 = vmatprep.mubr.bf16.mxu0 %v5075_v53  ;;  %1204 = vmatprep.mubr.bf16.mxu1 %v4313_v54  ;;  %v5203_v54 = vld [vmem:[%s4958_s23 + $0xe0] ss:$8 sps:$4 sm:$0xff]  }
  0xcb   : > { %1490 = vmatpush2.bf16.msra.mxu1 %v4368_v55  ;;  %2421 = vmatpush2.bf16.msra.mxu0 %v4369_v56  ;;  %v4383_v55 = vld [vmem:[%s4958_s23 + $0x290] ss:$8 sps:$4 sm:$0xff]   ;;  %v5207_v56 = vld [vmem:[%s4958_s23 + $0xf4] ss:$8 sps:$4 sm:$0xff]  }
  0xcc   : > { %1491 = vmatprep.subr.bf16.mxu1 %v4717_v0  ;;  %2422 = vmatprep.subr.bf16.mxu0 %v4717_v0 }
  0xcf   : > { %1492 = vmatpush2.bf16.msra.mxu1 %v4376_v59  ;;  %2423 = vmatpush2.bf16.msra.mxu0 %v4381_v60  ;;  %v5213_v59 = vld [vmem:[%s4958_s23 + $0xf0] ss:$8 sps:$4 sm:$0xff]   ;;  %v4389_v60 = vld [vmem:[%s4958_s23 + $0x2a0] ss:$8 sps:$4 sm:$0xff]  }
  0xd0   : > { %1493 = vmatprep.subr.bf16.mxu1 %v4717_v0  ;;  %2424 = vmatprep.subr.bf16.mxu0 %v4717_v0 }
  0xd1   : > { %1029 = vmatmul.mubr.bf16.gmra.mxu0 %v5085_v57  ;;  %1205 = vmatmul.mubr.bf16.gmra.mxu1 %v4317_v58  ;;  %v4386_v58 = vld [vmem:[%s4958_s23 + $0x2a4] ss:$8 sps:$4 sm:$0xff]  }
  0xd2   : > { %1035 = vmatprep.mubr.bf16.mxu0 %v5091_v61  ;;  %1211 = vmatprep.mubr.bf16.mxu1 %v4320_v62  ;;  %v5217_v62 = vld [vmem:[%s4958_s23 + $0x104] ss:$8 sps:$4 sm:$0xff]  }
  0xd3   : > { %1494 = vmatpush2.bf16.msra.mxu1 %v4390_v63  ;;  %2425 = vmatpush2.bf16.msra.mxu0 %v4391_v1  ;;  %v4394_v63 = vld [vmem:[%s4958_s23 + $0x2b4] ss:$8 sps:$4 sm:$0xff]   ;;  %v5223_v1 = vld [vmem:[%s4958_s23 + $0x100] ss:$8 sps:$4 sm:$0xff]  }
  0xd4   : > { %1495 = vmatprep.subr.bf16.mxu1 %v4717_v0  ;;  %2426 = vmatprep.subr.bf16.mxu0 %v4717_v0 }
  0xd7   : > { %1496 = vmatpush2.bf16.msra.mxu1 %v4398_v2  ;;  %2427 = vmatpush2.bf16.msra.mxu0 %v4403_v3  ;;  %v4397_v2 = vld [vmem:[%s4958_s23 + $0x2b0] ss:$8 sps:$4 sm:$0xff]   ;;  %v5227_v3 = vld [vmem:[%s4958_s23 + $0x114] ss:$8 sps:$4 sm:$0xff]  }
  0xd8   : > { %1497 = vmatprep.subr.bf16.mxu1 %v4717_v0  ;;  %2428 = vmatprep.subr.bf16.mxu0 %v4717_v0 }
  0xd9   : > { %1036 = vmatmul.mubr.bf16.gmra.mxu0 %v5105_v4  ;;  %1212 = vmatmul.mubr.bf16.gmra.mxu1 %v4323_v5  ;;  %v4401_v5 = vld [vmem:[%s4958_s23 + $0x2c4] ss:$8 sps:$4 sm:$0xff]  }
  0xda   : > { %1043 = vmatprep.mubr.bf16.mxu0 %v5111_v7  ;;  %1219 = vmatprep.mubr.bf16.mxu1 %v4328_v8  ;;  %v5233_v8 = vld [vmem:[%s4958_s23 + $0x110] ss:$8 sps:$4 sm:$0xff]  }
  0xdb   : > { %1498 = vmatpush2.bf16.msra.mxu1 %v4412_v9  ;;  %2429 = vmatpush2.bf16.msra.mxu0 %v4413_v10  ;;  %v4405_v9 = vld [vmem:[%s4958_s23 + $0x2c0] ss:$8 sps:$4 sm:$0xff]   ;;  %v5237_v10 = vld [vmem:[%s4958_s23 + $0x124] ss:$8 sps:$4 sm:$0xff]  }
  0xdc   : > { %1499 = vmatprep.subr.bf16.mxu1 %v4717_v0  ;;  %2430 = vmatprep.subr.bf16.mxu0 %v4717_v0 }
  0xdf   : > { %1500 = vmatpush2.bf16.msra.mxu1 %v4420_v11  ;;  %2431 = vmatpush2.bf16.msra.mxu0 %v4425_v12  ;;  %v4408_v11 = vld [vmem:[%s4958_s23 + $0x2d4] ss:$8 sps:$4 sm:$0xff]   ;;  %v5243_v12 = vld [vmem:[%s4958_s23 + $0x120] ss:$8 sps:$4 sm:$0xff]  }
  0xe0   : > { %1501 = vmatprep.subr.bf16.mxu1 %v4717_v0  ;;  %2432 = vmatprep.subr.bf16.mxu0 %v4717_v0 }
  0xe1   : > { %1044 = vmatmul.mubr.bf16.gmra.mxu0 %v5125_v13  ;;  %1220 = vmatmul.mubr.bf16.gmra.mxu1 %v4331_v14  ;;  %v4411_v14 = vld [vmem:[%s4958_s23 + $0x2d0] ss:$8 sps:$4 sm:$0xff]  }
  0xe2   : > { %1050 = vmatprep.mubr.bf16.mxu0 %v5129_v15  ;;  %1226 = vmatprep.mubr.bf16.mxu1 %v4335_v16  ;;  %v5247_v16 = vld [vmem:[%s4958_s23 + $0x134] ss:$8 sps:$4 sm:$0xff]  }
  0xe3   : > { %1502 = vmatpush2.bf16.msra.mxu1 %v4434_v17  ;;  %2433 = vmatpush2.bf16.msra.mxu0 %v4435_v18  ;;  %v4416_v17 = vld [vmem:[%s4958_s23 + $0x2e4] ss:$8 sps:$4 sm:$0xff]   ;;  %v5253_v18 = vld [vmem:[%s4958_s23 + $0x130] ss:$8 sps:$4 sm:$0xff]  }
  0xe4   : > { %1503 = vmatprep.subr.bf16.mxu1 %v4717_v0  ;;  %2434 = vmatprep.subr.bf16.mxu0 %v4717_v0  ;;  %v4345_v0 = vld [vmem:[%s4958_s23 + $0x240] ss:$8 sps:$4 sm:$0xff]  }
  0xe7   : > { %1504 = vmatpush2.bf16.msra.mxu1 %v4442_v20  ;;  %2435 = vmatpush2.bf16.msra.mxu0 %v4447_v21  ;;  %v4419_v20 = vld [vmem:[%s4958_s23 + $0x2e0] ss:$8 sps:$4 sm:$0xff]   ;;  %v5257_v21 = vld [vmem:[%s4958_s23 + $0x144] ss:$8 sps:$4 sm:$0xff]  }
  0xe9   : > { %1051 = vmatmul.mubr.bf16.gmra.mxu0 %v5143_v22  ;;  %1227 = vmatmul.mubr.bf16.gmra.mxu1 %v4339_v24  ;;  %v4423_v24 = vld [vmem:[%s4958_s23 + $0x2f4] ss:$8 sps:$4 sm:$0xff]  }
  0xea   : > { %1057 = vmatprep.mubr.bf16.mxu0 %v5147_v25  ;;  %1233 = vmatprep.mubr.bf16.mxu1 %v4342_v26  ;;  %v5263_v26 = vld [vmem:[%s4958_s23 + $0x140] ss:$8 sps:$4 sm:$0xff]  }
  0xf1   : > { %1058 = vmatmul.mubr.bf16.gmra.mxu0 %v5153_v28  ;;  %1234 = vmatmul.mubr.bf16.gmra.mxu1 %v4345_v0  ;;  %v4427_v0 = vld [vmem:[%s4958_s23 + $0x2f0] ss:$8 sps:$4 sm:$0xff]  }
  0xf2   : > { %1065 = vmatprep.mubr.bf16.mxu0 %v5157_v30  ;;  %1241 = vmatprep.mubr.bf16.mxu1 %v4350_v31  ;;  %v5267_v31 = vld [vmem:[%s4958_s23 + $0x154] ss:$8 sps:$4 sm:$0xff]  }
  0xf9   : > { %1066 = vmatmul.mubr.bf16.gmra.mxu0 %v5163_v32  ;;  %1242 = vmatmul.mubr.bf16.gmra.mxu1 %v4353_v34  ;;  %v4430_v34 = vld [vmem:[%s4958_s23 + $0x304] ss:$8 sps:$4 sm:$0xff]  }
  0xfa   : > { %1072 = vmatprep.mubr.bf16.mxu0 %v5167_v35  ;;  %1248 = vmatprep.mubr.bf16.mxu1 %v4357_v36  ;;  %v5273_v36 = vld [vmem:[%s4958_s23 + $0x150] ss:$8 sps:$4 sm:$0xff]  }
 0x101   : > { %1073 = vmatmul.mubr.bf16.gmra.mxu0 %v5173_v38  ;;  %1249 = vmatmul.mubr.bf16.gmra.mxu1 %v4361_v39  ;;  %v4433_v39 = vld [vmem:[%s4958_s23 + $0x300] ss:$8 sps:$4 sm:$0xff]  }
 0x102   : > { %1079 = vmatprep.mubr.bf16.mxu0 %v5177_v40  ;;  %1255 = vmatprep.mubr.bf16.mxu1 %v4364_v41  ;;  %v5277_v41 = vld [vmem:[%s4958_s23 + $0x164] ss:$8 sps:$4 sm:$0xff]  }
 0x109   : > { %1080 = vmatmul.mubr.bf16.gmra.mxu0 %v5183_v43  ;;  %1256 = vmatmul.mubr.bf16.gmra.mxu1 %v4367_v44  ;;  %v4438_v44 = vld [vmem:[%s4958_s23 + $0x314] ss:$8 sps:$4 sm:$0xff]  }
 0x10a   : > { %1087 = vmatprep.mubr.bf16.mxu0 %v5187_v46  ;;  %1263 = vmatprep.mubr.bf16.mxu1 %v4372_v47  ;;  %v5283_v47 = vld [vmem:[%s4958_s23 + $0x160] ss:$8 sps:$4 sm:$0xff]  }
 0x111   : > { %1088 = vmatmul.mubr.bf16.gmra.mxu0 %v5193_v48  ;;  %1264 = vmatmul.mubr.bf16.gmra.mxu1 %v4375_v49  ;;  %v4441_v49 = vld [vmem:[%s4958_s23 + $0x310] ss:$8 sps:$4 sm:$0xff]  }
 0x112   : > { %1094 = vmatprep.mubr.bf16.mxu0 %v5197_v51  ;;  %1270 = vmatprep.mubr.bf16.mxu1 %v4379_v52  ;;  %v5287_v52 = vld [vmem:[%s4958_s23 + $0x174] ss:$8 sps:$4 sm:$0xff]  }
 0x119   : > { %1095 = vmatmul.mubr.bf16.gmra.mxu0 %v5203_v54  ;;  %1271 = vmatmul.mubr.bf16.gmra.mxu1 %v4383_v55  ;;  %v4445_v55 = vld [vmem:[%s4958_s23 + $0x324] ss:$8 sps:$4 sm:$0xff]  }
 0x11a   : > { %1101 = vmatprep.mubr.bf16.mxu0 %v5207_v56  ;;  %1277 = vmatprep.mubr.bf16.mxu1 %v4386_v58  ;;  %v5293_v58 = vld [vmem:[%s4958_s23 + $0x170] ss:$8 sps:$4 sm:$0xff]  }
 0x121   : > { %1102 = vmatmul.mubr.bf16.gmra.mxu0 %v5213_v59  ;;  %1278 = vmatmul.mubr.bf16.gmra.mxu1 %v4389_v60  ;;  %v4449_v60 = vld [vmem:[%s4958_s23 + $0x320] ss:$8 sps:$4 sm:$0xff]  }
 0x122   : > { %1109 = vmatprep.mubr.bf16.mxu0 %v5217_v62  ;;  %1285 = vmatprep.mubr.bf16.mxu1 %v4394_v63 }
 0x129   : > { %1110 = vmatmul.mubr.bf16.gmra.mxu0 %v5223_v1  ;;  %1286 = vmatmul.mubr.bf16.gmra.mxu1 %v4397_v2 }
 0x12a   : > { %1116 = vmatprep.mubr.bf16.mxu0 %v5227_v3  ;;  %1292 = vmatprep.mubr.bf16.mxu1 %v4401_v5 }
 0x131   : > { %1117 = vmatmul.mubr.bf16.gmra.mxu0 %v5233_v8  ;;  %1293 = vmatmul.mubr.bf16.gmra.mxu1 %v4405_v9 }
 0x132   : > { %1123 = vmatprep.mubr.bf16.mxu0 %v5237_v10  ;;  %1299 = vmatprep.mubr.bf16.mxu1 %v4408_v11 }
 0x139   : > { %1124 = vmatmul.mubr.bf16.gmra.mxu0 %v5243_v12  ;;  %1300 = vmatmul.mubr.bf16.gmra.mxu1 %v4411_v14 }
 0x13a   : > { %1131 = vmatprep.mubr.bf16.mxu0 %v5247_v16  ;;  %1307 = vmatprep.mubr.bf16.mxu1 %v4416_v17 }
 0x141   : > { %1132 = vmatmul.mubr.bf16.gmra.mxu0 %v5253_v18  ;;  %1308 = vmatmul.mubr.bf16.gmra.mxu1 %v4419_v20 }
 0x142   : > { %1138 = vmatprep.mubr.bf16.mxu0 %v5257_v21  ;;  %1314 = vmatprep.mubr.bf16.mxu1 %v4423_v24 }
 0x149   : > { %1139 = vmatmul.mubr.bf16.gmra.mxu0 %v5263_v26  ;;  %1315 = vmatmul.mubr.bf16.gmra.mxu1 %v4427_v0 }
 0x14a   : > { %1145 = vmatprep.mubr.bf16.mxu0 %v5267_v31  ;;  %1321 = vmatprep.mubr.bf16.mxu1 %v4430_v34 }
 0x151   : > { %1146 = vmatmul.mubr.bf16.gmra.mxu0 %v5273_v36  ;;  %1322 = vmatmul.mubr.bf16.gmra.mxu1 %v4433_v39 }
 0x152   : > { %1153 = vmatprep.mubr.bf16.mxu0 %v5277_v41  ;;  %1329 = vmatprep.mubr.bf16.mxu1 %v4438_v44 }
 0x159   : > { %1154 = vmatmul.mubr.bf16.gmra.mxu0 %v5283_v47  ;;  %1330 = vmatmul.mubr.bf16.gmra.mxu1 %v4441_v49 }
 0x15a   : > { %1160 = vmatprep.mubr.bf16.mxu0 %v5287_v52  ;;  %1336 = vmatprep.mubr.bf16.mxu1 %v4445_v55 }
 0x161   : > { %1161 = vmatmul.mubr.bf16.gmra.mxu0 %v5293_v58  ;;  %1337 = vmatmul.mubr.bf16.gmra.mxu1 %v4449_v60 }
 0x162   : > { %1505 = vmatprep.mubr.bf16.mxu1 %v4961_v6  ;;  %2436 = vmatprep.mubr.bf16.mxu0 %v4961_v6 }
 0x169   : > { %v5299_v63 = vpop.f32.mrf.mxu0  ;;  %v5301_v2 = vpop.f32.mrf.mxu1  ;;  %1506 = vmatmul.mubr.bf16.vlgmr.msra.gmra.mxu1 %v4999_v19  ;;  %2437 = vmatmul.mubr.bf16.vlgmr.msra.gmra.mxu0 %v4999_v19 }
 0x16a   : > { %1513 = vmatprep.mubr.bf16.mxu1 %v5007_v23  ;;  %2444 = vmatprep.mubr.bf16.mxu0 %v5007_v23 }
 0x16b   : > { %v995_v5 = vpop.f32.mrf.mxu0  ;;  %v1171_v9 = vpop.f32.mrf.mxu1 }
 0x16d   : > { %v5307_v11 = vpop.f32.mrf.mxu0  ;;  %v5309_v14 = vpop.f32.mrf.mxu1 }
 0x16f   : > { %v998_v17 = vpop.f32.mrf.mxu0  ;;  %v1174_v6 = vpop.f32.mrf.mxu1 }
 0x171   : > { %v1001_v20 = vpop.f32.mrf.mxu0  ;;  %v1177_v24 = vpop.f32.mrf.mxu1  ;;  %1514 = vmatmul.mubr.bf16.gmra.mxu1 %v5015_v27  ;;  %2445 = vmatmul.mubr.bf16.gmra.mxu0 %v5015_v27 }
 0x172   : > { %1521 = vmatprep.mubr.bf16.mxu1 %v5021_v29  ;;  %2452 = vmatprep.mubr.bf16.mxu0 %v5021_v29 }
 0x173   : > { %v1002_v19 = vpop.f32.mrf.mxu0  ;;  %v1178_v23 = vpop.f32.mrf.mxu1 }
 0x175   : > { %v5315_v0 = vpop.f32.mrf.mxu0  ;;  %v5317_v34 = vpop.f32.mrf.mxu1 }
 0x177   : > { %v1005_v39 = vpop.f32.mrf.mxu0  ;;  %v1181_v44 = vpop.f32.mrf.mxu1 }
 0x179   : > { %v5319_v49 = vpop.f32.mrf.mxu0  ;;  %v5321_v55 = vpop.f32.mrf.mxu1  ;;  %1522 = vmatmul.mubr.bf16.gmra.mxu1 %v5031_v33  ;;  %2453 = vmatmul.mubr.bf16.gmra.mxu0 %v5031_v33 }
 0x17a   : > { %1529 = vmatprep.mubr.bf16.mxu1 %v5039_v37  ;;  %2460 = vmatprep.mubr.bf16.mxu0 %v5039_v37 }
 0x17b   : > { %v1010_v27 = vpop.f32.mrf.mxu0  ;;  %v1186_v29 = vpop.f32.mrf.mxu1 }
 0x17d   : > { %v1011_v60 = vpop.f32.mrf.mxu0  ;;  %v1187_v5 = vpop.f32.mrf.mxu1 }
 0x17f   : > { %v1012_v9 = vpop.f32.mrf.mxu0  ;;  %v1188_v17 = vpop.f32.mrf.mxu1 }
 0x181   : > { %v5327_v6 = vpop.f32.mrf.mxu0  ;;  %v5329_v20 = vpop.f32.mrf.mxu1  ;;  %1530 = vmatmul.mubr.bf16.gmra.mxu1 %v5050_v42  ;;  %2461 = vmatmul.mubr.bf16.gmra.mxu0 %v5050_v42 }
 0x182   : > { %1537 = vmatprep.mubr.bf16.mxu1 %v5057_v45  ;;  %2468 = vmatprep.mubr.bf16.mxu0 %v5057_v45 }
 0x183   : > { %v1017_v33 = vpop.f32.mrf.mxu0  ;;  %v1193_v37 = vpop.f32.mrf.mxu1 }
 0x185   : > { %v5335_v24 = vpop.f32.mrf.mxu0  ;;  %v5337_v19 = vpop.f32.mrf.mxu1 }
 0x187   : > { %v1020_v23 = vpop.f32.mrf.mxu0  ;;  %v1196_v39 = vpop.f32.mrf.mxu1 }
 0x189   : > { %v1023_v44 = vpop.f32.mrf.mxu0  ;;  %v1199_v27 = vpop.f32.mrf.mxu1  ;;  %1538 = vmatmul.mubr.bf16.gmra.mxu1 %v5068_v50  ;;  %2469 = vmatmul.mubr.bf16.gmra.mxu0 %v5068_v50 }
 0x18a   : > { %1545 = vmatprep.mubr.bf16.mxu1 %v5075_v53  ;;  %2476 = vmatprep.mubr.bf16.mxu0 %v5075_v53 }
 0x18b   : > { %v1024_v42 = vpop.f32.mrf.mxu0  ;;  %v1200_v45 = vpop.f32.mrf.mxu1 }
 0x18d   : > { %v5343_v29 = vpop.f32.mrf.mxu0  ;;  %v5345_v60 = vpop.f32.mrf.mxu1 }
 0x18f   : > { %v1027_v5 = vpop.f32.mrf.mxu0  ;;  %v1203_v9 = vpop.f32.mrf.mxu1 }
 0x191   : > { %v5347_v17 = vpop.f32.mrf.mxu0  ;;  %v5349_v33 = vpop.f32.mrf.mxu1  ;;  %1546 = vmatmul.mubr.bf16.gmra.mxu1 %v5085_v57  ;;  %2477 = vmatmul.mubr.bf16.gmra.mxu0 %v5085_v57 }
 0x192   : > { %1553 = vmatprep.mubr.bf16.mxu1 %v5091_v61  ;;  %2484 = vmatprep.mubr.bf16.mxu0 %v5091_v61 }
 0x193   : > { %v1032_v50 = vpop.f32.mrf.mxu0  ;;  %v1208_v53 = vpop.f32.mrf.mxu1 }
 0x195   : > { %v1033_v37 = vpop.f32.mrf.mxu0  ;;  %v1209_v23 = vpop.f32.mrf.mxu1 }
 0x197   : > { %v1034_v39 = vpop.f32.mrf.mxu0  ;;  %v1210_v44 = vpop.f32.mrf.mxu1 }
 0x199   : > { %v5355_v27 = vpop.f32.mrf.mxu0  ;;  %v5357_v42 = vpop.f32.mrf.mxu1  ;;  %1554 = vmatmul.mubr.bf16.gmra.mxu1 %v5105_v4  ;;  %2485 = vmatmul.mubr.bf16.gmra.mxu0 %v5105_v4 }
 0x19a   : > { %1561 = vmatprep.mubr.bf16.mxu1 %v5111_v7  ;;  %2492 = vmatprep.mubr.bf16.mxu0 %v5111_v7 }
 0x19b   : > { %v1039_v57 = vpop.f32.mrf.mxu0  ;;  %v1215_v61 = vpop.f32.mrf.mxu1 }
 0x19d   : > { %v5363_v45 = vpop.f32.mrf.mxu0  ;;  %v5365_v5 = vpop.f32.mrf.mxu1 }
 0x19f   : > { %v1042_v9 = vpop.f32.mrf.mxu0  ;;  %v1218_v50 = vpop.f32.mrf.mxu1 }
 0x1a1   : > { %v1045_v53 = vpop.f32.mrf.mxu0  ;;  %v1221_v37 = vpop.f32.mrf.mxu1  ;;  %1562 = vmatmul.mubr.bf16.gmra.mxu1 %v5125_v13  ;;  %2493 = vmatmul.mubr.bf16.gmra.mxu0 %v5125_v13 }
 0x1a2   : > { %1569 = vmatprep.mubr.bf16.mxu1 %v5129_v15  ;;  %2500 = vmatprep.mubr.bf16.mxu0 %v5129_v15 }
 0x1a3   : > { %v1046_v4 = vpop.f32.mrf.mxu0  ;;  %v1222_v7 = vpop.f32.mrf.mxu1 }
 0x1a5   : > { %v5371_v23 = vpop.f32.mrf.mxu0  ;;  %v5373_v39 = vpop.f32.mrf.mxu1 }
 0x1a7   : > { %v1049_v44 = vpop.f32.mrf.mxu0  ;;  %v1225_v57 = vpop.f32.mrf.mxu1 }
 0x1a9   : > { %v5375_v61 = vpop.f32.mrf.mxu0  ;;  %v5377_v9 = vpop.f32.mrf.mxu1  ;;  %1570 = vmatmul.mubr.bf16.gmra.mxu1 %v5143_v22  ;;  %2501 = vmatmul.mubr.bf16.gmra.mxu0 %v5143_v22 }
 0x1aa   : > { %1577 = vmatprep.mubr.bf16.mxu1 %v5147_v25  ;;  %2508 = vmatprep.mubr.bf16.mxu0 %v5147_v25 }
 0x1ab   : > { %v1054_v13 = vpop.f32.mrf.mxu0  ;;  %v1230_v15 = vpop.f32.mrf.mxu1 }
 0x1ad   : > { %v1055_v50 = vpop.f32.mrf.mxu0  ;;  %v1231_v53 = vpop.f32.mrf.mxu1 }
 0x1af   : > { %v1056_v37 = vpop.f32.mrf.mxu0  ;;  %v1232_v4 = vpop.f32.mrf.mxu1 }
 0x1b1   : > { %v5383_v7 = vpop.f32.mrf.mxu0  ;;  %v5385_v44 = vpop.f32.mrf.mxu1  ;;  %1578 = vmatmul.mubr.bf16.gmra.mxu1 %v5153_v28  ;;  %2509 = vmatmul.mubr.bf16.gmra.mxu0 %v5153_v28 }
 0x1b2   : > { %1585 = vmatprep.mubr.bf16.mxu1 %v5157_v30  ;;  %2516 = vmatprep.mubr.bf16.mxu0 %v5157_v30 }
 0x1b3   : > { %v1061_v22 = vpop.f32.mrf.mxu0  ;;  %v1237_v25 = vpop.f32.mrf.mxu1 }
 0x1b5   : > { %v5391_v57 = vpop.f32.mrf.mxu0  ;;  %v5393_v13 = vpop.f32.mrf.mxu1 }
 0x1b6   : > { %6257 = vst [vmem:[#allocation17_spill] sm:$0xff] %v5393_v13 }
 0x1b7   : > { %v1064_v15 = vpop.f32.mrf.mxu0  ;;  %v1240_v50 = vpop.f32.mrf.mxu1 }
 0x1b9   : > { %v1067_v53 = vpop.f32.mrf.mxu0  ;;  %v1243_v37 = vpop.f32.mrf.mxu1  ;;  %1586 = vmatmul.mubr.bf16.gmra.mxu1 %v5163_v32  ;;  %2517 = vmatmul.mubr.bf16.gmra.mxu0 %v5163_v32 }
 0x1ba   : > { %1593 = vmatprep.mubr.bf16.mxu1 %v5167_v35  ;;  %2524 = vmatprep.mubr.bf16.mxu0 %v5167_v35 }
 0x1bb   : > { %v1068_v28 = vpop.f32.mrf.mxu0  ;;  %v1244_v30 = vpop.f32.mrf.mxu1 }
 0x1bd   : > { %v5399_v4 = vpop.f32.mrf.mxu0  ;;  %v5401_v22 = vpop.f32.mrf.mxu1 }
 0x1be   : > { %6258 = vst [vmem:[#allocation18_spill] sm:$0xff] %v5401_v22  ;;  %v4455_v22 = vld [vmem:[%s4958_s23 + $0x1d0] ss:$8 sps:$4 sm:$0xff]  }
 0x1bf   : > { %v1071_v25 = vpop.f32.mrf.mxu0  ;;  %v1247_v13 = vpop.f32.mrf.mxu1 }
 0x1c1   : > { %v5403_v15 = vpop.f32.mrf.mxu0  ;;  %v5405_v50 = vpop.f32.mrf.mxu1  ;;  %1594 = vmatmul.mubr.bf16.gmra.mxu1 %v5173_v38  ;;  %2525 = vmatmul.mubr.bf16.gmra.mxu0 %v5173_v38 }
 0x1c2   : > { %6259 = vst [vmem:[#allocation19_spill] sm:$0xff] %v5405_v50  ;;  %1601 = vmatprep.mubr.bf16.mxu1 %v5177_v40  ;;  %2532 = vmatprep.mubr.bf16.mxu0 %v5177_v40 }
 0x1c3   : > { %v1076_v32 = vpop.f32.mrf.mxu0  ;;  %v1252_v35 = vpop.f32.mrf.mxu1 }
 0x1c5   : > { %v1077_v53 = vpop.f32.mrf.mxu0  ;;  %v1253_v37 = vpop.f32.mrf.mxu1 }
 0x1c7   : > { %v1078_v28 = vpop.f32.mrf.mxu0  ;;  %v1254_v30 = vpop.f32.mrf.mxu1 }
 0x1c9   : > { %v5411_v25 = vpop.f32.mrf.mxu0  ;;  %v5413_v13 = vpop.f32.mrf.mxu1  ;;  %1602 = vmatmul.mubr.bf16.gmra.mxu1 %v5183_v43  ;;  %2533 = vmatmul.mubr.bf16.gmra.mxu0 %v5183_v43 }
 0x1ca   : > { %6260 = vst [vmem:[#allocation20_spill] sm:$0xff] %v5413_v13  ;;  %1609 = vmatprep.mubr.bf16.mxu1 %v5187_v46  ;;  %2540 = vmatprep.mubr.bf16.mxu0 %v5187_v46 }
 0x1cb   : > { %v1083_v38 = vpop.f32.mrf.mxu0  ;;  %v1259_v40 = vpop.f32.mrf.mxu1 }
 0x1cd   : > { %v5419_v32 = vpop.f32.mrf.mxu0  ;;  %v5421_v35 = vpop.f32.mrf.mxu1 }
 0x1ce   : > { %6261 = vst [vmem:[#allocation21_spill] sm:$0xff] %v5421_v35 }
 0x1cf   : > { %v1086_v53 = vpop.f32.mrf.mxu0  ;;  %v1262_v37 = vpop.f32.mrf.mxu1 }
 0x1d1   : > { %v1089_v28 = vpop.f32.mrf.mxu0  ;;  %v1265_v30 = vpop.f32.mrf.mxu1  ;;  %1610 = vmatmul.mubr.bf16.gmra.mxu1 %v5193_v48  ;;  %2541 = vmatmul.mubr.bf16.gmra.mxu0 %v5193_v48 }
 0x1d2   : > { %1617 = vmatprep.mubr.bf16.mxu1 %v5197_v51  ;;  %2548 = vmatprep.mubr.bf16.mxu0 %v5197_v51 }
 0x1d3   : > { %v1090_v43 = vpop.f32.mrf.mxu0  ;;  %v1266_v46 = vpop.f32.mrf.mxu1 }
 0x1d5   : > { %v5427_v38 = vpop.f32.mrf.mxu0  ;;  %v5429_v40 = vpop.f32.mrf.mxu1 }
 0x1d6   : > { %6262 = vst [vmem:[#allocation22_spill] sm:$0xff] %v5429_v40 }
 0x1d7   : > { %v1093_v13 = vpop.f32.mrf.mxu0  ;;  %v1269_v35 = vpop.f32.mrf.mxu1 }
 0x1d9   : > { %v5431_v53 = vpop.f32.mrf.mxu0  ;;  %v5433_v37 = vpop.f32.mrf.mxu1  ;;  %1618 = vmatmul.mubr.bf16.gmra.mxu1 %v5203_v54  ;;  %2549 = vmatmul.mubr.bf16.gmra.mxu0 %v5203_v54 }
 0x1da   : > { %6263 = vst [vmem:[#allocation23_spill] sm:$0xff] %v5433_v37  ;;  %1625 = vmatprep.mubr.bf16.mxu1 %v5207_v56  ;;  %2556 = vmatprep.mubr.bf16.mxu0 %v5207_v56  ;;  %v4453_v37 = vld [vmem:[%s4958_s23 + $0x1c0] ss:$8 sps:$4 sm:$0xff]  }
 0x1db   : > { %v1098_v48 = vpop.f32.mrf.mxu0  ;;  %v1274_v51 = vpop.f32.mrf.mxu1 }
 0x1dd   : > { %v1099_v28 = vpop.f32.mrf.mxu0  ;;  %v1275_v30 = vpop.f32.mrf.mxu1 }
 0x1df   : > { %v1100_v43 = vpop.f32.mrf.mxu0  ;;  %v1276_v46 = vpop.f32.mrf.mxu1 }
 0x1e1   : > { %v5439_v13 = vpop.f32.mrf.mxu0  ;;  %v5441_v35 = vpop.f32.mrf.mxu1  ;;  %1626 = vmatmul.mubr.bf16.gmra.mxu1 %v5213_v59  ;;  %2557 = vmatmul.mubr.bf16.gmra.mxu0 %v5213_v59 }
 0x1e2   : > { %6264 = vst [vmem:[#allocation24_spill] sm:$0xff] %v5441_v35  ;;  %1633 = vmatprep.mubr.bf16.mxu1 %v5217_v62  ;;  %2564 = vmatprep.mubr.bf16.mxu0 %v5217_v62 }
 0x1e3   : > { %v1105_v54 = vpop.f32.mrf.mxu0  ;;  %v1281_v56 = vpop.f32.mrf.mxu1 }
 0x1e5   : > { %v5447_v48 = vpop.f32.mrf.mxu0  ;;  %v5449_v51 = vpop.f32.mrf.mxu1 }
 0x1e6   : > { %6265 = vst [vmem:[#allocation25_spill] sm:$0xff] %v5449_v51 }
 0x1e7   : > { %v1108_v28 = vpop.f32.mrf.mxu0  ;;  %v1284_v30 = vpop.f32.mrf.mxu1 }
 0x1e9   : > { %v1111_v43 = vpop.f32.mrf.mxu0  ;;  %v1287_v46 = vpop.f32.mrf.mxu1  ;;  %1634 = vmatmul.mubr.bf16.gmra.mxu1 %v5223_v1  ;;  %2565 = vmatmul.mubr.bf16.gmra.mxu0 %v5223_v1 }
 0x1ea   : > { %1641 = vmatprep.mubr.bf16.mxu1 %v5227_v3  ;;  %2572 = vmatprep.mubr.bf16.mxu0 %v5227_v3 }
 0x1eb   : > { %v1112_v59 = vpop.f32.mrf.mxu0  ;;  %v1288_v62 = vpop.f32.mrf.mxu1 }
 0x1ed   : > { %v5455_v54 = vpop.f32.mrf.mxu0  ;;  %v5457_v56 = vpop.f32.mrf.mxu1 }
 0x1ee   : > { %6266 = vst [vmem:[#allocation26_spill] sm:$0xff] %v5457_v56 }
 0x1ef   : > { %v1115_v35 = vpop.f32.mrf.mxu0  ;;  %v1291_v51 = vpop.f32.mrf.mxu1 }
 0x1f1   : > { %v5459_v28 = vpop.f32.mrf.mxu0  ;;  %v5461_v30 = vpop.f32.mrf.mxu1  ;;  %1642 = vmatmul.mubr.bf16.gmra.mxu1 %v5233_v8  ;;  %2573 = vmatmul.mubr.bf16.gmra.mxu0 %v5233_v8 }
 0x1f2   : > { %6267 = vst [vmem:[#allocation27_spill] sm:$0xff] %v5461_v30  ;;  %1649 = vmatprep.mubr.bf16.mxu1 %v5237_v10  ;;  %2580 = vmatprep.mubr.bf16.mxu0 %v5237_v10 }
 0x1f3   : > { %v1120_v1 = vpop.f32.mrf.mxu0  ;;  %v1296_v3 = vpop.f32.mrf.mxu1 }
 0x1f5   : > { %v1121_v43 = vpop.f32.mrf.mxu0  ;;  %v1297_v46 = vpop.f32.mrf.mxu1 }
 0x1f7   : > { %v1122_v59 = vpop.f32.mrf.mxu0  ;;  %v1298_v62 = vpop.f32.mrf.mxu1 }
 0x1f9   : > { %v5467_v35 = vpop.f32.mrf.mxu0  ;;  %v5469_v51 = vpop.f32.mrf.mxu1  ;;  %1650 = vmatmul.mubr.bf16.gmra.mxu1 %v5243_v12  ;;  %2581 = vmatmul.mubr.bf16.gmra.mxu0 %v5243_v12 }
 0x1fa   : > { %6268 = vst [vmem:[#allocation28_spill] sm:$0xff] %v5469_v51  ;;  %1657 = vmatprep.mubr.bf16.mxu1 %v5247_v16  ;;  %2588 = vmatprep.mubr.bf16.mxu0 %v5247_v16 }
 0x1fb   : > { %v1127_v8 = vpop.f32.mrf.mxu0  ;;  %v1303_v10 = vpop.f32.mrf.mxu1 }
 0x1fd   : > { %v5475_v1 = vpop.f32.mrf.mxu0  ;;  %v5477_v3 = vpop.f32.mrf.mxu1 }
 0x1fe   : > { %6269 = vst [vmem:[#allocation29_spill] sm:$0xff] %v5477_v3 }
 0x1ff   : > { %v1130_v43 = vpop.f32.mrf.mxu0  ;;  %v1306_v46 = vpop.f32.mrf.mxu1 }
 0x201   : > { %v1133_v59 = vpop.f32.mrf.mxu0  ;;  %v1309_v62 = vpop.f32.mrf.mxu1  ;;  %1658 = vmatmul.mubr.bf16.gmra.mxu1 %v5253_v18  ;;  %2589 = vmatmul.mubr.bf16.gmra.mxu0 %v5253_v18 }
 0x202   : > { %1665 = vmatprep.mubr.bf16.mxu1 %v5257_v21  ;;  %2596 = vmatprep.mubr.bf16.mxu0 %v5257_v21 }
 0x203   : > { %v1134_v12 = vpop.f32.mrf.mxu0  ;;  %v1310_v16 = vpop.f32.mrf.mxu1 }
 0x205   : > { %v5483_v8 = vpop.f32.mrf.mxu0  ;;  %v5485_v10 = vpop.f32.mrf.mxu1 }
 0x206   : > { %6270 = vst [vmem:[#allocation30_spill] sm:$0xff] %v5485_v10 }
 0x207   : > { %v1137_v51 = vpop.f32.mrf.mxu0  ;;  %v1313_v3 = vpop.f32.mrf.mxu1 }
 0x209   : > { %v5487_v43 = vpop.f32.mrf.mxu0  ;;  %v5489_v46 = vpop.f32.mrf.mxu1  ;;  %1666 = vmatmul.mubr.bf16.gmra.mxu1 %v5263_v26  ;;  %2597 = vmatmul.mubr.bf16.gmra.mxu0 %v5263_v26 }
 0x20a   : > { %6271 = vst [vmem:[#allocation31_spill] sm:$0xff] %v5489_v46  ;;  %1673 = vmatprep.mubr.bf16.mxu1 %v5267_v31  ;;  %2604 = vmatprep.mubr.bf16.mxu0 %v5267_v31 }
 0x20b   : > { %v1142_v18 = vpop.f32.mrf.mxu0  ;;  %v1318_v21 = vpop.f32.mrf.mxu1 }
 0x20d   : > { %v1143_v59 = vpop.f32.mrf.mxu0  ;;  %v1319_v62 = vpop.f32.mrf.mxu1 }
 0x20f   : > { %v1144_v12 = vpop.f32.mrf.mxu0  ;;  %v1320_v16 = vpop.f32.mrf.mxu1 }
 0x211   : > { %v5495_v51 = vpop.f32.mrf.mxu0  ;;  %v5497_v3 = vpop.f32.mrf.mxu1  ;;  %1674 = vmatmul.mubr.bf16.gmra.mxu1 %v5273_v36  ;;  %2605 = vmatmul.mubr.bf16.gmra.mxu0 %v5273_v36 }
 0x212   : > { %6272 = vst [vmem:[#allocation32_spill] sm:$0xff] %v5497_v3  ;;  %1681 = vmatprep.mubr.bf16.mxu1 %v5277_v41  ;;  %2612 = vmatprep.mubr.bf16.mxu0 %v5277_v41 }
 0x213   : > { %v1149_v26 = vpop.f32.mrf.mxu0  ;;  %v1325_v31 = vpop.f32.mrf.mxu1 }
 0x215   : > { %v5503_v18 = vpop.f32.mrf.mxu0  ;;  %v5505_v21 = vpop.f32.mrf.mxu1 }
 0x216   : > { %6273 = vst [vmem:[#allocation33_spill] sm:$0xff] %v5505_v21 }
 0x217   : > { %v1152_v59 = vpop.f32.mrf.mxu0  ;;  %v1328_v62 = vpop.f32.mrf.mxu1 }
 0x219   : > { %v1155_v12 = vpop.f32.mrf.mxu0  ;;  %v1331_v16 = vpop.f32.mrf.mxu1  ;;  %1682 = vmatmul.mubr.bf16.gmra.mxu1 %v5283_v47  ;;  %2613 = vmatmul.mubr.bf16.gmra.mxu0 %v5283_v47  ;;  %v4450_v47 = vld [vmem:[%s4958_s23 + $0x1b4] ss:$8 sps:$4 sm:$0xff]  }
 0x21a   : > { %1689 = vmatprep.mubr.bf16.mxu1 %v5287_v52  ;;  %2620 = vmatprep.mubr.bf16.mxu0 %v5287_v52 }
 0x21b   : > { %v1156_v36 = vpop.f32.mrf.mxu0  ;;  %v1332_v41 = vpop.f32.mrf.mxu1 }
 0x21d   : > { %v5511_v26 = vpop.f32.mrf.mxu0  ;;  %v5513_v31 = vpop.f32.mrf.mxu1 }
 0x21e   : > { %6274 = vst [vmem:[#allocation34_spill] sm:$0xff] %v5513_v31 }
 0x21f   : > { %v1159_v21 = vpop.f32.mrf.mxu0  ;;  %v1335_v59 = vpop.f32.mrf.mxu1 }
 0x220   : > { %v4451_v59 = vld [vmem:[%s4958_s23 + $0x1b0] ss:$8 sps:$4 sm:$0xff]  }
 0x221   : > { %v5515_v62 = vpop.f32.mrf.mxu0  ;;  %v5517_v12 = vpop.f32.mrf.mxu1  ;;  %1690 = vmatmul.mubr.bf16.gmra.mxu1 %v5293_v58  ;;  %2621 = vmatmul.mubr.bf16.gmra.mxu0 %v5293_v58 }
 0x222   : > { %6275 = vst [vmem:[#allocation35_spill] sm:$0xff] %v5517_v12  ;;  %1697 = vmatprep.mubr.bf16.mxu1 %v4450_v47  ;;  %2628 = vmatprep.mubr.bf16.mxu0 %v4450_v47  ;;  %v4452_v12 = vld [vmem:[%s4958_s23 + $0x1c4] ss:$8 sps:$4 sm:$0xff]  }
 0x223   : > { %v1164_v52 = vpop.f32.mrf.mxu0  ;;  %v1340_v16 = vpop.f32.mrf.mxu1 }
 0x225   : > { %v1165_v36 = vpop.f32.mrf.mxu0  ;;  %v1341_v41 = vpop.f32.mrf.mxu1 }
 0x227   : > { %v1166_v31 = vpop.f32.mrf.mxu0  ;;  %v1342_v21 = vpop.f32.mrf.mxu1 }
 0x229   : > { %v1507_v3 = vpop.f32.mrf.mxu1  ;;  %1698 = vmatmul.mubr.bf16.gmra.mxu1 %v4451_v59  ;;  %v2438_v46 = vpop.f32.mrf.mxu0  ;;  %2629 = vmatmul.mubr.bf16.gmra.mxu0 %v4451_v59 }
 0x22a   : > { %1705 = vmatprep.mubr.bf16.mxu1 %v4452_v12  ;;  %2636 = vmatprep.mubr.bf16.mxu0 %v4452_v12  ;;  %v1987_v52 = vrot.slane %v1507_v3, 1  ;;  %v2918_v16 = vrot.slane %v2438_v46, 2  ;;  %v4454_v3 = vld [vmem:[%s4958_s23 + $0x1d4] ss:$8 sps:$4 sm:$0xff]  }
 0x22b   : > { %v1509_v10 = vpop.f32.mrf.mxu1  ;;  %v2440_v58 = vpop.f32.mrf.mxu0 }
 0x22d   : > { %v1510_v30 = vpop.f32.mrf.mxu1  ;;  %v2441_v47 = vpop.f32.mrf.mxu0 }
 0x22e   : > { %v1988_v31 = vrot.slane %v1510_v30, 1  ;;  %v2919_v36 = vrot.slane %v2441_v47, 2 }
 0x22f   : > { %v1512_v41 = vpop.f32.mrf.mxu1  ;;  %v2443_v21 = vpop.f32.mrf.mxu0 }
 0x230   : > { %v1989_v56 = vsel %vm1986_vm0, %v1987_v52, %v1988_v31  ;;  %v2920_v59 = vsel %vm2917_vm1, %v2918_v16, %v2919_v36 }
 0x231   : > { %v2211_v12 = vadd.f32 %v1989_v56, %v5299_v63  ;;  %v1515_v10 = vpop.f32.mrf.mxu1  ;;  %1706 = vmatmul.mubr.bf16.gmra.mxu1 %v4453_v37  ;;  %v2446_v58 = vpop.f32.mrf.mxu0  ;;  %2637 = vmatmul.mubr.bf16.gmra.mxu0 %v4453_v37 }
 0x232   : > { %v1990_v40 = vrot.slane %v1515_v10, 1  ;;  %v2921_v50 = vrot.slane %v2446_v58, 2  ;;  %1713 = vmatprep.mubr.bf16.mxu1 %v4454_v3  ;;  %2644 = vmatprep.mubr.bf16.mxu0 %v4454_v3 }
 0x233   : > { %v5529_v30 = vadd.f32 %v2920_v59, %v2211_v12  ;;  %v1517_v46 = vpop.f32.mrf.mxu1  ;;  %v2448_v47 = vpop.f32.mrf.mxu0 }
 0x234   : > { %v1991_v52 = vsel %vm1986_vm0, %v1988_v31, %v1990_v40  ;;  %v2922_v16 = vsel %vm2917_vm1, %v2919_v36, %v2921_v50  ;;  %v4456_v31 = vld [vmem:[%s4958_s23 + $0x1e4] ss:$8 sps:$4 sm:$0xff]  }
 0x235   : > { %v2212_v63 = vadd.f32 %v1991_v52, %v5307_v11  ;;  %v1518_v56 = vpop.f32.mrf.mxu1  ;;  %v2449_v41 = vpop.f32.mrf.mxu0 }
 0x236   : > { %v1992_v12 = vrot.slane %v1518_v56, 1  ;;  %v2923_v3 = vrot.slane %v2449_v41, 2 }
 0x237   : > { %v5534_v37 = vadd.f32 %v2922_v16, %v2212_v63  ;;  %v1520_v21 = vpop.f32.mrf.mxu1  ;;  %v2451_v10 = vpop.f32.mrf.mxu0 }
 0x239   : > { %v1523_v58 = vpop.f32.mrf.mxu1  ;;  %1714 = vmatmul.mubr.bf16.gmra.mxu1 %v4455_v22  ;;  %v2454_v59 = vpop.f32.mrf.mxu0  ;;  %2645 = vmatmul.mubr.bf16.gmra.mxu0 %v4455_v22 }
 0x23a   : > { %v1993_v46 = vrot.slane %v1523_v58, 1  ;;  %v2924_v40 = vrot.slane %v2454_v59, 2  ;;  %1721 = vmatprep.mubr.bf16.mxu1 %v4456_v31  ;;  %2652 = vmatprep.mubr.bf16.mxu0 %v4456_v31 }
 0x23b   : > { %v1525_v50 = vpop.f32.mrf.mxu1  ;;  %v2456_v11 = vpop.f32.mrf.mxu0 }
 0x23c   : > { %v1994_v36 = vsel %vm1986_vm0, %v1992_v12, %v1993_v46  ;;  %v2925_v47 = vsel %vm2917_vm1, %v2923_v3, %v2924_v40  ;;  %v4457_v50 = vld [vmem:[%s4958_s23 + $0x1e0] ss:$8 sps:$4 sm:$0xff]  }
 0x23d   : > { %v2213_v52 = vadd.f32 %v1994_v36, %v5315_v0  ;;  %v1526_v16 = vpop.f32.mrf.mxu1  ;;  %v2457_v63 = vpop.f32.mrf.mxu0  ;;  %v4458_v0 = vld [vmem:[%s4958_s23 + $0x1f4] ss:$8 sps:$4 sm:$0xff]  }
 0x23e   : > { %v1995_v22 = vrot.slane %v1526_v16, 1  ;;  %v2926_v56 = vrot.slane %v2457_v63, 2 }
 0x23f   : > { %v5541_v41 = vadd.f32 %v2925_v47, %v2213_v52  ;;  %v1528_v21 = vpop.f32.mrf.mxu1  ;;  %v2459_v10 = vpop.f32.mrf.mxu0 }
 0x240   : > { %v1996_v58 = vsel %vm1986_vm0, %v1993_v46, %v1995_v22  ;;  %v2927_v59 = vsel %vm2917_vm1, %v2924_v40, %v2926_v56 }
 0x241   : > { %v2214_v31 = vadd.f32 %v1996_v58, %v5319_v49  ;;  %v1531_v12 = vpop.f32.mrf.mxu1  ;;  %1722 = vmatmul.mubr.bf16.gmra.mxu1 %v4457_v50  ;;  %v2462_v3 = vpop.f32.mrf.mxu0  ;;  %2653 = vmatmul.mubr.bf16.gmra.mxu0 %v4457_v50 }
 0x242   : > { %1729 = vmatprep.mubr.bf16.mxu1 %v4458_v0  ;;  %2660 = vmatprep.mubr.bf16.mxu0 %v4458_v0  ;;  %v1997_v46 = vrot.slane %v1531_v12, 1  ;;  %v2928_v40 = vrot.slane %v2462_v3, 2  ;;  %v4460_v12 = vld [vmem:[%s4958_s23 + $0x204] ss:$8 sps:$4 sm:$0xff]  }
 0x243   : > { %v5548_v11 = vadd.f32 %v2927_v59, %v2214_v31  ;;  %v1533_v36 = vpop.f32.mrf.mxu1  ;;  %v2464_v47 = vpop.f32.mrf.mxu0  ;;  %v4459_v59 = vld [vmem:[%s4958_s23 + $0x1f0] ss:$8 sps:$4 sm:$0xff]  }
 0x245   : > { %v1534_v52 = vpop.f32.mrf.mxu1  ;;  %v2465_v16 = vpop.f32.mrf.mxu0 }
 0x246   : > { %v1998_v63 = vrot.slane %v1534_v52, 1  ;;  %v2929_v49 = vrot.slane %v2465_v16, 2 }
 0x247   : > { %v1536_v22 = vpop.f32.mrf.mxu1  ;;  %v2467_v56 = vpop.f32.mrf.mxu0 }
 0x248   : > { %v1999_v21 = vsel %vm1986_vm0, %v1997_v46, %v1998_v63  ;;  %v2930_v10 = vsel %vm2917_vm1, %v2928_v40, %v2929_v49 }
 0x249   : > { %v2215_v58 = vadd.f32 %v1999_v21, %v5327_v6  ;;  %v1539_v50 = vpop.f32.mrf.mxu1  ;;  %1730 = vmatmul.mubr.bf16.gmra.mxu1 %v4459_v59  ;;  %v2470_v31 = vpop.f32.mrf.mxu0  ;;  %2661 = vmatmul.mubr.bf16.gmra.mxu0 %v4459_v59 }
 0x24a   : > { %v2000_v0 = vrot.slane %v1539_v50, 1  ;;  %v2931_v36 = vrot.slane %v2470_v31, 2  ;;  %1737 = vmatprep.mubr.bf16.mxu1 %v4460_v12  ;;  %2668 = vmatprep.mubr.bf16.mxu0 %v4460_v12  ;;  %v4461_v31 = vld [vmem:[%s4958_s23 + $0x200] ss:$8 sps:$4 sm:$0xff]  }
 0x24b   : > { %v5555_v3 = vadd.f32 %v2930_v10, %v2215_v58  ;;  %v1541_v47 = vpop.f32.mrf.mxu1  ;;  %v2472_v52 = vpop.f32.mrf.mxu0 }
 0x24c   : > { %v2001_v16 = vsel %vm1986_vm0, %v1998_v63, %v2000_v0  ;;  %v2932_v46 = vsel %vm2917_vm1, %v2929_v49, %v2931_v36  ;;  %v4462_v0 = vld [vmem:[%s4958_s23 + $0x214] ss:$8 sps:$4 sm:$0xff]  }
 0x24d   : > { %v2216_v6 = vadd.f32 %v2001_v16, %v5335_v24  ;;  %v1542_v40 = vpop.f32.mrf.mxu1  ;;  %v2473_v22 = vpop.f32.mrf.mxu0 }
 0x24e   : > { %v2002_v58 = vrot.slane %v1542_v40, 1  ;;  %v2933_v12 = vrot.slane %v2473_v22, 2 }
 0x24f   : > { %v5560_v56 = vadd.f32 %v2932_v46, %v2216_v6  ;;  %v1544_v21 = vpop.f32.mrf.mxu1  ;;  %v2475_v50 = vpop.f32.mrf.mxu0 }
 0x251   : > { %v1547_v59 = vpop.f32.mrf.mxu1  ;;  %1738 = vmatmul.mubr.bf16.gmra.mxu1 %v4461_v31  ;;  %v2478_v10 = vpop.f32.mrf.mxu0  ;;  %2669 = vmatmul.mubr.bf16.gmra.mxu0 %v4461_v31 }
 0x252   : > { %v2003_v47 = vrot.slane %v1547_v59, 1  ;;  %v2934_v63 = vrot.slane %v2478_v10, 2  ;;  %1745 = vmatprep.mubr.bf16.mxu1 %v4462_v0  ;;  %2676 = vmatprep.mubr.bf16.mxu0 %v4462_v0 }
 0x253   : > { %v1549_v49 = vpop.f32.mrf.mxu1  ;;  %v2480_v24 = vpop.f32.mrf.mxu0 }
 0x254   : > { %v2004_v36 = vsel %vm1986_vm0, %v2002_v58, %v2003_v47  ;;  %v2935_v52 = vsel %vm2917_vm1, %v2933_v12, %v2934_v63  ;;  %v4463_v49 = vld [vmem:[%s4958_s23 + $0x210] ss:$8 sps:$4 sm:$0xff]  }
 0x255   : > { %v2217_v16 = vadd.f32 %v2004_v36, %v5343_v29  ;;  %v1550_v46 = vpop.f32.mrf.mxu1  ;;  %v2481_v6 = vpop.f32.mrf.mxu0  ;;  %v4464_v29 = vld [vmem:[%s4958_s23 + $0x224] ss:$8 sps:$4 sm:$0xff]  }
 0x256   : > { %v2005_v21 = vrot.slane %v1550_v46, 1  ;;  %v2936_v40 = vrot.slane %v2481_v6, 2 }
 0x257   : > { %v5567_v22 = vadd.f32 %v2935_v52, %v2217_v16  ;;  %v1552_v50 = vpop.f32.mrf.mxu1  ;;  %v2483_v59 = vpop.f32.mrf.mxu0 }
 0x258   : > { %v2006_v31 = vsel %vm1986_vm0, %v2003_v47, %v2005_v21  ;;  %v2937_v10 = vsel %vm2917_vm1, %v2934_v63, %v2936_v40 }
 0x259   : > { %v2218_v0 = vadd.f32 %v2006_v31, %v5347_v17  ;;  %v1555_v58 = vpop.f32.mrf.mxu1  ;;  %1746 = vmatmul.mubr.bf16.gmra.mxu1 %v4463_v49  ;;  %v2486_v12 = vpop.f32.mrf.mxu0  ;;  %2677 = vmatmul.mubr.bf16.gmra.mxu0 %v4463_v49 }
 0x25a   : > { %1753 = vmatprep.mubr.bf16.mxu1 %v4464_v29  ;;  %2684 = vmatprep.mubr.bf16.mxu0 %v4464_v29  ;;  %v2007_v47 = vrot.slane %v1555_v58, 1  ;;  %v2938_v63 = vrot.slane %v2486_v12, 2  ;;  %v4466_v58 = vld [vmem:[%s4958_s23 + $0x234] ss:$8 sps:$4 sm:$0xff]  }
 0x25b   : > { %v5574_v24 = vadd.f32 %v2937_v10, %v2218_v0  ;;  %v1557_v36 = vpop.f32.mrf.mxu1  ;;  %v2488_v52 = vpop.f32.mrf.mxu0  ;;  %v4465_v10 = vld [vmem:[%s4958_s23 + $0x220] ss:$8 sps:$4 sm:$0xff]  }
 0x25d   : > { %v1558_v16 = vpop.f32.mrf.mxu1  ;;  %v2489_v46 = vpop.f32.mrf.mxu0 }
 0x25e   : > { %v2008_v6 = vrot.slane %v1558_v16, 1  ;;  %v2939_v17 = vrot.slane %v2489_v46, 2 }
 0x25f   : > { %v1560_v21 = vpop.f32.mrf.mxu1  ;;  %v2491_v40 = vpop.f32.mrf.mxu0 }
 0x260   : > { %v2009_v50 = vsel %vm1986_vm0, %v2007_v47, %v2008_v6  ;;  %v2940_v59 = vsel %vm2917_vm1, %v2938_v63, %v2939_v17 }
 0x261   : > { %v2219_v31 = vadd.f32 %v2009_v50, %v5355_v27  ;;  %v1563_v49 = vpop.f32.mrf.mxu1  ;;  %1754 = vmatmul.mubr.bf16.gmra.mxu1 %v4465_v10  ;;  %v2494_v0 = vpop.f32.mrf.mxu0  ;;  %2685 = vmatmul.mubr.bf16.gmra.mxu0 %v4465_v10 }
 0x262   : > { %v2010_v29 = vrot.slane %v1563_v49, 1  ;;  %v2941_v36 = vrot.slane %v2494_v0, 2  ;;  %1761 = vmatprep.mubr.bf16.mxu1 %v4466_v58  ;;  %2692 = vmatprep.mubr.bf16.mxu0 %v4466_v58  ;;  %v4467_v0 = vld [vmem:[%s4958_s23 + $0x230] ss:$8 sps:$4 sm:$0xff]  }
 0x263   : > { %v5581_v12 = vadd.f32 %v2940_v59, %v2219_v31  ;;  %v1565_v52 = vpop.f32.mrf.mxu1  ;;  %v2496_v16 = vpop.f32.mrf.mxu0 }
 0x264   : > { %v2011_v46 = vsel %vm1986_vm0, %v2008_v6, %v2010_v29  ;;  %v2942_v47 = vsel %vm2917_vm1, %v2939_v17, %v2941_v36  ;;  %v4468_v29 = vld [vmem:[%s4958_s23 + $0x244] ss:$8 sps:$4 sm:$0xff]  }
 0x265   : > { %v2220_v27 = vadd.f32 %v2011_v46, %v5363_v45  ;;  %v1566_v63 = vpop.f32.mrf.mxu1  ;;  %v2497_v21 = vpop.f32.mrf.mxu0 }
 0x266   : > { %v2012_v31 = vrot.slane %v1566_v63, 1  ;;  %v2943_v58 = vrot.slane %v2497_v21, 2 }
 0x267   : > { %v5586_v40 = vadd.f32 %v2942_v47, %v2220_v27  ;;  %v1568_v50 = vpop.f32.mrf.mxu1  ;;  %v2499_v49 = vpop.f32.mrf.mxu0 }
 0x269   : > { %v1571_v10 = vpop.f32.mrf.mxu1  ;;  %1762 = vmatmul.mubr.bf16.gmra.mxu1 %v4467_v0  ;;  %v2502_v59 = vpop.f32.mrf.mxu0  ;;  %2693 = vmatmul.mubr.bf16.gmra.mxu0 %v4467_v0 }
 0x26a   : > { %v2013_v52 = vrot.slane %v1571_v10, 1  ;;  %v2944_v6 = vrot.slane %v2502_v59, 2  ;;  %1769 = vmatprep.mubr.bf16.mxu1 %v4468_v29  ;;  %2700 = vmatprep.mubr.bf16.mxu0 %v4468_v29 }
 0x26b   : > { %v1573_v17 = vpop.f32.mrf.mxu1  ;;  %v2504_v45 = vpop.f32.mrf.mxu0 }
 0x26c   : > { %v2014_v36 = vsel %vm1986_vm0, %v2012_v31, %v2013_v52  ;;  %v2945_v16 = vsel %vm2917_vm1, %v2943_v58, %v2944_v6  ;;  %v4469_v17 = vld [vmem:[%s4958_s23 + $0x240] ss:$8 sps:$4 sm:$0xff]  }
 0x26d   : > { %v2221_v46 = vadd.f32 %v2014_v36, %v5371_v23  ;;  %v1574_v47 = vpop.f32.mrf.mxu1  ;;  %v2505_v27 = vpop.f32.mrf.mxu0  ;;  %v4470_v23 = vld [vmem:[%s4958_s23 + $0x254] ss:$8 sps:$4 sm:$0xff]  }
 0x26e   : > { %v2015_v50 = vrot.slane %v1574_v47, 1  ;;  %v2946_v63 = vrot.slane %v2505_v27, 2 }
 0x26f   : > { %v5593_v21 = vadd.f32 %v2945_v16, %v2221_v46  ;;  %v1576_v49 = vpop.f32.mrf.mxu1  ;;  %v2507_v10 = vpop.f32.mrf.mxu0 }
 0x270   : > { %v2016_v0 = vsel %vm1986_vm0, %v2013_v52, %v2015_v50  ;;  %v2947_v59 = vsel %vm2917_vm1, %v2944_v6, %v2946_v63 }
 0x271   : > { %v2222_v29 = vadd.f32 %v2016_v0, %v5375_v61  ;;  %v1579_v31 = vpop.f32.mrf.mxu1  ;;  %1770 = vmatmul.mubr.bf16.gmra.mxu1 %v4469_v17  ;;  %v2510_v58 = vpop.f32.mrf.mxu0  ;;  %2701 = vmatmul.mubr.bf16.gmra.mxu0 %v4469_v17 }
 0x272   : > { %1777 = vmatprep.mubr.bf16.mxu1 %v4470_v23  ;;  %2708 = vmatprep.mubr.bf16.mxu0 %v4470_v23  ;;  %v2017_v52 = vrot.slane %v1579_v31, 1  ;;  %v2948_v6 = vrot.slane %v2510_v58, 2  ;;  %v4472_v31 = vld [vmem:[%s4958_s23 + $0x264] ss:$8 sps:$4 sm:$0xff]  }
 0x273   : > { %v5600_v45 = vadd.f32 %v2947_v59, %v2222_v29  ;;  %v1581_v36 = vpop.f32.mrf.mxu1  ;;  %v2512_v16 = vpop.f32.mrf.mxu0  ;;  %v4471_v59 = vld [vmem:[%s4958_s23 + $0x250] ss:$8 sps:$4 sm:$0xff]  }
 0x275   : > { %v1582_v46 = vpop.f32.mrf.mxu1  ;;  %v2513_v47 = vpop.f32.mrf.mxu0 }
 0x276   : > { %v2018_v27 = vrot.slane %v1582_v46, 1  ;;  %v2949_v61 = vrot.slane %v2513_v47, 2 }
 0x277   : > { %v1584_v50 = vpop.f32.mrf.mxu1  ;;  %v2515_v63 = vpop.f32.mrf.mxu0 }
 0x278   : > { %v2019_v49 = vsel %vm1986_vm0, %v2017_v52, %v2018_v27  ;;  %v2950_v10 = vsel %vm2917_vm1, %v2948_v6, %v2949_v61 }
 0x279   : > { %v2223_v0 = vadd.f32 %v2019_v49, %v5383_v7  ;;  %v1587_v17 = vpop.f32.mrf.mxu1  ;;  %1778 = vmatmul.mubr.bf16.gmra.mxu1 %v4471_v59  ;;  %v2518_v29 = vpop.f32.mrf.mxu0  ;;  %2709 = vmatmul.mubr.bf16.gmra.mxu0 %v4471_v59 }
 0x27a   : > { %v2020_v23 = vrot.slane %v1587_v17, 1  ;;  %v2951_v36 = vrot.slane %v2518_v29, 2  ;;  %1785 = vmatprep.mubr.bf16.mxu1 %v4472_v31  ;;  %2716 = vmatprep.mubr.bf16.mxu0 %v4472_v31  ;;  %v4473_v29 = vld [vmem:[%s4958_s23 + $0x260] ss:$8 sps:$4 sm:$0xff]  }
 0x27b   : > { %v5607_v58 = vadd.f32 %v2950_v10, %v2223_v0  ;;  %v1589_v16 = vpop.f32.mrf.mxu1  ;;  %v2520_v46 = vpop.f32.mrf.mxu0 }
 0x27c   : > { %v2021_v47 = vsel %vm1986_vm0, %v2018_v27, %v2020_v23  ;;  %v2952_v52 = vsel %vm2917_vm1, %v2949_v61, %v2951_v36  ;;  %v4474_v23 = vld [vmem:[%s4958_s23 + $0x274] ss:$8 sps:$4 sm:$0xff]  }
 0x27d   : > { %v2224_v7 = vadd.f32 %v2021_v47, %v5391_v57  ;;  %v1590_v6 = vpop.f32.mrf.mxu1  ;;  %v2521_v50 = vpop.f32.mrf.mxu0 }
 0x27e   : > { %v2022_v0 = vrot.slane %v1590_v6, 1  ;;  %v2953_v31 = vrot.slane %v2521_v50, 2 }
 0x27f   : > { %v5612_v63 = vadd.f32 %v2952_v52, %v2224_v7  ;;  %v1592_v49 = vpop.f32.mrf.mxu1  ;;  %v2523_v17 = vpop.f32.mrf.mxu0 }
 0x281   : > { %v1595_v59 = vpop.f32.mrf.mxu1  ;;  %1786 = vmatmul.mubr.bf16.gmra.mxu1 %v4473_v29  ;;  %v2526_v10 = vpop.f32.mrf.mxu0  ;;  %2717 = vmatmul.mubr.bf16.gmra.mxu0 %v4473_v29 }
 0x282   : > { %v2023_v16 = vrot.slane %v1595_v59, 1  ;;  %v2954_v27 = vrot.slane %v2526_v10, 2  ;;  %1793 = vmatprep.mubr.bf16.mxu1 %v4474_v23  ;;  %2724 = vmatprep.mubr.bf16.mxu0 %v4474_v23 }
 0x283   : > { %v1597_v61 = vpop.f32.mrf.mxu1  ;;  %v2528_v57 = vpop.f32.mrf.mxu0 }
 0x284   : > { %v2024_v36 = vsel %vm1986_vm0, %v2022_v0, %v2023_v16  ;;  %v2955_v46 = vsel %vm2917_vm1, %v2953_v31, %v2954_v27  ;;  %v4475_v61 = vld [vmem:[%s4958_s23 + $0x270] ss:$8 sps:$4 sm:$0xff]  }
 0x285   : > { %v2225_v47 = vadd.f32 %v2024_v36, %v5399_v4  ;;  %v1598_v52 = vpop.f32.mrf.mxu1  ;;  %v2529_v7 = vpop.f32.mrf.mxu0  ;;  %v4476_v4 = vld [vmem:[%s4958_s23 + $0x284] ss:$8 sps:$4 sm:$0xff]  }
 0x286   : > { %v2025_v49 = vrot.slane %v1598_v52, 1  ;;  %v2956_v6 = vrot.slane %v2529_v7, 2 }
 0x287   : > { %v5619_v50 = vadd.f32 %v2955_v46, %v2225_v47  ;;  %v1600_v17 = vpop.f32.mrf.mxu1  ;;  %v2531_v59 = vpop.f32.mrf.mxu0 }
 0x288   : > { %v2026_v29 = vsel %vm1986_vm0, %v2023_v16, %v2025_v49  ;;  %v2957_v10 = vsel %vm2917_vm1, %v2954_v27, %v2956_v6 }
 0x289   : > { %v2226_v23 = vadd.f32 %v2026_v29, %v5403_v15  ;;  %v1603_v0 = vpop.f32.mrf.mxu1  ;;  %1794 = vmatmul.mubr.bf16.gmra.mxu1 %v4475_v61  ;;  %v2534_v31 = vpop.f32.mrf.mxu0  ;;  %2725 = vmatmul.mubr.bf16.gmra.mxu0 %v4475_v61 }
 0x28a   : > { %1801 = vmatprep.mubr.bf16.mxu1 %v4476_v4  ;;  %2732 = vmatprep.mubr.bf16.mxu0 %v4476_v4  ;;  %v2027_v16 = vrot.slane %v1603_v0, 1  ;;  %v2958_v27 = vrot.slane %v2534_v31, 2  ;;  %v4478_v0 = vld [vmem:[%s4958_s23 + $0x294] ss:$8 sps:$4 sm:$0xff]  }
 0x28b   : > { %v5626_v57 = vadd.f32 %v2957_v10, %v2226_v23  ;;  %v1605_v36 = vpop.f32.mrf.mxu1  ;;  %v2536_v46 = vpop.f32.mrf.mxu0  ;;  %v4477_v10 = vld [vmem:[%s4958_s23 + $0x280] ss:$8 sps:$4 sm:$0xff]  }
 0x28d   : > { %v1606_v47 = vpop.f32.mrf.mxu1  ;;  %v2537_v52 = vpop.f32.mrf.mxu0 }
 0x28e   : > { %v2028_v7 = vrot.slane %v1606_v47, 1  ;;  %v2959_v15 = vrot.slane %v2537_v52, 2 }
 0x28f   : > { %v1608_v49 = vpop.f32.mrf.mxu1  ;;  %v2539_v6 = vpop.f32.mrf.mxu0 }
 0x290   : > { %v2029_v17 = vsel %vm1986_vm0, %v2027_v16, %v2028_v7  ;;  %v2960_v59 = vsel %vm2917_vm1, %v2958_v27, %v2959_v15 }
 0x291   : > { %v2227_v29 = vadd.f32 %v2029_v17, %v5411_v25  ;;  %v1611_v61 = vpop.f32.mrf.mxu1  ;;  %1802 = vmatmul.mubr.bf16.gmra.mxu1 %v4477_v10  ;;  %v2542_v23 = vpop.f32.mrf.mxu0  ;;  %2733 = vmatmul.mubr.bf16.gmra.mxu0 %v4477_v10 }
 0x292   : > { %v2030_v4 = vrot.slane %v1611_v61, 1  ;;  %v2961_v36 = vrot.slane %v2542_v23, 2  ;;  %1809 = vmatprep.mubr.bf16.mxu1 %v4478_v0  ;;  %2740 = vmatprep.mubr.bf16.mxu0 %v4478_v0  ;;  %v4479_v23 = vld [vmem:[%s4958_s23 + $0x290] ss:$8 sps:$4 sm:$0xff]  }
 0x293   : > { %v5633_v31 = vadd.f32 %v2960_v59, %v2227_v29  ;;  %v1613_v46 = vpop.f32.mrf.mxu1  ;;  %v2544_v47 = vpop.f32.mrf.mxu0 }
 0x294   : > { %v2031_v52 = vsel %vm1986_vm0, %v2028_v7, %v2030_v4  ;;  %v2962_v16 = vsel %vm2917_vm1, %v2959_v15, %v2961_v36  ;;  %v4480_v4 = vld [vmem:[%s4958_s23 + $0x2a4] ss:$8 sps:$4 sm:$0xff]  }
 0x295   : > { %v2228_v25 = vadd.f32 %v2031_v52, %v5419_v32  ;;  %v1614_v27 = vpop.f32.mrf.mxu1  ;;  %v2545_v49 = vpop.f32.mrf.mxu0 }
 0x296   : > { %v2032_v29 = vrot.slane %v1614_v27, 1  ;;  %v2963_v0 = vrot.slane %v2545_v49, 2 }
 0x297   : > { %v5638_v6 = vadd.f32 %v2962_v16, %v2228_v25  ;;  %v1616_v17 = vpop.f32.mrf.mxu1  ;;  %v2547_v61 = vpop.f32.mrf.mxu0 }
 0x299   : > { %v1619_v10 = vpop.f32.mrf.mxu1  ;;  %1810 = vmatmul.mubr.bf16.gmra.mxu1 %v4479_v23  ;;  %v2550_v59 = vpop.f32.mrf.mxu0  ;;  %2741 = vmatmul.mubr.bf16.gmra.mxu0 %v4479_v23 }
 0x29a   : > { %v2033_v46 = vrot.slane %v1619_v10, 1  ;;  %v2964_v7 = vrot.slane %v2550_v59, 2  ;;  %1817 = vmatprep.mubr.bf16.mxu1 %v4480_v4  ;;  %2748 = vmatprep.mubr.bf16.mxu0 %v4480_v4 }
 0x29b   : > { %v1621_v15 = vpop.f32.mrf.mxu1  ;;  %v2552_v32 = vpop.f32.mrf.mxu0 }
 0x29c   : > { %v2034_v36 = vsel %vm1986_vm0, %v2032_v29, %v2033_v46  ;;  %v2965_v47 = vsel %vm2917_vm1, %v2963_v0, %v2964_v7  ;;  %v4481_v15 = vld [vmem:[%s4958_s23 + $0x2a0] ss:$8 sps:$4 sm:$0xff]  }
 0x29d   : > { %v2229_v52 = vadd.f32 %v2034_v36, %v5427_v38  ;;  %v1622_v16 = vpop.f32.mrf.mxu1  ;;  %v2553_v25 = vpop.f32.mrf.mxu0  ;;  %v4482_v38 = vld [vmem:[%s4958_s23 + $0x2b4] ss:$8 sps:$4 sm:$0xff]  }
 0x29e   : > { %v2035_v17 = vrot.slane %v1622_v16, 1  ;;  %v2966_v27 = vrot.slane %v2553_v25, 2 }
 0x29f   : > { %v5645_v49 = vadd.f32 %v2965_v47, %v2229_v52  ;;  %v1624_v61 = vpop.f32.mrf.mxu1  ;;  %v2555_v10 = vpop.f32.mrf.mxu0 }
 0x2a0   : > { %v2036_v23 = vsel %vm1986_vm0, %v2033_v46, %v2035_v17  ;;  %v2967_v59 = vsel %vm2917_vm1, %v2964_v7, %v2966_v27 }
 0x2a1   : > { %v2230_v4 = vadd.f32 %v2036_v23, %v5431_v53  ;;  %v1627_v29 = vpop.f32.mrf.mxu1  ;;  %1818 = vmatmul.mubr.bf16.gmra.mxu1 %v4481_v15  ;;  %v2558_v0 = vpop.f32.mrf.mxu0  ;;  %2749 = vmatmul.mubr.bf16.gmra.mxu0 %v4481_v15 }
 0x2a2   : > { %1825 = vmatprep.mubr.bf16.mxu1 %v4482_v38  ;;  %2756 = vmatprep.mubr.bf16.mxu0 %v4482_v38  ;;  %v2037_v46 = vrot.slane %v1627_v29, 1  ;;  %v2968_v7 = vrot.slane %v2558_v0, 2  ;;  %v4484_v29 = vld [vmem:[%s4958_s23 + $0x2c4] ss:$8 sps:$4 sm:$0xff]  }
 0x2a3   : > { %v5652_v32 = vadd.f32 %v2967_v59, %v2230_v4  ;;  %v1629_v36 = vpop.f32.mrf.mxu1  ;;  %v2560_v47 = vpop.f32.mrf.mxu0  ;;  %v4483_v59 = vld [vmem:[%s4958_s23 + $0x2b0] ss:$8 sps:$4 sm:$0xff]  }
 0x2a5   : > { %v1630_v52 = vpop.f32.mrf.mxu1  ;;  %v2561_v16 = vpop.f32.mrf.mxu0 }
 0x2a6   : > { %v2038_v25 = vrot.slane %v1630_v52, 1  ;;  %v2969_v53 = vrot.slane %v2561_v16, 2 }
 0x2a7   : > { %v1632_v17 = vpop.f32.mrf.mxu1  ;;  %v2563_v27 = vpop.f32.mrf.mxu0 }
 0x2a8   : > { %v2039_v61 = vsel %vm1986_vm0, %v2037_v46, %v2038_v25  ;;  %v2970_v10 = vsel %vm2917_vm1, %v2968_v7, %v2969_v53 }
 0x2a9   : > { %v2231_v23 = vadd.f32 %v2039_v61, %v5439_v13  ;;  %v1635_v15 = vpop.f32.mrf.mxu1  ;;  %1826 = vmatmul.mubr.bf16.gmra.mxu1 %v4483_v59  ;;  %v2566_v4 = vpop.f32.mrf.mxu0  ;;  %2757 = vmatmul.mubr.bf16.gmra.mxu0 %v4483_v59 }
 0x2aa   : > { %v2040_v38 = vrot.slane %v1635_v15, 1  ;;  %v2971_v36 = vrot.slane %v2566_v4, 2  ;;  %1833 = vmatprep.mubr.bf16.mxu1 %v4484_v29  ;;  %2764 = vmatprep.mubr.bf16.mxu0 %v4484_v29  ;;  %v4485_v4 = vld [vmem:[%s4958_s23 + $0x2c0] ss:$8 sps:$4 sm:$0xff]  }
 0x2ab   : > { %v5659_v0 = vadd.f32 %v2970_v10, %v2231_v23  ;;  %v1637_v47 = vpop.f32.mrf.mxu1  ;;  %v2568_v52 = vpop.f32.mrf.mxu0 }
 0x2ac   : > { %v2041_v16 = vsel %vm1986_vm0, %v2038_v25, %v2040_v38  ;;  %v2972_v46 = vsel %vm2917_vm1, %v2969_v53, %v2971_v36  ;;  %v4486_v38 = vld [vmem:[%s4958_s23 + $0x2d4] ss:$8 sps:$4 sm:$0xff]  }
 0x2ad   : > { %v2232_v13 = vadd.f32 %v2041_v16, %v5447_v48  ;;  %v1638_v7 = vpop.f32.mrf.mxu1  ;;  %v2569_v17 = vpop.f32.mrf.mxu0 }
 0x2ae   : > { %v2042_v23 = vrot.slane %v1638_v7, 1  ;;  %v2973_v29 = vrot.slane %v2569_v17, 2 }
 0x2af   : > { %v5664_v27 = vadd.f32 %v2972_v46, %v2232_v13  ;;  %v1640_v61 = vpop.f32.mrf.mxu1  ;;  %v2571_v15 = vpop.f32.mrf.mxu0 }
 0x2b1   : > { %v1643_v59 = vpop.f32.mrf.mxu1  ;;  %1834 = vmatmul.mubr.bf16.gmra.mxu1 %v4485_v4  ;;  %v2574_v10 = vpop.f32.mrf.mxu0  ;;  %2765 = vmatmul.mubr.bf16.gmra.mxu0 %v4485_v4 }
 0x2b2   : > { %v2043_v47 = vrot.slane %v1643_v59, 1  ;;  %v2974_v25 = vrot.slane %v2574_v10, 2  ;;  %1841 = vmatprep.mubr.bf16.mxu1 %v4486_v38  ;;  %2772 = vmatprep.mubr.bf16.mxu0 %v4486_v38 }
 0x2b3   : > { %v1645_v53 = vpop.f32.mrf.mxu1  ;;  %v2576_v48 = vpop.f32.mrf.mxu0 }
 0x2b4   : > { %v2044_v36 = vsel %vm1986_vm0, %v2042_v23, %v2043_v47  ;;  %v2975_v52 = vsel %vm2917_vm1, %v2973_v29, %v2974_v25  ;;  %v4487_v53 = vld [vmem:[%s4958_s23 + $0x2d0] ss:$8 sps:$4 sm:$0xff]  }
 0x2b5   : > { %v2233_v16 = vadd.f32 %v2044_v36, %v5455_v54  ;;  %v1646_v46 = vpop.f32.mrf.mxu1  ;;  %v2577_v13 = vpop.f32.mrf.mxu0  ;;  %v4488_v54 = vld [vmem:[%s4958_s23 + $0x2e4] ss:$8 sps:$4 sm:$0xff]  }
 0x2b6   : > { %v2045_v61 = vrot.slane %v1646_v46, 1  ;;  %v2976_v7 = vrot.slane %v2577_v13, 2 }
 0x2b7   : > { %v5671_v17 = vadd.f32 %v2975_v52, %v2233_v16  ;;  %v1648_v15 = vpop.f32.mrf.mxu1  ;;  %v2579_v59 = vpop.f32.mrf.mxu0 }
 0x2b8   : > { %v2046_v4 = vsel %vm1986_vm0, %v2043_v47, %v2045_v61  ;;  %v2977_v10 = vsel %vm2917_vm1, %v2974_v25, %v2976_v7 }
 0x2b9   : > { %v2234_v38 = vadd.f32 %v2046_v4, %v5459_v28  ;;  %v1651_v23 = vpop.f32.mrf.mxu1  ;;  %1842 = vmatmul.mubr.bf16.gmra.mxu1 %v4487_v53  ;;  %v2582_v29 = vpop.f32.mrf.mxu0  ;;  %2773 = vmatmul.mubr.bf16.gmra.mxu0 %v4487_v53 }
 0x2ba   : > { %1849 = vmatprep.mubr.bf16.mxu1 %v4488_v54  ;;  %2780 = vmatprep.mubr.bf16.mxu0 %v4488_v54  ;;  %v2047_v47 = vrot.slane %v1651_v23, 1  ;;  %v2978_v25 = vrot.slane %v2582_v29, 2  ;;  %v4490_v23 = vld [vmem:[%s4958_s23 + $0x2f4] ss:$8 sps:$4 sm:$0xff]  }
 0x2bb   : > { %v5678_v48 = vadd.f32 %v2977_v10, %v2234_v38  ;;  %v1653_v36 = vpop.f32.mrf.mxu1  ;;  %v2584_v52 = vpop.f32.mrf.mxu0  ;;  %v4489_v10 = vld [vmem:[%s4958_s23 + $0x2e0] ss:$8 sps:$4 sm:$0xff]  }
 0x2bd   : > { %v1654_v16 = vpop.f32.mrf.mxu1  ;;  %v2585_v46 = vpop.f32.mrf.mxu0 }
 0x2be   : > { %v2048_v13 = vrot.slane %v1654_v16, 1  ;;  %v2979_v28 = vrot.slane %v2585_v46, 2 }
 0x2bf   : > { %v1656_v61 = vpop.f32.mrf.mxu1  ;;  %v2587_v7 = vpop.f32.mrf.mxu0 }
 0x2c0   : > { %v2049_v15 = vsel %vm1986_vm0, %v2047_v47, %v2048_v13  ;;  %v2980_v59 = vsel %vm2917_vm1, %v2978_v25, %v2979_v28 }
 0x2c1   : > { %v2235_v4 = vadd.f32 %v2049_v15, %v5467_v35  ;;  %v1659_v53 = vpop.f32.mrf.mxu1  ;;  %1850 = vmatmul.mubr.bf16.gmra.mxu1 %v4489_v10  ;;  %v2590_v38 = vpop.f32.mrf.mxu0  ;;  %2781 = vmatmul.mubr.bf16.gmra.mxu0 %v4489_v10 }
 0x2c2   : > { %v2050_v54 = vrot.slane %v1659_v53, 1  ;;  %v2981_v36 = vrot.slane %v2590_v38, 2  ;;  %1857 = vmatprep.mubr.bf16.mxu1 %v4490_v23  ;;  %2788 = vmatprep.mubr.bf16.mxu0 %v4490_v23  ;;  %v4491_v38 = vld [vmem:[%s4958_s23 + $0x2f0] ss:$8 sps:$4 sm:$0xff]  }
 0x2c3   : > { %v5685_v29 = vadd.f32 %v2980_v59, %v2235_v4  ;;  %v1661_v52 = vpop.f32.mrf.mxu1  ;;  %v2592_v16 = vpop.f32.mrf.mxu0 }
 0x2c4   : > { %v2051_v46 = vsel %vm1986_vm0, %v2048_v13, %v2050_v54  ;;  %v2982_v47 = vsel %vm2917_vm1, %v2979_v28, %v2981_v36  ;;  %v4492_v54 = vld [vmem:[%s4958_s23 + $0x304] ss:$8 sps:$4 sm:$0xff]  }
 0x2c5   : > { %v2236_v35 = vadd.f32 %v2051_v46, %v5475_v1  ;;  %v1662_v25 = vpop.f32.mrf.mxu1  ;;  %v2593_v61 = vpop.f32.mrf.mxu0 }
 0x2c6   : > { %v2052_v4 = vrot.slane %v1662_v25, 1  ;;  %v2983_v23 = vrot.slane %v2593_v61, 2 }
 0x2c7   : > { %v5690_v7 = vadd.f32 %v2982_v47, %v2236_v35  ;;  %v1664_v15 = vpop.f32.mrf.mxu1  ;;  %v2595_v53 = vpop.f32.mrf.mxu0 }
 0x2c9   : > { %v1667_v10 = vpop.f32.mrf.mxu1  ;;  %1858 = vmatmul.mubr.bf16.gmra.mxu1 %v4491_v38  ;;  %v2598_v59 = vpop.f32.mrf.mxu0  ;;  %2789 = vmatmul.mubr.bf16.gmra.mxu0 %v4491_v38 }
 0x2ca   : > { %v2053_v52 = vrot.slane %v1667_v10, 1  ;;  %v2984_v13 = vrot.slane %v2598_v59, 2  ;;  %1865 = vmatprep.mubr.bf16.mxu1 %v4492_v54  ;;  %2796 = vmatprep.mubr.bf16.mxu0 %v4492_v54 }
 0x2cb   : > { %v1669_v28 = vpop.f32.mrf.mxu1  ;;  %v2600_v1 = vpop.f32.mrf.mxu0 }
 0x2cc   : > { %v2054_v36 = vsel %vm1986_vm0, %v2052_v4, %v2053_v52  ;;  %v2985_v16 = vsel %vm2917_vm1, %v2983_v23, %v2984_v13  ;;  %v4493_v28 = vld [vmem:[%s4958_s23 + $0x300] ss:$8 sps:$4 sm:$0xff]  }
 0x2cd   : > { %v2237_v46 = vadd.f32 %v2054_v36, %v5483_v8  ;;  %v1670_v47 = vpop.f32.mrf.mxu1  ;;  %v2601_v35 = vpop.f32.mrf.mxu0  ;;  %v4494_v8 = vld [vmem:[%s4958_s23 + $0x314] ss:$8 sps:$4 sm:$0xff]  }
 0x2ce   : > { %v2055_v15 = vrot.slane %v1670_v47, 1  ;;  %v2986_v25 = vrot.slane %v2601_v35, 2 }
 0x2cf   : > { %v5697_v61 = vadd.f32 %v2985_v16, %v2237_v46  ;;  %v1672_v53 = vpop.f32.mrf.mxu1  ;;  %v2603_v10 = vpop.f32.mrf.mxu0 }
 0x2d0   : > { %v2056_v38 = vsel %vm1986_vm0, %v2053_v52, %v2055_v15  ;;  %v2987_v59 = vsel %vm2917_vm1, %v2984_v13, %v2986_v25 }
 0x2d1   : > { %v2238_v54 = vadd.f32 %v2056_v38, %v5487_v43  ;;  %v1675_v4 = vpop.f32.mrf.mxu1  ;;  %1866 = vmatmul.mubr.bf16.gmra.mxu1 %v4493_v28  ;;  %v2606_v23 = vpop.f32.mrf.mxu0  ;;  %2797 = vmatmul.mubr.bf16.gmra.mxu0 %v4493_v28 }
 0x2d2   : > { %1873 = vmatprep.mubr.bf16.mxu1 %v4494_v8  ;;  %2804 = vmatprep.mubr.bf16.mxu0 %v4494_v8  ;;  %v2057_v52 = vrot.slane %v1675_v4, 1  ;;  %v2988_v13 = vrot.slane %v2606_v23, 2  ;;  %v4496_v4 = vld [vmem:[%s4958_s23 + $0x324] ss:$8 sps:$4 sm:$0xff]  }
 0x2d3   : > { %v5704_v1 = vadd.f32 %v2987_v59, %v2238_v54  ;;  %v1677_v36 = vpop.f32.mrf.mxu1  ;;  %v2608_v16 = vpop.f32.mrf.mxu0  ;;  %v4495_v59 = vld [vmem:[%s4958_s23 + $0x310] ss:$8 sps:$4 sm:$0xff]  }
 0x2d5   : > { %v1678_v46 = vpop.f32.mrf.mxu1  ;;  %v2609_v47 = vpop.f32.mrf.mxu0 }
 0x2d6   : > { %v2058_v35 = vrot.slane %v1678_v46, 1  ;;  %v2989_v43 = vrot.slane %v2609_v47, 2 }
 0x2d7   : > { %v1680_v15 = vpop.f32.mrf.mxu1  ;;  %v2611_v25 = vpop.f32.mrf.mxu0 }
 0x2d8   : > { %v2059_v53 = vsel %vm1986_vm0, %v2057_v52, %v2058_v35  ;;  %v2990_v10 = vsel %vm2917_vm1, %v2988_v13, %v2989_v43 }
 0x2d9   : > { %v2239_v38 = vadd.f32 %v2059_v53, %v5495_v51  ;;  %v1683_v28 = vpop.f32.mrf.mxu1  ;;  %1874 = vmatmul.mubr.bf16.gmra.mxu1 %v4495_v59  ;;  %v2614_v54 = vpop.f32.mrf.mxu0  ;;  %2805 = vmatmul.mubr.bf16.gmra.mxu0 %v4495_v59 }
 0x2da   : > { %v2060_v8 = vrot.slane %v1683_v28, 1  ;;  %v2991_v36 = vrot.slane %v2614_v54, 2  ;;  %1881 = vmatprep.mubr.bf16.mxu1 %v4496_v4  ;;  %2812 = vmatprep.mubr.bf16.mxu0 %v4496_v4  ;;  %v4497_v54 = vld [vmem:[%s4958_s23 + $0x320] ss:$8 sps:$4 sm:$0xff]  }
 0x2db   : > { %v5711_v23 = vadd.f32 %v2990_v10, %v2239_v38  ;;  %v1685_v16 = vpop.f32.mrf.mxu1  ;;  %v2616_v46 = vpop.f32.mrf.mxu0 }
 0x2dc   : > { %v2061_v47 = vsel %vm1986_vm0, %v2058_v35, %v2060_v8  ;;  %v2992_v52 = vsel %vm2917_vm1, %v2989_v43, %v2991_v36 }
 0x2dd   : > { %v2240_v51 = vadd.f32 %v2061_v47, %v5503_v18  ;;  %v1686_v13 = vpop.f32.mrf.mxu1  ;;  %v2617_v15 = vpop.f32.mrf.mxu0 }
 0x2de   : > { %v2062_v10 = vrot.slane %v1686_v13, 1  ;;  %v2993_v38 = vrot.slane %v2617_v15, 2 }
 0x2df   : > { %v5716_v25 = vadd.f32 %v2992_v52, %v2240_v51  ;;  %v1688_v53 = vpop.f32.mrf.mxu1  ;;  %v2619_v28 = vpop.f32.mrf.mxu0 }
 0x2e1   : > { %6276 = vst [vmem:[#allocation36_spill] sm:$0xff] %v5716_v25  ;;  %v1691_v59 = vpop.f32.mrf.mxu1  ;;  %1882 = vmatmul.mubr.bf16.gmra.mxu1 %v4497_v54  ;;  %v2622_v4 = vpop.f32.mrf.mxu0  ;;  %2813 = vmatmul.mubr.bf16.gmra.mxu0 %v4497_v54 }
 0x2e2   : > { %v2063_v16 = vrot.slane %v1691_v59, 1  ;;  %v2994_v46 = vrot.slane %v2622_v4, 2 }
 0x2e3   : > { %v1693_v35 = vpop.f32.mrf.mxu1  ;;  %v2624_v8 = vpop.f32.mrf.mxu0 }
 0x2e4   : > { %v2064_v43 = vsel %vm1986_vm0, %v2062_v10, %v2063_v16  ;;  %v2995_v18 = vsel %vm2917_vm1, %v2993_v38, %v2994_v46 }
 0x2e5   : > { %v2241_v36 = vadd.f32 %v2064_v43, %v5511_v26  ;;  %v1694_v47 = vpop.f32.mrf.mxu1  ;;  %v2625_v52 = vpop.f32.mrf.mxu0 }
 0x2e6   : > { %v2065_v51 = vrot.slane %v1694_v47, 1  ;;  %v2996_v53 = vrot.slane %v2625_v52, 2 }
 0x2e7   : > { %v5722_v28 = vadd.f32 %v2995_v18, %v2241_v36  ;;  %v1696_v25 = vpop.f32.mrf.mxu1  ;;  %v2627_v54 = vpop.f32.mrf.mxu0 }
 0x2e8   : > { %v2066_v13 = vsel %vm1986_vm0, %v2063_v16, %v2065_v51  ;;  %v2997_v15 = vsel %vm2917_vm1, %v2994_v46, %v2996_v53 }
 0x2e9   : > { %v2242_v59 = vadd.f32 %v2066_v13, %v5515_v62  ;;  %v1699_v4 = vpop.f32.mrf.mxu1  ;;  %v2630_v10 = vpop.f32.mrf.mxu0 }
 0x2ea   : > { %v2067_v47 = vrot.slane %v1699_v4, 1  ;;  %v2998_v52 = vrot.slane %v2630_v10, 2 }
 0x2eb   : > { %v5727_v35 = vadd.f32 %v2997_v15, %v2242_v59  ;;  %v1701_v38 = vpop.f32.mrf.mxu1  ;;  %v2632_v26 = vpop.f32.mrf.mxu0 }
 0x2ed   : > { %v1702_v8 = vpop.f32.mrf.mxu1  ;;  %v2633_v43 = vpop.f32.mrf.mxu0 }
 0x2ee   : > { %v2068_v18 = vrot.slane %v1702_v8, 1  ;;  %v2999_v36 = vrot.slane %v2633_v43, 2 }
 0x2ef   : > { %v1704_v25 = vpop.f32.mrf.mxu1  ;;  %v2635_v54 = vpop.f32.mrf.mxu0 }
 0x2f0   : > { %v2069_v16 = vsel %vm1986_vm0, %v2067_v47, %v2068_v18  ;;  %v3000_v46 = vsel %vm2917_vm1, %v2998_v52, %v2999_v36 }
 0x2f1   : > { %v2243_v62 = vadd.f32 %v2069_v16, %v5301_v2  ;;  %v1707_v51 = vpop.f32.mrf.mxu1  ;;  %v2638_v53 = vpop.f32.mrf.mxu0 }
 0x2f2   : > { %v2070_v13 = vrot.slane %v1707_v51, 1  ;;  %v3001_v15 = vrot.slane %v2638_v53, 2 }
 0x2f3   : > { %v5732_v59 = vadd.f32 %v3000_v46, %v2243_v62  ;;  %v1709_v38 = vpop.f32.mrf.mxu1  ;;  %v2640_v26 = vpop.f32.mrf.mxu0 }
 0x2f4   : > { %v2071_v4 = vsel %vm1986_vm0, %v2068_v18, %v2070_v13  ;;  %v3002_v10 = vsel %vm2917_vm1, %v2999_v36, %v3001_v15 }
 0x2f5   : > { %v2244_v8 = vadd.f32 %v2071_v4, %v5309_v14  ;;  %v1710_v43 = vpop.f32.mrf.mxu1  ;;  %v2641_v47 = vpop.f32.mrf.mxu0 }
 0x2f6   : > { %v2072_v51 = vrot.slane %v1710_v43, 1  ;;  %v3003_v53 = vrot.slane %v2641_v47, 2 }
 0x2f7   : > { %v5737_v25 = vadd.f32 %v3002_v10, %v2244_v8  ;;  %v1712_v52 = vpop.f32.mrf.mxu1  ;;  %v2643_v2 = vpop.f32.mrf.mxu0 }
 0x2f9   : > { %v1715_v54 = vpop.f32.mrf.mxu1  ;;  %v2646_v16 = vpop.f32.mrf.mxu0 }
 0x2fa   : > { %v2073_v46 = vrot.slane %v1715_v54, 1  ;;  %v3004_v62 = vrot.slane %v2646_v16, 2 }
 0x2fb   : > { %v1717_v38 = vpop.f32.mrf.mxu1  ;;  %v2648_v26 = vpop.f32.mrf.mxu0 }
 0x2fc   : > { %v2074_v18 = vsel %vm1986_vm0, %v2072_v51, %v2073_v46  ;;  %v3005_v36 = vsel %vm2917_vm1, %v3003_v53, %v3004_v62 }
 0x2fd   : > { %v2245_v14 = vadd.f32 %v2074_v18, %v5317_v34  ;;  %v1718_v13 = vpop.f32.mrf.mxu1  ;;  %v2649_v15 = vpop.f32.mrf.mxu0 }
 0x2fe   : > { %v2075_v4 = vrot.slane %v1718_v13, 1  ;;  %v3006_v10 = vrot.slane %v2649_v15, 2 }
 0x2ff   : > { %v5742_v8 = vadd.f32 %v3005_v36, %v2245_v14  ;;  %v1720_v52 = vpop.f32.mrf.mxu1  ;;  %v2651_v2 = vpop.f32.mrf.mxu0 }
 0x300   : > { %v2076_v43 = vsel %vm1986_vm0, %v2073_v46, %v2075_v4  ;;  %v3007_v47 = vsel %vm2917_vm1, %v3004_v62, %v3006_v10 }
 0x301   : > { %v2246_v54 = vadd.f32 %v2076_v43, %v5321_v55  ;;  %v1723_v16 = vpop.f32.mrf.mxu1  ;;  %v2654_v51 = vpop.f32.mrf.mxu0 }
 0x302   : > { %v2077_v13 = vrot.slane %v1723_v16, 1  ;;  %v3008_v15 = vrot.slane %v2654_v51, 2 }
 0x303   : > { %v5747_v38 = vadd.f32 %v3007_v47, %v2246_v54  ;;  %v1725_v53 = vpop.f32.mrf.mxu1  ;;  %v2656_v34 = vpop.f32.mrf.mxu0 }
 0x305   : > { %v1726_v26 = vpop.f32.mrf.mxu1  ;;  %v2657_v18 = vpop.f32.mrf.mxu0 }
 0x306   : > { %v2078_v36 = vrot.slane %v1726_v26, 1  ;;  %v3009_v14 = vrot.slane %v2657_v18, 2 }
 0x307   : > { %v1728_v52 = vpop.f32.mrf.mxu1  ;;  %v2659_v2 = vpop.f32.mrf.mxu0 }
 0x308   : > { %v2079_v46 = vsel %vm1986_vm0, %v2077_v13, %v2078_v36  ;;  %v3010_v62 = vsel %vm2917_vm1, %v3008_v15, %v3009_v14 }
 0x309   : > { %v2247_v55 = vadd.f32 %v2079_v46, %v5329_v20  ;;  %v1731_v4 = vpop.f32.mrf.mxu1  ;;  %v2662_v10 = vpop.f32.mrf.mxu0 }
 0x30a   : > { %v2080_v43 = vrot.slane %v1731_v4, 1  ;;  %v3011_v47 = vrot.slane %v2662_v10, 2 }
 0x30b   : > { %v5752_v54 = vadd.f32 %v3010_v62, %v2247_v55  ;;  %v1733_v53 = vpop.f32.mrf.mxu1  ;;  %v2664_v34 = vpop.f32.mrf.mxu0 }
 0x30c   : > { %v2081_v16 = vsel %vm1986_vm0, %v2078_v36, %v2080_v43  ;;  %v3012_v51 = vsel %vm2917_vm1, %v3009_v14, %v3011_v47 }
 0x30d   : > { %v2248_v26 = vadd.f32 %v2081_v16, %v5337_v19  ;;  %v1734_v18 = vpop.f32.mrf.mxu1  ;;  %v2665_v13 = vpop.f32.mrf.mxu0 }
 0x30e   : > { %v2082_v4 = vrot.slane %v1734_v18, 1  ;;  %v3013_v10 = vrot.slane %v2665_v13, 2 }
 0x30f   : > { %v5757_v52 = vadd.f32 %v3012_v51, %v2248_v26  ;;  %v1736_v15 = vpop.f32.mrf.mxu1  ;;  %v2667_v20 = vpop.f32.mrf.mxu0 }
 0x311   : > { %v1739_v2 = vpop.f32.mrf.mxu1  ;;  %v2670_v46 = vpop.f32.mrf.mxu0 }
 0x312   : > { %v2083_v62 = vrot.slane %v1739_v2, 1  ;;  %v3014_v55 = vrot.slane %v2670_v46, 2 }
 0x313   : > { %v1741_v53 = vpop.f32.mrf.mxu1  ;;  %v2672_v34 = vpop.f32.mrf.mxu0 }
 0x314   : > { %v2084_v36 = vsel %vm1986_vm0, %v2082_v4, %v2083_v62  ;;  %v3015_v14 = vsel %vm2917_vm1, %v3013_v10, %v3014_v55 }
 0x315   : > { %v2249_v19 = vadd.f32 %v2084_v36, %v5345_v60  ;;  %v1742_v43 = vpop.f32.mrf.mxu1  ;;  %v2673_v47 = vpop.f32.mrf.mxu0 }
 0x316   : > { %v2085_v16 = vrot.slane %v1742_v43, 1  ;;  %v3016_v51 = vrot.slane %v2673_v47, 2 }
 0x317   : > { %v5762_v26 = vadd.f32 %v3015_v14, %v2249_v19  ;;  %v1744_v15 = vpop.f32.mrf.mxu1  ;;  %v2675_v20 = vpop.f32.mrf.mxu0 }
 0x318   : > { %v2086_v18 = vsel %vm1986_vm0, %v2083_v62, %v2085_v16  ;;  %v3017_v13 = vsel %vm2917_vm1, %v3014_v55, %v3016_v51 }
 0x319   : > { %v2250_v2 = vadd.f32 %v2086_v18, %v5349_v33  ;;  %v1747_v46 = vpop.f32.mrf.mxu1  ;;  %v2678_v4 = vpop.f32.mrf.mxu0 }
 0x31a   : > { %v2087_v43 = vrot.slane %v1747_v46, 1  ;;  %v3018_v47 = vrot.slane %v2678_v4, 2 }
 0x31b   : > { %v5767_v53 = vadd.f32 %v3017_v13, %v2250_v2  ;;  %v1749_v10 = vpop.f32.mrf.mxu1  ;;  %v2680_v60 = vpop.f32.mrf.mxu0 }
 0x31d   : > { %v1750_v34 = vpop.f32.mrf.mxu1  ;;  %v2681_v36 = vpop.f32.mrf.mxu0 }
 0x31e   : > { %v2088_v14 = vrot.slane %v1750_v34, 1  ;;  %v3019_v19 = vrot.slane %v2681_v36, 2 }
 0x31f   : > { %v1752_v15 = vpop.f32.mrf.mxu1  ;;  %v2683_v20 = vpop.f32.mrf.mxu0 }
 0x320   : > { %v2089_v62 = vsel %vm1986_vm0, %v2087_v43, %v2088_v14  ;;  %v3020_v55 = vsel %vm2917_vm1, %v3018_v47, %v3019_v19 }
 0x321   : > { %v2251_v33 = vadd.f32 %v2089_v62, %v5357_v42  ;;  %v1755_v16 = vpop.f32.mrf.mxu1  ;;  %v2686_v51 = vpop.f32.mrf.mxu0 }
 0x322   : > { %v2090_v18 = vrot.slane %v1755_v16, 1  ;;  %v3021_v13 = vrot.slane %v2686_v51, 2 }
 0x323   : > { %v5772_v2 = vadd.f32 %v3020_v55, %v2251_v33  ;;  %v1757_v10 = vpop.f32.mrf.mxu1  ;;  %v2688_v60 = vpop.f32.mrf.mxu0 }
 0x324   : > { %v2091_v46 = vsel %vm1986_vm0, %v2088_v14, %v2090_v18  ;;  %v3022_v4 = vsel %vm2917_vm1, %v3019_v19, %v3021_v13 }
 0x325   : > { %v2252_v34 = vadd.f32 %v2091_v46, %v5365_v5  ;;  %v1758_v36 = vpop.f32.mrf.mxu1  ;;  %v2689_v43 = vpop.f32.mrf.mxu0 }
 0x326   : > { %v2092_v16 = vrot.slane %v1758_v36, 1  ;;  %v3023_v51 = vrot.slane %v2689_v43, 2 }
 0x327   : > { %v5777_v15 = vadd.f32 %v3022_v4, %v2252_v34  ;;  %v1760_v47 = vpop.f32.mrf.mxu1  ;;  %v2691_v42 = vpop.f32.mrf.mxu0 }
 0x329   : > { %v1763_v20 = vpop.f32.mrf.mxu1  ;;  %v2694_v62 = vpop.f32.mrf.mxu0 }
 0x32a   : > { %v2093_v55 = vrot.slane %v1763_v20, 1  ;;  %v3024_v33 = vrot.slane %v2694_v62, 2 }
 0x32b   : > { %v1765_v10 = vpop.f32.mrf.mxu1  ;;  %v2696_v60 = vpop.f32.mrf.mxu0 }
 0x32c   : > { %v2094_v14 = vsel %vm1986_vm0, %v2092_v16, %v2093_v55  ;;  %v3025_v19 = vsel %vm2917_vm1, %v3023_v51, %v3024_v33 }
 0x32d   : > { %v2253_v5 = vadd.f32 %v2094_v14, %v5373_v39  ;;  %v1766_v18 = vpop.f32.mrf.mxu1  ;;  %v2697_v13 = vpop.f32.mrf.mxu0 }
 0x32e   : > { %v2095_v46 = vrot.slane %v1766_v18, 1  ;;  %v3026_v4 = vrot.slane %v2697_v13, 2 }
 0x32f   : > { %v5782_v34 = vadd.f32 %v3025_v19, %v2253_v5  ;;  %v1768_v47 = vpop.f32.mrf.mxu1  ;;  %v2699_v42 = vpop.f32.mrf.mxu0 }
 0x330   : > { %v2096_v36 = vsel %vm1986_vm0, %v2093_v55, %v2095_v46  ;;  %v3027_v43 = vsel %vm2917_vm1, %v3024_v33, %v3026_v4 }
 0x331   : > { %v2254_v20 = vadd.f32 %v2096_v36, %v5377_v9  ;;  %v1771_v62 = vpop.f32.mrf.mxu1  ;;  %v2702_v16 = vpop.f32.mrf.mxu0 }
 0x332   : > { %v2097_v18 = vrot.slane %v1771_v62, 1  ;;  %v3028_v13 = vrot.slane %v2702_v16, 2 }
 0x333   : > { %v5787_v10 = vadd.f32 %v3027_v43, %v2254_v20  ;;  %v1773_v51 = vpop.f32.mrf.mxu1  ;;  %v2704_v39 = vpop.f32.mrf.mxu0 }
 0x335   : > { %6277 = vst [vmem:[#allocation37_spill] sm:$0xff] %v5787_v10  ;;  %v1774_v60 = vpop.f32.mrf.mxu1  ;;  %v2705_v14 = vpop.f32.mrf.mxu0 }
 0x336   : > { %v2098_v19 = vrot.slane %v1774_v60, 1  ;;  %v3029_v5 = vrot.slane %v2705_v14, 2  ;;  %v6279_v60 = vld [vmem:[#allocation17_spill] sm:$0xff] }
 0x337   : > { %v1776_v47 = vpop.f32.mrf.mxu1  ;;  %v2707_v42 = vpop.f32.mrf.mxu0 }
 0x338   : > { %v2099_v55 = vsel %vm1986_vm0, %v2097_v18, %v2098_v19  ;;  %v3030_v33 = vsel %vm2917_vm1, %v3028_v13, %v3029_v5 }
 0x339   : > { %v2255_v9 = vadd.f32 %v2099_v55, %v5385_v44  ;;  %v1779_v46 = vpop.f32.mrf.mxu1  ;;  %v2710_v4 = vpop.f32.mrf.mxu0 }
 0x33a   : > { %v2100_v36 = vrot.slane %v1779_v46, 1  ;;  %v3031_v43 = vrot.slane %v2710_v4, 2 }
 0x33b   : > { %v5792_v20 = vadd.f32 %v3030_v33, %v2255_v9  ;;  %v1781_v51 = vpop.f32.mrf.mxu1  ;;  %v2712_v39 = vpop.f32.mrf.mxu0 }
 0x33c   : > { %v2101_v62 = vsel %vm1986_vm0, %v2098_v19, %v2100_v36  ;;  %v3032_v16 = vsel %vm2917_vm1, %v3029_v5, %v3031_v43  ;;  %v6281_v36 = vld [vmem:[#allocation18_spill] sm:$0xff] }
 0x33d   : > { %6278 = vst [vmem:[#allocation38_spill] sm:$0xff] %v5792_v20  ;;  %v2256_v14 = vadd.f32 %v2101_v62, %v6279_v60  ;;  %v1782_v47 = vpop.f32.mrf.mxu1  ;;  %v2713_v18 = vpop.f32.mrf.mxu0 }
 0x33e   : > { %v2102_v46 = vrot.slane %v1782_v47, 1  ;;  %v3033_v4 = vrot.slane %v2713_v18, 2  ;;  %v6283_v18 = vld [vmem:[#allocation19_spill] sm:$0xff] }
 0x33f   : > { %v5797_v42 = vadd.f32 %v3032_v16, %v2256_v14  ;;  %v1784_v13 = vpop.f32.mrf.mxu1  ;;  %v2715_v44 = vpop.f32.mrf.mxu0 }
 0x341   : > { %6280 = vst [vmem:[#allocation17_spill] sm:$0xff] %v5797_v42  ;;  %v1787_v55 = vpop.f32.mrf.mxu1  ;;  %v2718_v10 = vpop.f32.mrf.mxu0 }
 0x342   : > { %v2103_v33 = vrot.slane %v1787_v55, 1  ;;  %v3034_v9 = vrot.slane %v2718_v10, 2 }
 0x343   : > { %v1789_v51 = vpop.f32.mrf.mxu1  ;;  %v2720_v39 = vpop.f32.mrf.mxu0 }
 0x344   : > { %v2104_v19 = vsel %vm1986_vm0, %v2102_v46, %v2103_v33  ;;  %v3035_v5 = vsel %vm2917_vm1, %v3033_v4, %v3034_v9 }
 0x345   : > { %v2257_v43 = vadd.f32 %v2104_v19, %v6281_v36  ;;  %v1790_v62 = vpop.f32.mrf.mxu1  ;;  %v2721_v60 = vpop.f32.mrf.mxu0 }
 0x346   : > { %v2105_v16 = vrot.slane %v1790_v62, 1  ;;  %v3036_v14 = vrot.slane %v2721_v60, 2 }
 0x347   : > { %v5802_v13 = vadd.f32 %v3035_v5, %v2257_v43  ;;  %v1792_v44 = vpop.f32.mrf.mxu1  ;;  %v2723_v42 = vpop.f32.mrf.mxu0 }
 0x348   : > { %v2106_v47 = vsel %vm1986_vm0, %v2103_v33, %v2105_v16  ;;  %v3037_v10 = vsel %vm2917_vm1, %v3034_v9, %v3036_v14  ;;  %v6285_v16 = vld [vmem:[#allocation20_spill] sm:$0xff] }
 0x349   : > { %6282 = vst [vmem:[#allocation18_spill] sm:$0xff] %v5802_v13  ;;  %v2258_v55 = vadd.f32 %v2106_v47, %v6283_v18  ;;  %v1795_v51 = vpop.f32.mrf.mxu1  ;;  %v2726_v46 = vpop.f32.mrf.mxu0 }
 0x34a   : > { %v2107_v62 = vrot.slane %v1795_v51, 1  ;;  %v3038_v60 = vrot.slane %v2726_v46, 2  ;;  %v6287_v46 = vld [vmem:[#allocation21_spill] sm:$0xff] }
 0x34b   : > { %v5807_v39 = vadd.f32 %v3037_v10, %v2258_v55  ;;  %v1797_v4 = vpop.f32.mrf.mxu1  ;;  %v2728_v19 = vpop.f32.mrf.mxu0 }
 0x34d   : > { %6284 = vst [vmem:[#allocation19_spill] sm:$0xff] %v5807_v39  ;;  %v1798_v36 = vpop.f32.mrf.mxu1  ;;  %v2729_v20 = vpop.f32.mrf.mxu0 }
 0x34e   : > { %v2108_v5 = vrot.slane %v1798_v36, 1  ;;  %v3039_v43 = vrot.slane %v2729_v20, 2 }
 0x34f   : > { %v1800_v44 = vpop.f32.mrf.mxu1  ;;  %v2731_v42 = vpop.f32.mrf.mxu0 }
 0x350   : > { %v2109_v33 = vsel %vm1986_vm0, %v2107_v62, %v2108_v5  ;;  %v3040_v9 = vsel %vm2917_vm1, %v3038_v60, %v3039_v43 }
 0x351   : > { %v2259_v14 = vadd.f32 %v2109_v33, %v6285_v16  ;;  %v1803_v47 = vpop.f32.mrf.mxu1  ;;  %v2734_v18 = vpop.f32.mrf.mxu0 }
 0x352   : > { %v2110_v10 = vrot.slane %v1803_v47, 1  ;;  %v3041_v55 = vrot.slane %v2734_v18, 2 }
 0x353   : > { %v5812_v4 = vadd.f32 %v3040_v9, %v2259_v14  ;;  %v1805_v19 = vpop.f32.mrf.mxu1  ;;  %v2736_v39 = vpop.f32.mrf.mxu0 }
 0x354   : > { %v2111_v51 = vsel %vm1986_vm0, %v2108_v5, %v2110_v10  ;;  %v3042_v20 = vsel %vm2917_vm1, %v3039_v43, %v3041_v55  ;;  %v6289_v10 = vld [vmem:[#allocation22_spill] sm:$0xff] }
 0x355   : > { %6286 = vst [vmem:[#allocation20_spill] sm:$0xff] %v5812_v4  ;;  %v2260_v36 = vadd.f32 %v2111_v51, %v6287_v46  ;;  %v1806_v44 = vpop.f32.mrf.mxu1  ;;  %v2737_v62 = vpop.f32.mrf.mxu0 }
 0x356   : > { %v2112_v47 = vrot.slane %v1806_v44, 1  ;;  %v3043_v18 = vrot.slane %v2737_v62, 2  ;;  %v6291_v62 = vld [vmem:[#allocation23_spill] sm:$0xff] }
 0x357   : > { %v5817_v42 = vadd.f32 %v3042_v20, %v2260_v36  ;;  %v1808_v60 = vpop.f32.mrf.mxu1  ;;  %v2739_v33 = vpop.f32.mrf.mxu0 }
 0x359   : > { %6288 = vst [vmem:[#allocation21_spill] sm:$0xff] %v5817_v42  ;;  %v1811_v16 = vpop.f32.mrf.mxu1  ;;  %v2742_v13 = vpop.f32.mrf.mxu0 }
 0x35a   : > { %v2113_v9 = vrot.slane %v1811_v16, 1  ;;  %v3044_v14 = vrot.slane %v2742_v13, 2 }
 0x35b   : > { %v1813_v19 = vpop.f32.mrf.mxu1  ;;  %v2744_v39 = vpop.f32.mrf.mxu0 }
 0x35c   : > { %v2114_v5 = vsel %vm1986_vm0, %v2112_v47, %v2113_v9  ;;  %v3045_v43 = vsel %vm2917_vm1, %v3043_v18, %v3044_v14 }
 0x35d   : > { %v2261_v55 = vadd.f32 %v2114_v5, %v6289_v10  ;;  %v1814_v51 = vpop.f32.mrf.mxu1  ;;  %v2745_v46 = vpop.f32.mrf.mxu0 }
 0x35e   : > { %v2115_v20 = vrot.slane %v1814_v51, 1  ;;  %v3046_v36 = vrot.slane %v2745_v46, 2 }
 0x35f   : > { %v5822_v60 = vadd.f32 %v3045_v43, %v2261_v55  ;;  %v1816_v33 = vpop.f32.mrf.mxu1  ;;  %v2747_v42 = vpop.f32.mrf.mxu0 }
 0x360   : > { %v2116_v44 = vsel %vm1986_vm0, %v2113_v9, %v2115_v20  ;;  %v3047_v13 = vsel %vm2917_vm1, %v3044_v14, %v3046_v36  ;;  %v6293_v20 = vld [vmem:[#allocation24_spill] sm:$0xff] }
 0x361   : > { %6290 = vst [vmem:[#allocation22_spill] sm:$0xff] %v5822_v60  ;;  %v2262_v16 = vadd.f32 %v2116_v44, %v6291_v62  ;;  %v1819_v19 = vpop.f32.mrf.mxu1  ;;  %v2750_v47 = vpop.f32.mrf.mxu0 }
 0x362   : > { %v2117_v51 = vrot.slane %v1819_v19, 1  ;;  %v3048_v46 = vrot.slane %v2750_v47, 2  ;;  %v6295_v47 = vld [vmem:[#allocation25_spill] sm:$0xff] }
 0x363   : > { %v5827_v39 = vadd.f32 %v3047_v13, %v2262_v16  ;;  %v1821_v18 = vpop.f32.mrf.mxu1  ;;  %v2752_v5 = vpop.f32.mrf.mxu0 }
 0x365   : > { %6292 = vst [vmem:[#allocation23_spill] sm:$0xff] %v5827_v39  ;;  %v1822_v10 = vpop.f32.mrf.mxu1  ;;  %v2753_v4 = vpop.f32.mrf.mxu0 }
 0x366   : > { %v2118_v43 = vrot.slane %v1822_v10, 1  ;;  %v3049_v55 = vrot.slane %v2753_v4, 2 }
 0x367   : > { %v1824_v33 = vpop.f32.mrf.mxu1  ;;  %v2755_v42 = vpop.f32.mrf.mxu0 }
 0x368   : > { %v2119_v9 = vsel %vm1986_vm0, %v2117_v51, %v2118_v43  ;;  %v3050_v14 = vsel %vm2917_vm1, %v3048_v46, %v3049_v55 }
 0x369   : > { %v2263_v36 = vadd.f32 %v2119_v9, %v6293_v20  ;;  %v1827_v44 = vpop.f32.mrf.mxu1  ;;  %v2758_v62 = vpop.f32.mrf.mxu0 }
 0x36a   : > { %v2120_v13 = vrot.slane %v1827_v44, 1  ;;  %v3051_v16 = vrot.slane %v2758_v62, 2 }
 0x36b   : > { %v5832_v18 = vadd.f32 %v3050_v14, %v2263_v36  ;;  %v1829_v5 = vpop.f32.mrf.mxu1  ;;  %v2760_v39 = vpop.f32.mrf.mxu0 }
 0x36c   : > { %v2121_v19 = vsel %vm1986_vm0, %v2118_v43, %v2120_v13  ;;  %v3052_v51 = vsel %vm2917_vm1, %v3049_v55, %v3051_v16  ;;  %v6297_v13 = vld [vmem:[#allocation26_spill] sm:$0xff] }
 0x36d   : > { %6294 = vst [vmem:[#allocation24_spill] sm:$0xff] %v5832_v18  ;;  %v2264_v4 = vadd.f32 %v2121_v19, %v6295_v47  ;;  %v1830_v10 = vpop.f32.mrf.mxu1  ;;  %v2761_v33 = vpop.f32.mrf.mxu0 }
 0x36e   : > { %v2122_v44 = vrot.slane %v1830_v10, 1  ;;  %v3053_v39 = vrot.slane %v2761_v33, 2 }
 0x36f   : > { %v5837_v42 = vadd.f32 %v3052_v51, %v2264_v4  ;;  %v1832_v46 = vpop.f32.mrf.mxu1  ;;  %v2763_v9 = vpop.f32.mrf.mxu0 }
 0x371   : > { %6296 = vst [vmem:[#allocation25_spill] sm:$0xff] %v5837_v42  ;;  %v1835_v20 = vpop.f32.mrf.mxu1  ;;  %v2766_v60 = vpop.f32.mrf.mxu0 }
 0x372   : > { %v2123_v62 = vrot.slane %v1835_v20, 1  ;;  %v3054_v14 = vrot.slane %v2766_v60, 2  ;;  %v6299_v60 = vld [vmem:[#allocation27_spill] sm:$0xff] }
 0x373   : > { %v1837_v36 = vpop.f32.mrf.mxu1  ;;  %v2768_v5 = vpop.f32.mrf.mxu0 }
 0x374   : > { %v2124_v43 = vsel %vm1986_vm0, %v2122_v44, %v2123_v62  ;;  %v3055_v55 = vsel %vm2917_vm1, %v3053_v39, %v3054_v14 }
 0x375   : > { %v2265_v19 = vadd.f32 %v2124_v43, %v6297_v13  ;;  %v1838_v47 = vpop.f32.mrf.mxu1  ;;  %v2769_v18 = vpop.f32.mrf.mxu0 }
 0x376   : > { %v2125_v16 = vrot.slane %v1838_v47, 1  ;;  %v3056_v4 = vrot.slane %v2769_v18, 2 }
 0x377   : > { %v5842_v51 = vadd.f32 %v3055_v55, %v2265_v19  ;;  %v1840_v46 = vpop.f32.mrf.mxu1  ;;  %v2771_v9 = vpop.f32.mrf.mxu0 }
 0x378   : > { %v2126_v10 = vsel %vm1986_vm0, %v2123_v62, %v2125_v16  ;;  %v3057_v44 = vsel %vm2917_vm1, %v3054_v14, %v3056_v4  ;;  %v6301_v16 = vld [vmem:[#allocation28_spill] sm:$0xff] }
 0x379   : > { %6298 = vst [vmem:[#allocation26_spill] sm:$0xff] %v5842_v51  ;;  %v2266_v20 = vadd.f32 %v2126_v10, %v6299_v60  ;;  %v1843_v36 = vpop.f32.mrf.mxu1  ;;  %v2774_v33 = vpop.f32.mrf.mxu0 }
 0x37a   : > { %v2127_v47 = vrot.slane %v1843_v36, 1  ;;  %v3058_v9 = vrot.slane %v2774_v33, 2  ;;  %v6303_v36 = vld [vmem:[#allocation29_spill] sm:$0xff] }
 0x37b   : > { %v5847_v5 = vadd.f32 %v3057_v44, %v2266_v20  ;;  %v1845_v43 = vpop.f32.mrf.mxu1  ;;  %v2776_v13 = vpop.f32.mrf.mxu0 }
 0x37d   : > { %6300 = vst [vmem:[#allocation27_spill] sm:$0xff] %v5847_v5  ;;  %v1846_v42 = vpop.f32.mrf.mxu1  ;;  %v2777_v39 = vpop.f32.mrf.mxu0 }
 0x37e   : > { %v2128_v18 = vrot.slane %v1846_v42, 1  ;;  %v3059_v19 = vrot.slane %v2777_v39, 2 }
 0x37f   : > { %v1848_v55 = vpop.f32.mrf.mxu1  ;;  %v2779_v46 = vpop.f32.mrf.mxu0 }
 0x380   : > { %v2129_v62 = vsel %vm1986_vm0, %v2127_v47, %v2128_v18  ;;  %v3060_v14 = vsel %vm2917_vm1, %v3058_v9, %v3059_v19 }
 0x381   : > { %v2267_v10 = vadd.f32 %v2129_v62, %v6301_v16  ;;  %v1851_v60 = vpop.f32.mrf.mxu1  ;;  %v2782_v51 = vpop.f32.mrf.mxu0 }
 0x382   : > { %v2130_v4 = vrot.slane %v1851_v60, 1  ;;  %v3061_v20 = vrot.slane %v2782_v51, 2 }
 0x383   : > { %v5852_v44 = vadd.f32 %v3060_v14, %v2267_v10  ;;  %v1853_v43 = vpop.f32.mrf.mxu1  ;;  %v2784_v13 = vpop.f32.mrf.mxu0 }
 0x384   : > { %v2131_v42 = vsel %vm1986_vm0, %v2128_v18, %v2130_v4  ;;  %v3062_v47 = vsel %vm2917_vm1, %v3059_v19, %v3061_v20  ;;  %v6305_v4 = vld [vmem:[#allocation30_spill] sm:$0xff] }
 0x385   : > { %6302 = vst [vmem:[#allocation28_spill] sm:$0xff] %v5852_v44  ;;  %v2268_v39 = vadd.f32 %v2131_v42, %v6303_v36  ;;  %v1854_v55 = vpop.f32.mrf.mxu1  ;;  %v2785_v33 = vpop.f32.mrf.mxu0 }
 0x386   : > { %v2132_v60 = vrot.slane %v1854_v55, 1  ;;  %v3063_v13 = vrot.slane %v2785_v33, 2  ;;  %v6307_v55 = vld [vmem:[#allocation31_spill] sm:$0xff] }
 0x387   : > { %v5857_v46 = vadd.f32 %v3062_v47, %v2268_v39  ;;  %v1856_v62 = vpop.f32.mrf.mxu1  ;;  %v2787_v16 = vpop.f32.mrf.mxu0 }
 0x389   : > { %6304 = vst [vmem:[#allocation29_spill] sm:$0xff] %v5857_v46  ;;  %v1859_v5 = vpop.f32.mrf.mxu1  ;;  %v2790_v9 = vpop.f32.mrf.mxu0 }
 0x38a   : > { %v2133_v51 = vrot.slane %v1859_v5, 1  ;;  %v3064_v10 = vrot.slane %v2790_v9, 2 }
 0x38b   : > { %v1861_v14 = vpop.f32.mrf.mxu1  ;;  %v2792_v43 = vpop.f32.mrf.mxu0 }
 0x38c   : > { %v2134_v18 = vsel %vm1986_vm0, %v2132_v60, %v2133_v51  ;;  %v3065_v19 = vsel %vm2917_vm1, %v3063_v13, %v3064_v10 }
 0x38d   : > { %v2269_v42 = vadd.f32 %v2134_v18, %v6305_v4  ;;  %v1862_v36 = vpop.f32.mrf.mxu1  ;;  %v2793_v44 = vpop.f32.mrf.mxu0 }
 0x38e   : > { %v2135_v20 = vrot.slane %v1862_v36, 1  ;;  %v3066_v39 = vrot.slane %v2793_v44, 2 }
 0x38f   : > { %v5862_v47 = vadd.f32 %v3065_v19, %v2269_v42  ;;  %v1864_v62 = vpop.f32.mrf.mxu1  ;;  %v2795_v16 = vpop.f32.mrf.mxu0 }
 0x390   : > { %v2136_v5 = vsel %vm1986_vm0, %v2133_v51, %v2135_v20  ;;  %v3067_v60 = vsel %vm2917_vm1, %v3064_v10, %v3066_v39  ;;  %v6309_v20 = vld [vmem:[#allocation32_spill] sm:$0xff] }
 0x391   : > { %6306 = vst [vmem:[#allocation30_spill] sm:$0xff] %v5862_v47  ;;  %v2270_v9 = vadd.f32 %v2136_v5, %v6307_v55  ;;  %v1867_v14 = vpop.f32.mrf.mxu1  ;;  %v2798_v33 = vpop.f32.mrf.mxu0 }
 0x392   : > { %v2137_v36 = vrot.slane %v1867_v14, 1  ;;  %v3068_v16 = vrot.slane %v2798_v33, 2  ;;  %v6311_v14 = vld [vmem:[#allocation33_spill] sm:$0xff] }
 0x393   : > { %v5867_v43 = vadd.f32 %v3067_v60, %v2270_v9  ;;  %v1869_v18 = vpop.f32.mrf.mxu1  ;;  %v2800_v4 = vpop.f32.mrf.mxu0 }
 0x395   : > { %6308 = vst [vmem:[#allocation31_spill] sm:$0xff] %v5867_v43  ;;  %v1870_v46 = vpop.f32.mrf.mxu1  ;;  %v2801_v13 = vpop.f32.mrf.mxu0 }
 0x396   : > { %v2138_v44 = vrot.slane %v1870_v46, 1  ;;  %v3069_v42 = vrot.slane %v2801_v13, 2 }
 0x397   : > { %v1872_v19 = vpop.f32.mrf.mxu1  ;;  %v2803_v62 = vpop.f32.mrf.mxu0 }
 0x398   : > { %v2139_v51 = vsel %vm1986_vm0, %v2137_v36, %v2138_v44  ;;  %v3070_v10 = vsel %vm2917_vm1, %v3068_v16, %v3069_v42 }
 0x399   : > { %v2271_v5 = vadd.f32 %v2139_v51, %v6309_v20  ;;  %v1875_v55 = vpop.f32.mrf.mxu1  ;;  %v2806_v47 = vpop.f32.mrf.mxu0 }
 0x39a   : > { %v2140_v39 = vrot.slane %v1875_v55, 1  ;;  %v3071_v9 = vrot.slane %v2806_v47, 2 }
 0x39b   : > { %v5872_v60 = vadd.f32 %v3070_v10, %v2271_v5  ;;  %v1877_v18 = vpop.f32.mrf.mxu1  ;;  %v2808_v4 = vpop.f32.mrf.mxu0 }
 0x39c   : > { %v2141_v46 = vsel %vm1986_vm0, %v2138_v44, %v2140_v39  ;;  %v3072_v36 = vsel %vm2917_vm1, %v3069_v42, %v3071_v9  ;;  %v6312_v39 = vld [vmem:[#allocation34_spill] sm:$0xff] }
 0x39d   : > { %6310 = vst [vmem:[#allocation32_spill] sm:$0xff] %v5872_v60  ;;  %v2272_v13 = vadd.f32 %v2141_v46, %v6311_v14  ;;  %v1878_v19 = vpop.f32.mrf.mxu1  ;;  %v2809_v33 = vpop.f32.mrf.mxu0 }
 0x39e   : > { %v2142_v55 = vrot.slane %v1878_v19, 1  ;;  %v3073_v4 = vrot.slane %v2809_v33, 2 }
 0x39f   : > { %v5877_v62 = vadd.f32 %v3072_v36, %v2272_v13  ;;  %v1880_v51 = vpop.f32.mrf.mxu1  ;;  %v2811_v20 = vpop.f32.mrf.mxu0 }
 0x3a0   : > { %v6313_v20 = vld [vmem:[#allocation35_spill] sm:$0xff] }
 0x3a1   : > { %v1883_v43 = vpop.f32.mrf.mxu1  ;;  %v2814_v16 = vpop.f32.mrf.mxu0 }
 0x3a2   : > { %v2143_v47 = vrot.slane %v1883_v43, 1  ;;  %v3074_v5 = vrot.slane %v2814_v16, 2 }
 0x3a3   : > { %v1885_v10 = vpop.f32.mrf.mxu1  ;;  %v2816_v18 = vpop.f32.mrf.mxu0 }
 0x3a4   : > { %v2144_v44 = vsel %vm1986_vm0, %v2142_v55, %v2143_v47  ;;  %v3075_v42 = vsel %vm2917_vm1, %v3073_v4, %v3074_v5 }
 0x3a5   : > { %v2273_v46 = vadd.f32 %v2144_v44, %v6312_v39  ;;  %v1886_v14 = vpop.f32.mrf.mxu1  ;;  %v2817_v60 = vpop.f32.mrf.mxu0 }
 0x3a6   : > { %v2145_v9 = vrot.slane %v1886_v14, 1  ;;  %v3076_v13 = vrot.slane %v2817_v60, 2 }
 0x3a7   : > { %v5882_v36 = vadd.f32 %v3075_v42, %v2273_v46  ;;  %v1888_v51 = vpop.f32.mrf.mxu1  ;;  %v2819_v19 = vpop.f32.mrf.mxu0  ;;  %3209 = sbr.rel (%p4087_p7) target bundleno = 972 (0x3cc), region = 48 }
 0x3a8   : > { %v2146_v43 = vsel %vm1986_vm0, %v2143_v47, %v2145_v9  ;;  %v3077_v33 = vsel %vm2917_vm1, %v3074_v5, %v3076_v13 }
 0x3a9   : > { %v2274_v16 = vadd.f32 %v2146_v43, %v6313_v20 }
 0x3ab   : > { %v5887_v10 = vadd.f32 %v3077_v33, %v2274_v16 }
 0x3ac   : > { %3210 = vst [vmem:[#allocation2 + $0xb0] sm:$0xff] %v5529_v30  ;;  %3211 = vst [vmem:[#allocation2 + $0x1b0] sm:$0xff] %v5534_v37  ;;  %v6314_v60 = vld [vmem:[#allocation36_spill] sm:$0xff]  ;;  %v6315_v55 = vld [vmem:[#allocation37_spill] sm:$0xff] }
 0x3ad   : > { %3212 = vst [vmem:[#allocation2 + $0xd8] sm:$0xff] %v5541_v41  ;;  %3213 = vst [vmem:[#allocation2 + $0x18] sm:$0xff] %v5548_v11  ;;  %v6316_v47 = vld [vmem:[#allocation38_spill] sm:$0xff]  ;;  %v6317_v5 = vld [vmem:[#allocation17_spill] sm:$0xff] }
 0x3ae   : > { %3214 = vst [vmem:[#allocation2 + $0x50] sm:$0xff] %v5555_v3  ;;  %3215 = vst [vmem:[#allocation2 + $0x168] sm:$0xff] %v5560_v56  ;;  %v6318_v18 = vld [vmem:[#allocation18_spill] sm:$0xff]  ;;  %v6319_v4 = vld [vmem:[#allocation19_spill] sm:$0xff] }
 0x3af   : > { %3216 = vst [vmem:[#allocation2 + $0x130] sm:$0xff] %v5567_v22  ;;  %3217 = vst [vmem:[#allocation2 + $0x48] sm:$0xff] %v5574_v24  ;;  %v6320_v44 = vld [vmem:[#allocation20_spill] sm:$0xff]  ;;  %v6321_v39 = vld [vmem:[#allocation21_spill] sm:$0xff] }
 0x3b0   : > { %3218 = vst [vmem:[#allocation2 + $0x180] sm:$0xff] %v5581_v12  ;;  %3219 = vst [vmem:[#allocation2 + $0x110] sm:$0xff] %v5586_v40  ;;  %v6322_v46 = vld [vmem:[#allocation22_spill] sm:$0xff]  ;;  %v6323_v14 = vld [vmem:[#allocation23_spill] sm:$0xff] }
 0x3b1   : > { %3220 = vst [vmem:[#allocation2 + $0x118] sm:$0xff] %v5593_v21  ;;  %3221 = vst [vmem:[#allocation2 + $0x98] sm:$0xff] %v5600_v45  ;;  %v6324_v42 = vld [vmem:[#allocation24_spill] sm:$0xff]  ;;  %v6325_v9 = vld [vmem:[#allocation25_spill] sm:$0xff] }
 0x3b2   : > { %3222 = vst [vmem:[#allocation2 + $0x120] sm:$0xff] %v5607_v58  ;;  %3223 = vst [vmem:[#allocation2 + $0x150] sm:$0xff] %v5612_v63  ;;  %v6326_v13 = vld [vmem:[#allocation26_spill] sm:$0xff]  ;;  %v6327_v51 = vld [vmem:[#allocation27_spill] sm:$0xff] }
 0x3b3   : > { %3224 = vst [vmem:[#allocation2 + $0x108] sm:$0xff] %v5619_v50  ;;  %3225 = vst [vmem:[#allocation2 + $0x60] sm:$0xff] %v5626_v57  ;;  %v6328_v19 = vld [vmem:[#allocation28_spill] sm:$0xff]  ;;  %v6329_v43 = vld [vmem:[#allocation29_spill] sm:$0xff] }
 0x3b4   : > { %3226 = vst [vmem:[#allocation2 + $0xe0] sm:$0xff] %v5633_v31  ;;  %3227 = vst [vmem:[#allocation2 + $0x188] sm:$0xff] %v5638_v6  ;;  %v6330_v20 = vld [vmem:[#allocation30_spill] sm:$0xff]  ;;  %v6331_v16 = vld [vmem:[#allocation31_spill] sm:$0xff] }
 0x3b5   : > { %3228 = vst [vmem:[#allocation2 + $0x138] sm:$0xff] %v5645_v49  ;;  %3229 = vst [vmem:[#allocation2 + $0x140] sm:$0xff] %v5652_v32  ;;  %v6332_v33 = vld [vmem:[#allocation32_spill] sm:$0xff] }
 0x3b6   : > { %3230 = vst [vmem:[#allocation2 + $0x80] sm:$0xff] %v5659_v0  ;;  %3231 = vst [vmem:[#allocation2 + $0x1a8] sm:$0xff] %v5664_v27 }
 0x3b7   : > { %3232 = vst [vmem:[#allocation2 + $0x1b8] sm:$0xff] %v5671_v17  ;;  %3233 = vst [vmem:[#allocation2 + $0x28] sm:$0xff] %v5678_v48 }
 0x3b8   : > { %3234 = vst [vmem:[#allocation2 + $0x1e8] sm:$0xff] %v5685_v29  ;;  %3235 = vst [vmem:[#allocation2 + $0xf8] sm:$0xff] %v5690_v7 }
 0x3b9   : > { %3236 = vst [vmem:[#allocation2 + $0x160] sm:$0xff] %v5697_v61  ;;  %3237 = vst [vmem:[#allocation2 + $0x30] sm:$0xff] %v5704_v1 }
 0x3ba   : > { %3238 = vst [vmem:[#allocation2 + $0x1e0] sm:$0xff] %v5711_v23  ;;  %3239 = vst [vmem:[#allocation2] sm:$0xff] %v6314_v60 }
 0x3bb   : > { %3240 = vst [vmem:[#allocation2 + $0xf0] sm:$0xff] %v5722_v28  ;;  %3241 = vst [vmem:[#allocation2 + $0x8] sm:$0xff] %v5727_v35 }
 0x3bc   : > { %3242 = vst [vmem:[#allocation2 + $0x148] sm:$0xff] %v5732_v59  ;;  %3243 = vst [vmem:[#allocation2 + $0x1d0] sm:$0xff] %v5737_v25 }
 0x3bd   : > { %3244 = vst [vmem:[#allocation2 + $0x100] sm:$0xff] %v5742_v8  ;;  %3245 = vst [vmem:[#allocation2 + $0xc8] sm:$0xff] %v5747_v38 }
 0x3be   : > { %3246 = vst [vmem:[#allocation2 + $0x40] sm:$0xff] %v5752_v54  ;;  %3247 = vst [vmem:[#allocation2 + $0x1f8] sm:$0xff] %v5757_v52 }
 0x3bf   : > { %3248 = vst [vmem:[#allocation2 + $0x20] sm:$0xff] %v5762_v26  ;;  %3249 = vst [vmem:[#allocation2 + $0x128] sm:$0xff] %v5767_v53 }
 0x3c0   : > { %3250 = vst [vmem:[#allocation2 + $0x1a0] sm:$0xff] %v5772_v2  ;;  %3251 = vst [vmem:[#allocation2 + $0x1f0] sm:$0xff] %v5777_v15 }
 0x3c1   : > { %3252 = vst [vmem:[#allocation2 + $0xe8] sm:$0xff] %v5782_v34  ;;  %3253 = vst [vmem:[#allocation2 + $0x78] sm:$0xff] %v6315_v55 }
 0x3c2   : > { %3254 = vst [vmem:[#allocation2 + $0x70] sm:$0xff] %v6316_v47  ;;  %3255 = vst [vmem:[#allocation2 + $0x90] sm:$0xff] %v6317_v5 }
 0x3c3   : > { %3256 = vst [vmem:[#allocation2 + $0x1d8] sm:$0xff] %v6318_v18  ;;  %3257 = vst [vmem:[#allocation2 + $0xd0] sm:$0xff] %v6319_v4 }
 0x3c4   : > { %3258 = vst [vmem:[#allocation2 + $0xb8] sm:$0xff] %v6320_v44  ;;  %3259 = vst [vmem:[#allocation2 + $0x88] sm:$0xff] %v6321_v39 }
 0x3c5   : > { %3260 = vst [vmem:[#allocation2 + $0xa8] sm:$0xff] %v6322_v46  ;;  %3261 = vst [vmem:[#allocation2 + $0x1c8] sm:$0xff] %v6323_v14 }
 0x3c6   : > { %3262 = vst [vmem:[#allocation2 + $0x170] sm:$0xff] %v6324_v42  ;;  %3263 = vst [vmem:[#allocation2 + $0x178] sm:$0xff] %v6325_v9 }
 0x3c7   : > { %3264 = vst [vmem:[#allocation2 + $0x68] sm:$0xff] %v6326_v13  ;;  %3265 = vst [vmem:[#allocation2 + $0x190] sm:$0xff] %v6327_v51 }
 0x3c8   : > { %3266 = vst [vmem:[#allocation2 + $0x198] sm:$0xff] %v6328_v19  ;;  %3267 = vst [vmem:[#allocation2 + $0x38] sm:$0xff] %v6329_v43 }
 0x3c9   : > { %3268 = vst [vmem:[#allocation2 + $0xc0] sm:$0xff] %v6330_v20  ;;  %3269 = vst [vmem:[#allocation2 + $0x1c0] sm:$0xff] %v6331_v16 }
 0x3ca   : > { %3270 = vst [vmem:[#allocation2 + $0x158] sm:$0xff] %v6332_v33  ;;  %3271 = vst [vmem:[#allocation2 + $0x10] sm:$0xff] %v5877_v62 }
 0x3cb   : > { %3272 = vst [vmem:[#allocation2 + $0x58] sm:$0xff] %v5882_v36  ;;  %3273 = vst [vmem:[#allocation2 + $0xa0] sm:$0xff] %v5887_v10 }
 0x3cc PF: > { %p4088_p11 = scmp.eq.s32.totalorder %s4692_s18, 0 }
 0x3ce   : > { %3277 = sbr.rel (%p4088_p11) target bundleno = 1019 (0x3fb), region = 52 }
 0x3d3   : > { %v3278_v60 = vld [vmem:[#allocation2 + $0xb0] sm:$0xff]  ;;  %v3280_v47 = vld [vmem:[#allocation2 + $0xd8] sm:$0xff]  ;;  %v3283_v46 = vld [vmem:[#allocation2 + $0x168] sm:$0xff] }
 0x3d4   : > { %v3279_v55 = vld [vmem:[#allocation2 + $0x1b0] sm:$0xff]  ;;  %v3342_v5 = vadd.f32 %v3278_v60, %v5529_v30  ;;  %v3344_v4 = vadd.f32 %v3280_v47, %v5541_v41  ;;  %v3281_v44 = vld [vmem:[#allocation2 + $0x18] sm:$0xff]  ;;  %v3347_v9 = vadd.f32 %v3283_v46, %v5560_v56  ;;  %v3285_v51 = vld [vmem:[#allocation2 + $0x48] sm:$0xff] }
 0x3d5   : > { %v3343_v18 = vadd.f32 %v3279_v55, %v5534_v37  ;;  %v3282_v39 = vld [vmem:[#allocation2 + $0x50] sm:$0xff]  ;;  %v3345_v14 = vadd.f32 %v3281_v44, %v5548_v11  ;;  %v3286_v19 = vld [vmem:[#allocation2 + $0x180] sm:$0xff]  ;;  %v3349_v37 = vadd.f32 %v3285_v51, %v5574_v24  ;;  %v3288_v20 = vld [vmem:[#allocation2 + $0x118] sm:$0xff] }
 0x3d6   : > { %v3346_v42 = vadd.f32 %v3282_v39, %v5555_v3  ;;  %v3284_v13 = vld [vmem:[#allocation2 + $0x130] sm:$0xff]  ;;  %3406 = vst [vmem:[#allocation2 + $0xb0] sm:$0xff] %v3342_v5  ;;  %3408 = vst [vmem:[#allocation2 + $0xd8] sm:$0xff] %v3344_v4  ;;  %v3350_v41 = vadd.f32 %v3286_v19, %v5581_v12  ;;  %v3289_v16 = vld [vmem:[#allocation2 + $0x98] sm:$0xff]  ;;  %v3352_v3 = vadd.f32 %v3288_v20, %v5593_v21 }
 0x3d7   : > { %3407 = vst [vmem:[#allocation2 + $0x1b0] sm:$0xff] %v3343_v18  ;;  %v3348_v30 = vadd.f32 %v3284_v13, %v5567_v22  ;;  %v3287_v43 = vld [vmem:[#allocation2 + $0x110] sm:$0xff]  ;;  %3409 = vst [vmem:[#allocation2 + $0x18] sm:$0xff] %v3345_v14  ;;  %v3353_v56 = vadd.f32 %v3289_v16, %v5600_v45  ;;  %v3290_v33 = vld [vmem:[#allocation2 + $0x120] sm:$0xff] }
 0x3d8   : > { %3410 = vst [vmem:[#allocation2 + $0x50] sm:$0xff] %v3346_v42  ;;  %3411 = vst [vmem:[#allocation2 + $0x168] sm:$0xff] %v3347_v9  ;;  %v3351_v11 = vadd.f32 %v3287_v43, %v5586_v40  ;;  %v3291_v60 = vld [vmem:[#allocation2 + $0x150] sm:$0xff]  ;;  %v3292_v55 = vld [vmem:[#allocation2 + $0x108] sm:$0xff]  ;;  %v3354_v22 = vadd.f32 %v3290_v33, %v5607_v58 }
 0x3d9   : > { %3412 = vst [vmem:[#allocation2 + $0x130] sm:$0xff] %v3348_v30  ;;  %3413 = vst [vmem:[#allocation2 + $0x48] sm:$0xff] %v3349_v37  ;;  %v3355_v24 = vadd.f32 %v3291_v60, %v5612_v63  ;;  %v3356_v12 = vadd.f32 %v3292_v55, %v5619_v50  ;;  %v3293_v47 = vld [vmem:[#allocation2 + $0x60] sm:$0xff]  ;;  %v3295_v18 = vld [vmem:[#allocation2 + $0x188] sm:$0xff] }
 0x3da   : > { %3414 = vst [vmem:[#allocation2 + $0x180] sm:$0xff] %v3350_v41  ;;  %v3294_v5 = vld [vmem:[#allocation2 + $0xe0] sm:$0xff]  ;;  %3415 = vst [vmem:[#allocation2 + $0x110] sm:$0xff] %v3351_v11  ;;  %v3357_v40 = vadd.f32 %v3293_v47, %v5626_v57  ;;  %v3359_v45 = vadd.f32 %v3295_v18, %v5638_v6  ;;  %v3296_v4 = vld [vmem:[#allocation2 + $0x138] sm:$0xff] }
 0x3db   : > { %3416 = vst [vmem:[#allocation2 + $0x118] sm:$0xff] %v3352_v3  ;;  %3417 = vst [vmem:[#allocation2 + $0x98] sm:$0xff] %v3353_v56  ;;  %v3358_v21 = vadd.f32 %v3294_v5, %v5633_v31  ;;  %v3297_v44 = vld [vmem:[#allocation2 + $0x140] sm:$0xff]  ;;  %v3360_v58 = vadd.f32 %v3296_v4, %v5645_v49  ;;  %v3299_v46 = vld [vmem:[#allocation2 + $0x1a8] sm:$0xff] }
 0x3dc   : > { %v3298_v39 = vld [vmem:[#allocation2 + $0x80] sm:$0xff]  ;;  %3418 = vst [vmem:[#allocation2 + $0x120] sm:$0xff] %v3354_v22  ;;  %3419 = vst [vmem:[#allocation2 + $0x150] sm:$0xff] %v3355_v24  ;;  %v3361_v63 = vadd.f32 %v3297_v44, %v5652_v32  ;;  %v3300_v14 = vld [vmem:[#allocation2 + $0x1b8] sm:$0xff]  ;;  %v3363_v57 = vadd.f32 %v3299_v46, %v5664_v27 }
 0x3dd   : > { %3420 = vst [vmem:[#allocation2 + $0x108] sm:$0xff] %v3356_v12  ;;  %v3362_v50 = vadd.f32 %v3298_v39, %v5659_v0  ;;  %v3301_v42 = vld [vmem:[#allocation2 + $0x28] sm:$0xff]  ;;  %3421 = vst [vmem:[#allocation2 + $0x60] sm:$0xff] %v3357_v40  ;;  %v3364_v31 = vadd.f32 %v3300_v14, %v5671_v17  ;;  %v3303_v13 = vld [vmem:[#allocation2 + $0xf8] sm:$0xff] }
 0x3de   : > { %3422 = vst [vmem:[#allocation2 + $0xe0] sm:$0xff] %v3358_v21  ;;  %3423 = vst [vmem:[#allocation2 + $0x188] sm:$0xff] %v3359_v45  ;;  %v3365_v6 = vadd.f32 %v3301_v42, %v5678_v48  ;;  %v3302_v9 = vld [vmem:[#allocation2 + $0x1e8] sm:$0xff]  ;;  %v3304_v51 = vld [vmem:[#allocation2 + $0x160] sm:$0xff]  ;;  %v3367_v32 = vadd.f32 %v3303_v13, %v5690_v7 }
 0x3df   : > { %3424 = vst [vmem:[#allocation2 + $0x138] sm:$0xff] %v3360_v58  ;;  %3425 = vst [vmem:[#allocation2 + $0x140] sm:$0xff] %v3361_v63  ;;  %v3366_v49 = vadd.f32 %v3302_v9, %v5685_v29  ;;  %v3368_v0 = vadd.f32 %v3304_v51, %v5697_v61  ;;  %v3305_v19 = vld [vmem:[#allocation2 + $0x30] sm:$0xff]  ;;  %v3306_v30 = vld [vmem:[#allocation2 + $0x1e0] sm:$0xff] }
 0x3e0   : > { %3426 = vst [vmem:[#allocation2 + $0x80] sm:$0xff] %v3362_v50  ;;  %v3307_v37 = vld [vmem:[#allocation2] sm:$0xff]  ;;  %3427 = vst [vmem:[#allocation2 + $0x1a8] sm:$0xff] %v3363_v57  ;;  %v3369_v27 = vadd.f32 %v3305_v19, %v5704_v1  ;;  %v3370_v17 = vadd.f32 %v3306_v30, %v5711_v23  ;;  %v3308_v43 = vld [vmem:[#allocation2 + $0xf0] sm:$0xff] }
 0x3e1   : > { %3428 = vst [vmem:[#allocation2 + $0x1b8] sm:$0xff] %v3364_v31  ;;  %3429 = vst [vmem:[#allocation2 + $0x28] sm:$0xff] %v3365_v6  ;;  %v6333_v48 = vld [vmem:[#allocation36_spill] sm:$0xff]  ;;  %v3309_v20 = vld [vmem:[#allocation2 + $0x8] sm:$0xff]  ;;  %v3372_v29 = vadd.f32 %v3308_v43, %v5722_v28 }
 0x3e2   : > { %v3371_v41 = vadd.f32 %v3307_v37, %v6333_v48  ;;  %v3310_v16 = vld [vmem:[#allocation2 + $0x148] sm:$0xff]  ;;  %3430 = vst [vmem:[#allocation2 + $0x1e8] sm:$0xff] %v3366_v49  ;;  %3431 = vst [vmem:[#allocation2 + $0xf8] sm:$0xff] %v3367_v32  ;;  %v3373_v7 = vadd.f32 %v3309_v20, %v5727_v35  ;;  %v3311_v11 = vld [vmem:[#allocation2 + $0x1d0] sm:$0xff] }
 0x3e3   : > { %3432 = vst [vmem:[#allocation2 + $0x160] sm:$0xff] %v3368_v0  ;;  %v3374_v61 = vadd.f32 %v3310_v16, %v5732_v59  ;;  %v3312_v3 = vld [vmem:[#allocation2 + $0x100] sm:$0xff]  ;;  %v3313_v56 = vld [vmem:[#allocation2 + $0xc8] sm:$0xff]  ;;  %3433 = vst [vmem:[#allocation2 + $0x30] sm:$0xff] %v3369_v27  ;;  %v3375_v1 = vadd.f32 %v3311_v11, %v5737_v25 }
 0x3e4   : > { %3434 = vst [vmem:[#allocation2 + $0x1e0] sm:$0xff] %v3370_v17  ;;  %3435 = vst [vmem:[#allocation2] sm:$0xff] %v3371_v41  ;;  %v3376_v23 = vadd.f32 %v3312_v3, %v5742_v8  ;;  %v3377_v33 = vadd.f32 %v3313_v56, %v5747_v38  ;;  %v3314_v60 = vld [vmem:[#allocation2 + $0x40] sm:$0xff]  ;;  %v3315_v55 = vld [vmem:[#allocation2 + $0x1f8] sm:$0xff] }
 0x3e5   : > { %v3316_v22 = vld [vmem:[#allocation2 + $0x20] sm:$0xff]  ;;  %3436 = vst [vmem:[#allocation2 + $0xf0] sm:$0xff] %v3372_v29  ;;  %3437 = vst [vmem:[#allocation2 + $0x8] sm:$0xff] %v3373_v7  ;;  %v3378_v28 = vadd.f32 %v3314_v60, %v5752_v54  ;;  %v3379_v35 = vadd.f32 %v3315_v55, %v5757_v52  ;;  %v3317_v24 = vld [vmem:[#allocation2 + $0x128] sm:$0xff] }
 0x3e6   : > { %3438 = vst [vmem:[#allocation2 + $0x148] sm:$0xff] %v3374_v61  ;;  %v3380_v59 = vadd.f32 %v3316_v22, %v5762_v26  ;;  %v3318_v12 = vld [vmem:[#allocation2 + $0x1a0] sm:$0xff]  ;;  %v3319_v47 = vld [vmem:[#allocation2 + $0x1f0] sm:$0xff]  ;;  %3439 = vst [vmem:[#allocation2 + $0x1d0] sm:$0xff] %v3375_v1  ;;  %v3381_v25 = vadd.f32 %v3317_v24, %v5767_v53 }
 0x3e7   : > { %3440 = vst [vmem:[#allocation2 + $0x100] sm:$0xff] %v3376_v23  ;;  %3441 = vst [vmem:[#allocation2 + $0xc8] sm:$0xff] %v3377_v33  ;;  %v3382_v8 = vadd.f32 %v3318_v12, %v5772_v2  ;;  %v3383_v38 = vadd.f32 %v3319_v47, %v5777_v15  ;;  %v3320_v5 = vld [vmem:[#allocation2 + $0xe8] sm:$0xff]  ;;  %v3321_v18 = vld [vmem:[#allocation2 + $0x78] sm:$0xff] }
 0x3e8   : > { %v3322_v40 = vld [vmem:[#allocation2 + $0x70] sm:$0xff]  ;;  %3442 = vst [vmem:[#allocation2 + $0x40] sm:$0xff] %v3378_v28  ;;  %3443 = vst [vmem:[#allocation2 + $0x1f8] sm:$0xff] %v3379_v35  ;;  %v3384_v54 = vadd.f32 %v3320_v5, %v5782_v34  ;;  %v6334_v52 = vld [vmem:[#allocation37_spill] sm:$0xff] }
 0x3e9   : > { %3444 = vst [vmem:[#allocation2 + $0x20] sm:$0xff] %v3380_v59  ;;  %v3385_v26 = vadd.f32 %v3321_v18, %v6334_v52  ;;  %v6335_v21 = vld [vmem:[#allocation38_spill] sm:$0xff]  ;;  %v3324_v44 = vld [vmem:[#allocation2 + $0x1d8] sm:$0xff]  ;;  %3445 = vst [vmem:[#allocation2 + $0x128] sm:$0xff] %v3381_v25 }
 0x3ea   : > { %v3386_v45 = vadd.f32 %v3322_v40, %v6335_v21  ;;  %v3323_v4 = vld [vmem:[#allocation2 + $0x90] sm:$0xff]  ;;  %3446 = vst [vmem:[#allocation2 + $0x1a0] sm:$0xff] %v3382_v8  ;;  %3447 = vst [vmem:[#allocation2 + $0x1f0] sm:$0xff] %v3383_v38  ;;  %v6336_v53 = vld [vmem:[#allocation17_spill] sm:$0xff] }
 0x3eb   : > { %v3325_v39 = vld [vmem:[#allocation2 + $0xd0] sm:$0xff]  ;;  %v3387_v2 = vadd.f32 %v3323_v4, %v6336_v53  ;;  %v3326_v46 = vld [vmem:[#allocation2 + $0xb8] sm:$0xff]  ;;  %v3327_v14 = vld [vmem:[#allocation2 + $0x88] sm:$0xff]  ;;  %3448 = vst [vmem:[#allocation2 + $0xe8] sm:$0xff] %v3384_v54 }
 0x3ec   : > { %v6337_v15 = vld [vmem:[#allocation18_spill] sm:$0xff]  ;;  %v6338_v63 = vld [vmem:[#allocation19_spill] sm:$0xff]  ;;  %3449 = vst [vmem:[#allocation2 + $0x78] sm:$0xff] %v3385_v26  ;;  %3450 = vst [vmem:[#allocation2 + $0x70] sm:$0xff] %v3386_v45 }
 0x3ed   : > { %v3388_v58 = vadd.f32 %v3324_v44, %v6337_v15  ;;  %v3389_v50 = vadd.f32 %v3325_v39, %v6338_v63  ;;  %v3328_v42 = vld [vmem:[#allocation2 + $0xa8] sm:$0xff]  ;;  %v6339_v34 = vld [vmem:[#allocation20_spill] sm:$0xff]  ;;  %v3330_v49 = vld [vmem:[#allocation2 + $0x170] sm:$0xff]  ;;  %3451 = vst [vmem:[#allocation2 + $0x90] sm:$0xff] %v3387_v2 }
 0x3ee   : > { %v3390_v57 = vadd.f32 %v3326_v46, %v6339_v34  ;;  %v6340_v31 = vld [vmem:[#allocation21_spill] sm:$0xff]  ;;  %v6341_v9 = vld [vmem:[#allocation22_spill] sm:$0xff]  ;;  %v3331_v32 = vld [vmem:[#allocation2 + $0x178] sm:$0xff] }
 0x3ef   : > { %v3391_v6 = vadd.f32 %v3327_v14, %v6340_v31  ;;  %v3392_v13 = vadd.f32 %v3328_v42, %v6341_v9  ;;  %v3329_v51 = vld [vmem:[#allocation2 + $0x1c8] sm:$0xff]  ;;  %3452 = vst [vmem:[#allocation2 + $0x1d8] sm:$0xff] %v3388_v58  ;;  %3453 = vst [vmem:[#allocation2 + $0xd0] sm:$0xff] %v3389_v50  ;;  %v6342_v0 = vld [vmem:[#allocation23_spill] sm:$0xff] }
 0x3f0   : > { %v3393_v19 = vadd.f32 %v3329_v51, %v6342_v0  ;;  %v6343_v30 = vld [vmem:[#allocation24_spill] sm:$0xff]  ;;  %v6344_v27 = vld [vmem:[#allocation25_spill] sm:$0xff]  ;;  %v3333_v41 = vld [vmem:[#allocation2 + $0x190] sm:$0xff]  ;;  %3454 = vst [vmem:[#allocation2 + $0xb8] sm:$0xff] %v3390_v57 }
 0x3f1   : > { %v3394_v37 = vadd.f32 %v3330_v49, %v6343_v30  ;;  %v3395_v17 = vadd.f32 %v3331_v32, %v6344_v27  ;;  %v3332_v48 = vld [vmem:[#allocation2 + $0x68] sm:$0xff]  ;;  %v3334_v43 = vld [vmem:[#allocation2 + $0x198] sm:$0xff]  ;;  %3455 = vst [vmem:[#allocation2 + $0x88] sm:$0xff] %v3391_v6  ;;  %3456 = vst [vmem:[#allocation2 + $0xa8] sm:$0xff] %v3392_v13 }
 0x3f2   : > { %v6345_v20 = vld [vmem:[#allocation26_spill] sm:$0xff]  ;;  %v6346_v29 = vld [vmem:[#allocation27_spill] sm:$0xff]  ;;  %v6347_v61 = vld [vmem:[#allocation28_spill] sm:$0xff]  ;;  %3457 = vst [vmem:[#allocation2 + $0x1c8] sm:$0xff] %v3393_v19 }
 0x3f3   : > { %v3396_v16 = vadd.f32 %v3332_v48, %v6345_v20  ;;  %v3397_v7 = vadd.f32 %v3333_v41, %v6346_v29  ;;  %v3398_v11 = vadd.f32 %v3334_v43, %v6347_v61  ;;  %v3335_v3 = vld [vmem:[#allocation2 + $0x38] sm:$0xff]  ;;  %v3336_v56 = vld [vmem:[#allocation2 + $0xc0] sm:$0xff]  ;;  %3458 = vst [vmem:[#allocation2 + $0x170] sm:$0xff] %v3394_v37  ;;  %3459 = vst [vmem:[#allocation2 + $0x178] sm:$0xff] %v3395_v17 }
 0x3f4   : > { %v3337_v1 = vld [vmem:[#allocation2 + $0x1c0] sm:$0xff]  ;;  %v6349_v60 = vld [vmem:[#allocation30_spill] sm:$0xff]  ;;  %v6350_v22 = vld [vmem:[#allocation31_spill] sm:$0xff] }
 0x3f5   : > { %v6348_v23 = vld [vmem:[#allocation29_spill] sm:$0xff]  ;;  %v3400_v55 = vadd.f32 %v3336_v56, %v6349_v60  ;;  %v3401_v28 = vadd.f32 %v3337_v1, %v6350_v22  ;;  %v3338_v35 = vld [vmem:[#allocation2 + $0x158] sm:$0xff]  ;;  %v3339_v59 = vld [vmem:[#allocation2 + $0x10] sm:$0xff]  ;;  %3460 = vst [vmem:[#allocation2 + $0x68] sm:$0xff] %v3396_v16 }
 0x3f6   : > { %v3399_v33 = vadd.f32 %v3335_v3, %v6348_v23  ;;  %v3340_v24 = vld [vmem:[#allocation2 + $0x58] sm:$0xff]  ;;  %3461 = vst [vmem:[#allocation2 + $0x190] sm:$0xff] %v3397_v7  ;;  %3462 = vst [vmem:[#allocation2 + $0x198] sm:$0xff] %v3398_v11  ;;  %v3403_v25 = vadd.f32 %v3339_v59, %v5877_v62  ;;  %v3341_v38 = vld [vmem:[#allocation2 + $0xa0] sm:$0xff] }
 0x3f7   : > { %v6351_v12 = vld [vmem:[#allocation32_spill] sm:$0xff]  ;;  %v3404_v8 = vadd.f32 %v3340_v24, %v5882_v36  ;;  %3464 = vst [vmem:[#allocation2 + $0xc0] sm:$0xff] %v3400_v55  ;;  %3465 = vst [vmem:[#allocation2 + $0x1c0] sm:$0xff] %v3401_v28  ;;  %v3405_v5 = vadd.f32 %v3341_v38, %v5887_v10 }
 0x3f8   : > { %v3402_v47 = vadd.f32 %v3338_v35, %v6351_v12  ;;  %3463 = vst [vmem:[#allocation2 + $0x38] sm:$0xff] %v3399_v33  ;;  %3467 = vst [vmem:[#allocation2 + $0x10] sm:$0xff] %v3403_v25 }
 0x3f9   : > { %3468 = vst [vmem:[#allocation2 + $0x58] sm:$0xff] %v3404_v8  ;;  %3469 = vst [vmem:[#allocation2 + $0xa0] sm:$0xff] %v3405_v5 }
 0x3fa   : > { %3466 = vst [vmem:[#allocation2 + $0x158] sm:$0xff] %v3402_v47 }
 0x3fb PF: > { %p4089_p13 = scmp.ne.s32.totalorder %s4692_s18, 2 }
 0x3fd   : > { %3473 = sbr.rel (%p4089_p13) target bundleno = 1063 (0x427), region = 56 }
 0x402   : > { %v3474_v18 = vld [vmem:[#allocation2 + $0xb0] sm:$0xff]  ;;  %v6026_v62 = vld [vmem:[%s224_s10] ss:$0 sm:$0xff]  ;;  %v3476_v52 = vld [vmem:[#allocation2 + $0xd8] sm:$0xff] }
 0x403   : > { %v3475_v36 = vld [vmem:[#allocation2 + $0x1b0] sm:$0xff]  ;;  %v3545_v40 = vadd.f32 %v6026_v62, %v3474_v18  ;;  %v3477_v10 = vld [vmem:[#allocation2 + $0x18] sm:$0xff]  ;;  %v3547_v21 = vadd.f32 %v6026_v62, %v3476_v52  ;;  %v3479_v44 = vld [vmem:[#allocation2 + $0x168] sm:$0xff] }
 0x404   : > { %v3546_v54 = vadd.f32 %v6026_v62, %v3475_v36  ;;  %v3478_v26 = vld [vmem:[#allocation2 + $0x50] sm:$0xff]  ;;  %v3548_v45 = vadd.f32 %v6026_v62, %v3477_v10  ;;  %v3481_v53 = vld [vmem:[#allocation2 + $0x48] sm:$0xff]  ;;  %v3550_v58 = vadd.f32 %v6026_v62, %v3479_v44  ;;  %v3482_v50 = vld [vmem:[#allocation2 + $0x180] sm:$0xff] }
 0x405   : > { %v3549_v4 = vadd.f32 %v6026_v62, %v3478_v26  ;;  %v3480_v39 = vld [vmem:[#allocation2 + $0x130] sm:$0xff]  ;;  %v3609_v2 = vmax.f32 %v3545_v40, 0.0  ;;  %v3484_v14 = vld [vmem:[#allocation2 + $0x118] sm:$0xff]  ;;  %v3611_v42 = vmax.f32 %v3547_v21, 0.0  ;;  %v3552_v31 = vadd.f32 %v6026_v62, %v3481_v53  ;;  %v3486_v9 = vld [vmem:[#allocation2 + $0x120] sm:$0xff] }
 0x406   : > { %v3610_v15 = vmax.f32 %v3546_v54, 0.0  ;;  %v3551_v63 = vadd.f32 %v6026_v62, %v3480_v39  ;;  %v3483_v46 = vld [vmem:[#allocation2 + $0x110] sm:$0xff]  ;;  %v3612_v34 = vmax.f32 %v3548_v45, 0.0  ;;  %v3485_v6 = vld [vmem:[#allocation2 + $0x98] sm:$0xff]  ;;  %v3614_v51 = vmax.f32 %v3550_v58, 0.0  ;;  %v3488_v19 = vld [vmem:[#allocation2 + $0x108] sm:$0xff] }
 0x407   : > { %v3613_v57 = vmax.f32 %v3549_v4, 0.0  ;;  %v3487_v13 = vld [vmem:[#allocation2 + $0x150] sm:$0xff]  ;;  %3673 = vst [vmem:[%s5891_s26] sm:$0xff] %v3609_v2  ;;  %v3553_v32 = vadd.f32 %v6026_v62, %v3482_v50  ;;  %v3554_v0 = vadd.f32 %v6026_v62, %v3483_v46  ;;  %v3489_v30 = vld [vmem:[#allocation2 + $0x60] sm:$0xff]  ;;  %3675 = vst [vmem:[%s5891_s26 + $0x10] sm:$0xff] %v3611_v42  ;;  %v3616_v37 = vmax.f32 %v3552_v31, 0.0 }
 0x408   : > { %3674 = vst [vmem:[%s5891_s26 + $0x8] sm:$0xff] %v3610_v15  ;;  %v3615_v49 = vmax.f32 %v3551_v63, 0.0  ;;  %3676 = vst [vmem:[%s5891_s26 + $0x18] sm:$0xff] %v3612_v34  ;;  %v3555_v27 = vadd.f32 %v6026_v62, %v3484_v14  ;;  %v3556_v17 = vadd.f32 %v6026_v62, %v3485_v6  ;;  %v3557_v48 = vadd.f32 %v6026_v62, %v3486_v9  ;;  %v3490_v41 = vld [vmem:[#allocation2 + $0xe0] sm:$0xff]  ;;  %v3491_v43 = vld [vmem:[#allocation2 + $0x188] sm:$0xff] }
 0x409   : > { %3677 = vst [vmem:[%s5891_s26 + $0x20] sm:$0xff] %v3613_v57  ;;  %3678 = vst [vmem:[%s5891_s26 + $0x28] sm:$0xff] %v3614_v51  ;;  %v3617_v20 = vmax.f32 %v3553_v32, 0.0  ;;  %v3618_v16 = vmax.f32 %v3554_v0, 0.0  ;;  %v3558_v29 = vadd.f32 %v6026_v62, %v3487_v13  ;;  %v3559_v7 = vadd.f32 %v6026_v62, %v3488_v19  ;;  %v3492_v61 = vld [vmem:[#allocation2 + $0x138] sm:$0xff]  ;;  %v3493_v11 = vld [vmem:[#allocation2 + $0x140] sm:$0xff] }
 0x40a   : > { %3679 = vst [vmem:[%s5891_s26 + $0x30] sm:$0xff] %v3615_v49  ;;  %v3494_v3 = vld [vmem:[#allocation2 + $0x80] sm:$0xff]  ;;  %3680 = vst [vmem:[%s5891_s26 + $0x38] sm:$0xff] %v3616_v37  ;;  %v3619_v56 = vmax.f32 %v3555_v27, 0.0  ;;  %v3620_v1 = vmax.f32 %v3556_v17, 0.0  ;;  %v3621_v23 = vmax.f32 %v3557_v48, 0.0  ;;  %v3560_v33 = vadd.f32 %v6026_v62, %v3489_v30 }
 0x40b   : > { %v3495_v60 = vld [vmem:[#allocation2 + $0x1a8] sm:$0xff]  ;;  %v3496_v55 = vld [vmem:[#allocation2 + $0x1b8] sm:$0xff]  ;;  %3681 = vst [vmem:[%s5891_s26 + $0x40] sm:$0xff] %v3617_v20  ;;  %3682 = vst [vmem:[%s5891_s26 + $0x48] sm:$0xff] %v3618_v16  ;;  %v3622_v22 = vmax.f32 %v3558_v29, 0.0  ;;  %v3623_v28 = vmax.f32 %v3559_v7, 0.0  ;;  %v3561_v35 = vadd.f32 %v6026_v62, %v3490_v41  ;;  %v3562_v59 = vadd.f32 %v6026_v62, %v3491_v43 }
 0x40c   : > { %v3497_v24 = vld [vmem:[#allocation2 + $0x28] sm:$0xff]  ;;  %3683 = vst [vmem:[%s5891_s26 + $0x50] sm:$0xff] %v3619_v56  ;;  %3684 = vst [vmem:[%s5891_s26 + $0x58] sm:$0xff] %v3620_v1  ;;  %v3624_v12 = vmax.f32 %v3560_v33, 0.0  ;;  %v3563_v47 = vadd.f32 %v6026_v62, %v3492_v61  ;;  %v3564_v25 = vadd.f32 %v6026_v62, %v3493_v11  ;;  %v3565_v8 = vadd.f32 %v6026_v62, %v3494_v3  ;;  %v3499_v5 = vld [vmem:[#allocation2 + $0xf8] sm:$0xff] }
 0x40d   : > { %3685 = vst [vmem:[%s5891_s26 + $0x60] sm:$0xff] %v3621_v23  ;;  %v3498_v38 = vld [vmem:[#allocation2 + $0x1e8] sm:$0xff]  ;;  %3686 = vst [vmem:[%s5891_s26 + $0x68] sm:$0xff] %v3622_v22  ;;  %v3625_v18 = vmax.f32 %v3561_v35, 0.0  ;;  %v3626_v36 = vmax.f32 %v3562_v59, 0.0  ;;  %v3566_v40 = vadd.f32 %v6026_v62, %v3495_v60  ;;  %v3567_v54 = vadd.f32 %v6026_v62, %v3496_v55  ;;  %v3500_v52 = vld [vmem:[#allocation2 + $0x160] sm:$0xff] }
 0x40e   : > { %3687 = vst [vmem:[%s5891_s26 + $0x70] sm:$0xff] %v3623_v28  ;;  %v3501_v10 = vld [vmem:[#allocation2 + $0x30] sm:$0xff]  ;;  %v3502_v26 = vld [vmem:[#allocation2 + $0x1e0] sm:$0xff]  ;;  %3688 = vst [vmem:[%s5891_s26 + $0x78] sm:$0xff] %v3624_v12  ;;  %v3627_v21 = vmax.f32 %v3563_v47, 0.0  ;;  %v3628_v45 = vmax.f32 %v3564_v25, 0.0  ;;  %v3568_v44 = vadd.f32 %v6026_v62, %v3497_v24  ;;  %v3569_v58 = vadd.f32 %v6026_v62, %v3498_v38 }
 0x40f   : > { %v3629_v4 = vmax.f32 %v3565_v8, 0.0  ;;  %v3503_v39 = vld [vmem:[#allocation2] sm:$0xff]  ;;  %v3504_v53 = vld [vmem:[#allocation2 + $0xf0] sm:$0xff]  ;;  %3689 = vst [vmem:[%s5891_s26 + $0x80] sm:$0xff] %v3625_v18  ;;  %3690 = vst [vmem:[%s5891_s26 + $0x88] sm:$0xff] %v3626_v36  ;;  %v3630_v2 = vmax.f32 %v3566_v40, 0.0  ;;  %v3570_v63 = vadd.f32 %v6026_v62, %v3499_v5  ;;  %v3571_v14 = vadd.f32 %v6026_v62, %v3500_v52 }
 0x410   : > { %v3631_v15 = vmax.f32 %v3567_v54, 0.0  ;;  %v3505_v50 = vld [vmem:[#allocation2 + $0x8] sm:$0xff]  ;;  %3691 = vst [vmem:[%s5891_s26 + $0x90] sm:$0xff] %v3627_v21  ;;  %3692 = vst [vmem:[%s5891_s26 + $0x98] sm:$0xff] %v3628_v45  ;;  %v3632_v46 = vmax.f32 %v3568_v44, 0.0  ;;  %v3572_v42 = vadd.f32 %v6026_v62, %v3501_v10  ;;  %v3573_v34 = vadd.f32 %v6026_v62, %v3502_v26  ;;  %v3507_v31 = vld [vmem:[#allocation2 + $0x1d0] sm:$0xff] }
 0x411   : > { %3693 = vst [vmem:[%s5891_s26 + $0xa0] sm:$0xff] %v3629_v4  ;;  %v3506_v57 = vld [vmem:[#allocation2 + $0x148] sm:$0xff]  ;;  %3694 = vst [vmem:[%s5891_s26 + $0xa8] sm:$0xff] %v3630_v2  ;;  %v3633_v6 = vmax.f32 %v3569_v58, 0.0  ;;  %v3634_v9 = vmax.f32 %v3570_v63, 0.0  ;;  %v3574_v13 = vadd.f32 %v6026_v62, %v3503_v39  ;;  %v3575_v51 = vadd.f32 %v6026_v62, %v3504_v53  ;;  %v3508_v49 = vld [vmem:[#allocation2 + $0x100] sm:$0xff] }
 0x412   : > { %3695 = vst [vmem:[%s5891_s26 + $0xb0] sm:$0xff] %v3631_v15  ;;  %v3509_v32 = vld [vmem:[#allocation2 + $0xc8] sm:$0xff]  ;;  %v3510_v0 = vld [vmem:[#allocation2 + $0x40] sm:$0xff]  ;;  %3696 = vst [vmem:[%s5891_s26 + $0xb8] sm:$0xff] %v3632_v46  ;;  %v3635_v19 = vmax.f32 %v3571_v14, 0.0  ;;  %v3636_v30 = vmax.f32 %v3572_v42, 0.0  ;;  %v3576_v27 = vadd.f32 %v6026_v62, %v3505_v50  ;;  %v3577_v20 = vadd.f32 %v6026_v62, %v3506_v57 }
 0x413   : > { %v3637_v37 = vmax.f32 %v3573_v34, 0.0  ;;  %v3511_v17 = vld [vmem:[#allocation2 + $0x1f8] sm:$0xff]  ;;  %v3512_v48 = vld [vmem:[#allocation2 + $0x20] sm:$0xff]  ;;  %3697 = vst [vmem:[%s5891_s26 + $0xc0] sm:$0xff] %v3633_v6  ;;  %3698 = vst [vmem:[%s5891_s26 + $0xc8] sm:$0xff] %v3634_v9  ;;  %v3638_v41 = vmax.f32 %v3574_v13, 0.0  ;;  %v3578_v16 = vadd.f32 %v6026_v62, %v3507_v31  ;;  %v3579_v61 = vadd.f32 %v6026_v62, %v3508_v49 }
 0x414   : > { %v3639_v43 = vmax.f32 %v3575_v51, 0.0  ;;  %v3513_v29 = vld [vmem:[#allocation2 + $0x128] sm:$0xff]  ;;  %3699 = vst [vmem:[%s5891_s26 + $0xd0] sm:$0xff] %v3635_v19  ;;  %3700 = vst [vmem:[%s5891_s26 + $0xd8] sm:$0xff] %v3636_v30  ;;  %v3640_v7 = vmax.f32 %v3576_v27, 0.0  ;;  %v3580_v11 = vadd.f32 %v6026_v62, %v3509_v32  ;;  %v3581_v3 = vadd.f32 %v6026_v62, %v3510_v0  ;;  %v3514_v56 = vld [vmem:[#allocation2 + $0x1a0] sm:$0xff] }
 0x415   : > { %3701 = vst [vmem:[%s5891_s26 + $0xe0] sm:$0xff] %v3637_v37  ;;  %v3515_v1 = vld [vmem:[#allocation2 + $0x1f0] sm:$0xff]  ;;  %3702 = vst [vmem:[%s5891_s26 + $0xe8] sm:$0xff] %v3638_v41  ;;  %v3641_v23 = vmax.f32 %v3577_v20, 0.0  ;;  %v3642_v33 = vmax.f32 %v3578_v16, 0.0  ;;  %v3582_v60 = vadd.f32 %v6026_v62, %v3511_v17  ;;  %v3583_v55 = vadd.f32 %v6026_v62, %v3512_v48  ;;  %v3516_v22 = vld [vmem:[#allocation2 + $0xe8] sm:$0xff] }
 0x416   : > { %3703 = vst [vmem:[%s5891_s26 + $0xf0] sm:$0xff] %v3639_v43  ;;  %v3517_v28 = vld [vmem:[#allocation2 + $0x78] sm:$0xff]  ;;  %v3518_v35 = vld [vmem:[#allocation2 + $0x70] sm:$0xff]  ;;  %3704 = vst [vmem:[%s5891_s26 + $0xf8] sm:$0xff] %v3640_v7  ;;  %v3643_v59 = vmax.f32 %v3579_v61, 0.0  ;;  %v3644_v24 = vmax.f32 %v3580_v11, 0.0  ;;  %v3584_v47 = vadd.f32 %v6026_v62, %v3513_v29  ;;  %v3585_v18 = vadd.f32 %v6026_v62, %v3514_v56 }
 0x417   : > { %v3645_v12 = vmax.f32 %v3581_v3, 0.0  ;;  %v3519_v25 = vld [vmem:[#allocation2 + $0x90] sm:$0xff]  ;;  %v3520_v8 = vld [vmem:[#allocation2 + $0x1d8] sm:$0xff]  ;;  %3705 = vst [vmem:[%s5891_s26 + $0x100] sm:$0xff] %v3641_v23  ;;  %3706 = vst [vmem:[%s5891_s26 + $0x108] sm:$0xff] %v3642_v33  ;;  %v3646_v38 = vmax.f32 %v3582_v60, 0.0  ;;  %v3586_v36 = vadd.f32 %v6026_v62, %v3515_v1  ;;  %v3587_v52 = vadd.f32 %v6026_v62, %v3516_v22 }
 0x418   : > { %v3647_v5 = vmax.f32 %v3583_v55, 0.0  ;;  %v3521_v40 = vld [vmem:[#allocation2 + $0xd0] sm:$0xff]  ;;  %3707 = vst [vmem:[%s5891_s26 + $0x110] sm:$0xff] %v3643_v59  ;;  %3708 = vst [vmem:[%s5891_s26 + $0x118] sm:$0xff] %v3644_v24  ;;  %v3648_v54 = vmax.f32 %v3584_v47, 0.0  ;;  %v3588_v10 = vadd.f32 %v6026_v62, %v3517_v28  ;;  %v3589_v26 = vadd.f32 %v6026_v62, %v3518_v35  ;;  %v3522_v21 = vld [vmem:[#allocation2 + $0xb8] sm:$0xff] }
 0x419   : > { %3709 = vst [vmem:[%s5891_s26 + $0x120] sm:$0xff] %v3645_v12  ;;  %v3523_v45 = vld [vmem:[#allocation2 + $0x88] sm:$0xff]  ;;  %3710 = vst [vmem:[%s5891_s26 + $0x128] sm:$0xff] %v3646_v38  ;;  %v3649_v4 = vmax.f32 %v3585_v18, 0.0  ;;  %v3650_v44 = vmax.f32 %v3586_v36, 0.0  ;;  %v3590_v39 = vadd.f32 %v6026_v62, %v3519_v25  ;;  %v3591_v53 = vadd.f32 %v6026_v62, %v3520_v8  ;;  %v3526_v58 = vld [vmem:[#allocation2 + $0x170] sm:$0xff] }
 0x41a   : > { %3711 = vst [vmem:[%s5891_s26 + $0x130] sm:$0xff] %v3647_v5  ;;  %v3524_v2 = vld [vmem:[#allocation2 + $0xa8] sm:$0xff]  ;;  %3712 = vst [vmem:[%s5891_s26 + $0x138] sm:$0xff] %v3648_v54  ;;  %v3651_v63 = vmax.f32 %v3587_v52, 0.0  ;;  %v3652_v50 = vmax.f32 %v3588_v10, 0.0  ;;  %v3653_v46 = vmax.f32 %v3589_v26, 0.0  ;;  %v3592_v14 = vadd.f32 %v6026_v62, %v3521_v40 }
 0x41b   : > { %v3525_v15 = vld [vmem:[#allocation2 + $0x1c8] sm:$0xff]  ;;  %v3527_v42 = vld [vmem:[#allocation2 + $0x178] sm:$0xff]  ;;  %3713 = vst [vmem:[%s5891_s26 + $0x140] sm:$0xff] %v3649_v4  ;;  %3714 = vst [vmem:[%s5891_s26 + $0x148] sm:$0xff] %v3650_v44  ;;  %v3654_v57 = vmax.f32 %v3590_v39, 0.0  ;;  %v3655_v31 = vmax.f32 %v3591_v53, 0.0  ;;  %v3593_v6 = vadd.f32 %v6026_v62, %v3522_v21  ;;  %v3594_v9 = vadd.f32 %v6026_v62, %v3523_v45 }
 0x41c   : > { %v3528_v34 = vld [vmem:[#allocation2 + $0x68] sm:$0xff]  ;;  %v3529_v13 = vld [vmem:[#allocation2 + $0x190] sm:$0xff]  ;;  %3715 = vst [vmem:[%s5891_s26 + $0x150] sm:$0xff] %v3651_v63  ;;  %3716 = vst [vmem:[%s5891_s26 + $0x158] sm:$0xff] %v3652_v50  ;;  %v3656_v51 = vmax.f32 %v3592_v14, 0.0  ;;  %v3595_v49 = vadd.f32 %v6026_v62, %v3524_v2  ;;  %v3596_v32 = vadd.f32 %v6026_v62, %v3525_v15  ;;  %v3597_v0 = vadd.f32 %v6026_v62, %v3526_v58 }
 0x41d   : > { %3717 = vst [vmem:[%s5891_s26 + $0x160] sm:$0xff] %v3653_v46  ;;  %v3530_v19 = vld [vmem:[#allocation2 + $0x198] sm:$0xff]  ;;  %3718 = vst [vmem:[%s5891_s26 + $0x168] sm:$0xff] %v3654_v57  ;;  %v3657_v37 = vmax.f32 %v3593_v6, 0.0  ;;  %v3658_v27 = vmax.f32 %v3594_v9, 0.0  ;;  %v3598_v17 = vadd.f32 %v6026_v62, %v3527_v42  ;;  %v3599_v48 = vadd.f32 %v6026_v62, %v3528_v34  ;;  %v3532_v41 = vld [vmem:[#allocation2 + $0xc0] sm:$0xff] }
 0x41e   : > { %v3531_v30 = vld [vmem:[#allocation2 + $0x38] sm:$0xff]  ;;  %3719 = vst [vmem:[%s5891_s26 + $0x170] sm:$0xff] %v3655_v31  ;;  %v3533_v43 = vld [vmem:[#allocation2 + $0x1c0] sm:$0xff]  ;;  %3720 = vst [vmem:[%s5891_s26 + $0x178] sm:$0xff] %v3656_v51  ;;  %v3659_v16 = vmax.f32 %v3595_v49, 0.0  ;;  %v3660_v29 = vmax.f32 %v3596_v32, 0.0  ;;  %v3600_v61 = vadd.f32 %v6026_v62, %v3529_v13  ;;  %v3601_v23 = vadd.f32 %v6026_v62, %v3530_v19 }
 0x41f   : > { %v3534_v20 = vld [vmem:[#allocation2 + $0x158] sm:$0xff]  ;;  %v3661_v7 = vmax.f32 %v3597_v0, 0.0  ;;  %v3535_v11 = vld [vmem:[#allocation2 + $0x10] sm:$0xff]  ;;  %3721 = vst [vmem:[%s5891_s26 + $0x180] sm:$0xff] %v3657_v37  ;;  %3722 = vst [vmem:[%s5891_s26 + $0x188] sm:$0xff] %v3658_v27  ;;  %v3662_v56 = vmax.f32 %v3598_v17, 0.0  ;;  %v3602_v33 = vadd.f32 %v6026_v62, %v3531_v30  ;;  %v3603_v22 = vadd.f32 %v6026_v62, %v3532_v41 }
 0x420   : > { %v3536_v3 = vld [vmem:[#allocation2 + $0x58] sm:$0xff]  ;;  %v3663_v1 = vmax.f32 %v3599_v48, 0.0  ;;  %v3537_v60 = vld [vmem:[#allocation2 + $0xa0] sm:$0xff]  ;;  %3723 = vst [vmem:[%s5891_s26 + $0x190] sm:$0xff] %v3659_v16  ;;  %3724 = vst [vmem:[%s5891_s26 + $0x198] sm:$0xff] %v3660_v29  ;;  %v3664_v55 = vmax.f32 %v3600_v61, 0.0  ;;  %v3604_v28 = vadd.f32 %v6026_v62, %v3533_v43  ;;  %v3605_v35 = vadd.f32 %v6026_v62, %v3534_v20 }
 0x421   : > { %3725 = vst [vmem:[%s5891_s26 + $0x1a0] sm:$0xff] %v3661_v7  ;;  %3726 = vst [vmem:[%s5891_s26 + $0x1a8] sm:$0xff] %v3662_v56  ;;  %v3665_v59 = vmax.f32 %v3601_v23, 0.0  ;;  %v3666_v24 = vmax.f32 %v3602_v33, 0.0  ;;  %v3606_v12 = vadd.f32 %v6026_v62, %v3535_v11  ;;  %v3607_v47 = vadd.f32 %v6026_v62, %v3536_v3 }
 0x422   : > { %3727 = vst [vmem:[%s5891_s26 + $0x1b0] sm:$0xff] %v3663_v1  ;;  %3728 = vst [vmem:[%s5891_s26 + $0x1b8] sm:$0xff] %v3664_v55  ;;  %v3667_v25 = vmax.f32 %v3603_v22, 0.0  ;;  %v3668_v8 = vmax.f32 %v3604_v28, 0.0  ;;  %v3669_v38 = vmax.f32 %v3605_v35, 0.0  ;;  %v3608_v5 = vadd.f32 %v6026_v62, %v3537_v60 }
 0x423   : > { %3729 = vst [vmem:[%s5891_s26 + $0x1c0] sm:$0xff] %v3665_v59  ;;  %3730 = vst [vmem:[%s5891_s26 + $0x1c8] sm:$0xff] %v3666_v24  ;;  %v3670_v18 = vmax.f32 %v3606_v12, 0.0  ;;  %v3671_v36 = vmax.f32 %v3607_v47, 0.0 }
 0x424   : > { %3731 = vst [vmem:[%s5891_s26 + $0x1d0] sm:$0xff] %v3667_v25  ;;  %3732 = vst [vmem:[%s5891_s26 + $0x1d8] sm:$0xff] %v3668_v8  ;;  %v3672_v40 = vmax.f32 %v3608_v5, 0.0 }
 0x425   : > { %3733 = vst [vmem:[%s5891_s26 + $0x1e0] sm:$0xff] %v3669_v38  ;;  %3734 = vst [vmem:[%s5891_s26 + $0x1e8] sm:$0xff] %v3670_v18 }
 0x426   : > { %3735 = vst [vmem:[%s5891_s26 + $0x1f0] sm:$0xff] %v3671_v36  ;;  %3736 = vst [vmem:[%s5891_s26 + $0x1f8] sm:$0xff] %v3672_v40 }
 0x427 PF: > { %s4092_s18 = sshll.u32 %s4696_s19, 7  ;;  %s3750_s4 = sshll.u32 %s5891_s26, 4  ;;  %s6163_s4 = int_to_ptr.vmem [resolvable:$true] %s3750_s4 }
 0x428   : > { %s6160_s27 = scalar_lea.hbm %s6228_s3, %s4092_s18  ;;  %s3738_s15 = scalar_lea.sflag [#allocation5], %s4934_s20 }
 0x429   : > { %s4580_s0 = scalar_lea.vmem %s6163_s4, 8192  ;;  %p6352_p4 = scmp.ne.s32.totalorder %s6251_s8, 0 }
 0x42a   : > { %p4581_p1 = scmp.ne.s32.totalorder %s6163_s4, %s4580_s0  ;;  %s4718_s1 = smov [#allocation9]  }
 0x42b   : > { %s4584_s24 = sshll.u32 %s4718_s1, 4  ;;  %s4585_s24 = int_to_ptr.vmem [resolvable:$false] %s4584_s24 }
 0x42c   : > { %p4582_p0 = pnand %p4581_p1, %p6352_p4  ;;  %s4586_s19 = scalar_lea.vmem %s4585_s24, 16384 }
 0x42d   : > { %p4587_p5 = scmp.lt.s32.totalorder %s6163_s4, %s4585_s24  ;;  %p4588_p6 = scmp.lt.s32.totalorder %s4586_s19, %s4580_s0 }
 0x42e   : > { %p4583_p2 = pneg %p4582_p0 }
 0x42f   : > { %p4589_p9 = por %p4588_p6, %p4587_p5 }
 0x431   : > { %p4590_p12 = pnand %p4589_p9, %p4583_p2 }
 0x433   : > { %4593 = shalt.err (!%p4590_p12)
}
 0x434   : > { %s4594_s11 = scalar_lea.hbm %s6160_s27, 8192  ;;  %s4598_s28 = scalar_lea.hbm %s6228_s3, 16384 }
 0x435   : > { %p4595_p3 = scmp.ne.s32.totalorder %s6160_s27, %s4594_s11  ;;  %p4599_p7 = scmp.lt.s32.totalorder %s6160_s27, %s6228_s3 }
 0x436   : > { %p4600_p11 = scmp.lt.s32.totalorder %s4598_s28, %s4594_s11 }
 0x437   : > { %p4596_p8 = pnand %p4595_p3, %p6352_p4 }
 0x438   : > { %p4601_p13 = por %p4600_p11, %p4599_p7 }
 0x439   : > { %p4597_p10 = pneg %p4596_p8 }
 0x43b   : > { %p4602_p1 = pnand %p4601_p13, %p4597_p10 }
 0x43d   : > { %4605 = shalt.err (!%p4602_p1)
}
 0x43e   : > { %s4719_s26 = smov 128   ;;  %s4720_s18 = smov 256  }
 0x43f   : > { %s4721_s5 = smov 8  }
 0x440   : > { %4140 = dma.vmem_to_hbm [thread:$0]  (%p6352_p4), %s6163_s4, 8192, %s6160_s27, %s3738_s15, %s4719_s26, %s4720_s18, %s4721_s5  }
 0x441 PF: > { %p4160_p0 = scmp.ge.s32.totalorder %s4708_s22, 2  ;;  %s3765_s25 = sand.u32 1, %s4668_s12  }
 0x442   : > { %p6353_p2 = scmp.ne.s32.totalorder %s6252_s30, 0  ;;  %s3766_s0 = scalar_lea.sflag [#allocation5], %s3765_s25 }
 0x444   : > { %p4154_p5 = pnand %p4160_p0, %p6353_p2 }
 0x446   : > { %p4155_p6 = pneg %p4154_p5 }
 0x448   : > { %4663 = dma.done.wait (%p4155_p6), %s3766_s0, 8192  }
 0x449   : > { %4665 = vsyncadd (%p4155_p6), %s3766_s0, 4294959104  ;;  %s20_s22 = sadd.s32 1, %s4708_s22   ;;  %s6354_s18 = sld [smem:[#allocation14_spill]] }
 0x44a   : > { %p17_p9 = scmp.ge.s32.totalorder %s20_s22, 8   ;;  %s6355_s20 = sld [smem:[#allocation15_spill]] }
 0x44b   : > { %s6356_s8 = sld [smem:[#allocation16_spill]]  ;;  %s6357_s12 = smov %s4672_s13 }
 0x44c   : > { %s6358_s13 = smov %s4676_s14  ;;  %s6359_s14 = smov %s4879_s7 }
 0x44d   : > { %s6360_s15 = smov %s4684_s16  ;;  %s6361_s16 = smov %s4688_s17 }
 0x44e   : > { %s6362_s17 = smov %s4827_s9  ;;  %s6363_s19 = smov %s4704_s21 }
 0x44f   :  { %19 = sbr.rel (!%p17_p9) target bundleno = 13 (0xd), region = 108 }
 0x451   : > { %s6364_s21 = smov %s6356_s8 }
 0x454   :  { %3771 = vsyncpa [#allocation4], 1 }
 0x455   :  { %3773 = vsyncpa [#allocation4 + $0x1], 1 }
 0x456   :  { %3774 = vsyncpa [#allocation7], 1 }
 0x457   :  { %3776 = vsyncpa [#allocation7 + $0x1], 1 }
 0x458   :  { %3777 = vsyncpa [#allocation5], 1 }
 0x459   :  { %3779 = vsyncpa [#allocation5 + $0x1], 1 }

</bundles_post_ra>
